<compile_context>
chip_gen: v7x
topology: tpu7x:2x2x1
jax: 0.10.0
libtpu: 0.0.40
codegen_flags: <defaults>
</compile_context>

<pallas_src>
from functools import partial

import jax
import jax.numpy as jnp
from jax import lax
from jax.experimental import pallas as pl
from jax.experimental.pallas import tpu as pltpu


C1 = 6      # conv output channels
KHW = 3     # conv kernel size
HID = 64    # hidden width of layer2
TB = 128    # batch tile per grid step (lane width)
RC = 4      # pooled rows per unrolled chunk (bounds live vregs)


# ---------------------------------------------------------------------------
# Fused Pallas kernel (one grid step == TB samples)
# ---------------------------------------------------------------------------
def _net_cf_kernel(xd_ref, w1_ref, b1_ref, w2_ref, b2_ref, w3_ref, b3_ref,
                   o_ref, featc_ref, fc1_ref, *, ph, pw, pwp):
    # xd_ref   : (1, 2, 4, ph+1, pw, TB)  phase planes,
    #            xd[0,p,s,a,j,t] = x[t, 0, 2a+p, 2j+s]; batch tile in lanes
    # w1_ref   : SMEM (C1*9,)  conv weight, flat index c*9 + di*3 + dj
    # b1_ref   : SMEM (C1,)    conv bias
    # w2_ref   : (C1, HID, ph*pwp)  FC1 weight per channel, cols zero-padded
    # b2_ref   : (HID, 1)
    # w3_ref   : (HID, 1)
    # b3_ref   : SMEM (1,)
    # o_ref    : (1, TB)
    # featc_ref: VMEM (ph*pwp, TB)  per-channel pooled features (K in sublanes)
    # fc1_ref  : VMEM (HID, TB)     FC1 accumulator

    # Per-step init (must not be gated on program_id==0: grid is "parallel").
    fc1_ref[...] = jnp.zeros_like(fc1_ref)
    featc_ref[...] = jnp.zeros_like(featc_ref)   # pad sublanes stay 0 for all c

    @pl.loop(0, C1)
    def _(c):
        coef = [w1_ref[c * 9 + t] for t in range(KHW * KHW)]
        bias = b1_ref[c]
        # Conv2d(1,6,3) + ReLU + max_pool2d(2,2) on the VPU, RC pooled rows at
        # a time.  For pooling phase (ri, rj) and tap (di, dj):
        #   x[2i+ri+di, 2j+rj+dj] = xd[(ri+di)%2, rj+dj, i+(ri+di)//2, j]
        # so every operand is an aligned (RC, pw, TB) slice of the phase planes.
        for i0 in range(0, ph, RC):
            m = None
            for ri in range(2):
                for rj in range(2):
                    acc = None
                    for di in range(KHW):
                        for dj in range(KHW):
                            u = ri + di
                            a0 = i0 + u // 2
                            win = xd_ref[0, u % 2, rj + dj, a0:a0 + RC, :, :]
                            term = coef[di * KHW + dj] * win
                            acc = term if acc is None else acc + term
                    m = acc if m is None else jnp.maximum(m, acc)
            # bias-add / ReLU commute with the max over pooling phases.
            pooled = jnp.maximum(m + bias, 0.0)              # (RC, pw, TB)
            for r in range(RC):
                row = (i0 + r) * pwp                         # multiple of 8
                featc_ref[row:row + pw, :] = pooled[r]
        # FC1 contribution of this channel: one (HID, ph*pwp) x (ph*pwp, TB)
        # MXU dot; the zero w2 columns match the untouched zero pad sublanes.
        fc1_ref[...] += jnp.dot(w2_ref[c], featc_ref[...],
                                preferred_element_type=jnp.float32)

    fc1 = jnp.maximum(fc1_ref[...] + b2_ref[...], 0.0)       # (HID, TB)
    # Linear(64 -> 1): VPU multiply + sublane reduction, lane-dense output.
    o_ref[...] = (jnp.sum(fc1 * w3_ref[...], axis=0, keepdims=True)
                  + b3_ref[0])


# ---------------------------------------------------------------------------
# Wrapper: phase-decompose + batch-tile the input, permute/pad weights, launch
# ---------------------------------------------------------------------------
@jax.jit
def net_cf_forward(x, params):
    n, cin, h, w = x.shape
    assert cin == 1 and h % 2 == 0 and w % 2 == 0
    oh, ow = h - KHW + 1, w - KHW + 1            # conv output spatial (16, 38)
    ph, pw = oh // 2, ow // 2                    # pooled spatial (8, 19)
    assert C1 * ph * pw == params["w2"].shape[1]
    assert ph % RC == 0
    pwp = -(-pw // 8) * 8                        # pooled cols padded to 8-mult

    g = -(-n // TB)                              # grid steps
    npad = g * TB

    # Stride-2 row/col phase decomposition with the batch tile in lanes:
    #   xd[gi, p, s, a, j, t] = x[gi*TB + t, 0, 2a + p, 2j + s]
    x2 = x[:, 0]
    if npad != n:
        x2 = jnp.pad(x2, ((0, npad - n), (0, 0), (0, 0)))
    planes = jnp.stack(
        [jnp.stack([x2[:, p::2, s:s + 2 * pw:2] for s in range(4)], axis=0)
         for p in range(2)], axis=0)             # (2, 4, npad, ph+1, pw)
    xd = (planes.transpose(2, 0, 1, 3, 4)
          .reshape(g, TB, 2, 4, h // 2, pw)
          .transpose(0, 2, 3, 4, 5, 1))          # (g, 2, 4, ph+1, pw, TB)

    w1_flat = params["w1"].reshape(C1 * KHW * KHW)
    b1 = params["b1"]
    # FC1 weight: torch flat index c*(ph*pw) + i*pw + j  ->  per-channel
    # (HID, ph*pwp) blocks with the padded columns zeroed.
    w2p = (jnp.pad(params["w2"].reshape(HID, C1, ph, pw),
                   ((0, 0), (0, 0), (0, 0), (0, pwp - pw)))
           .transpose(1, 0, 2, 3)
           .reshape(C1, HID, ph * pwp))
    b2 = params["b2"].reshape(HID, 1)
    w3 = params["w3"].reshape(HID, 1)
    b3 = params["b3"].reshape(1)

    out = pl.pallas_call(
        partial(_net_cf_kernel, ph=ph, pw=pw, pwp=pwp),
        out_shape=jax.ShapeDtypeStruct((1, npad), jnp.float32),
        grid_spec=pltpu.PrefetchScalarGridSpec(
            num_scalar_prefetch=0,
            grid=(g,),
            in_specs=[
                pl.BlockSpec((1, 2, 4, h // 2, pw, TB),
                             lambda i: (i, 0, 0, 0, 0, 0)),
                pl.BlockSpec(memory_space=pltpu.MemorySpace.SMEM),
                pl.BlockSpec(memory_space=pltpu.MemorySpace.SMEM),
                pl.BlockSpec((C1, HID, ph * pwp), lambda i: (0, 0, 0)),
                pl.BlockSpec((HID, 1), lambda i: (0, 0)),
                pl.BlockSpec((HID, 1), lambda i: (0, 0)),
                pl.BlockSpec(memory_space=pltpu.MemorySpace.SMEM),
            ],
            out_specs=pl.BlockSpec((1, TB), lambda i: (0, i)),
            scratch_shapes=[pltpu.VMEM((ph * pwp, TB), jnp.float32),
                            pltpu.VMEM((HID, TB), jnp.float32)],
        ),
        compiler_params=pltpu.CompilerParams(
            dimension_semantics=("parallel",)),
    )(xd, w1_flat, b1, w2p, b2, w3, b3)
    return out[0, :n].reshape(n, 1)


# ---------------------------------------------------------------------------
# Pure-JAX reference (correctness check)
# ---------------------------------------------------------------------------
def _ref_forward(x, p):
    dn = ("NCHW", "OIHW", "NCHW")
    y = lax.conv_general_dilated(x, p["w1"], (1, 1), "VALID",
                                 dimension_numbers=dn,
                                 precision=lax.Precision.HIGHEST)
    y = jnp.maximum(y + p["b1"][None, :, None, None], 0.0)
    y = lax.reduce_window(y, -jnp.inf, lax.max,
                          (1, 1, 2, 2), (1, 1, 2, 2), "VALID")
    flat = y.reshape(y.shape[0], -1)
    h = jnp.maximum(jnp.dot(flat, p["w2"].T,
                            precision=lax.Precision.HIGHEST) + p["b2"], 0.0)
    return jnp.dot(h, p["w3"].T, precision=lax.Precision.HIGHEST) + p["b3"]


# ---------------------------------------------------------------------------
# Deterministic parameter init (PyTorch-style uniform(+-1/sqrt(fan_in)))
# ---------------------------------------------------------------------------
def init_params(key):
    def uinit(k, shape, fan_in):
        bound = 1.0 / jnp.sqrt(float(fan_in))
        return jax.random.uniform(k, shape, jnp.float32, -bound, bound)

    k1, k2, k3 = jax.random.split(key, 3)
    k1w, k1b = jax.random.split(k1)
    k2w, k2b = jax.random.split(k2)
    k3w, k3b = jax.random.split(k3)
    return {
        "w1": uinit(k1w, (C1, 1, KHW, KHW), KHW * KHW),
        "b1": uinit(k1b, (C1,), KHW * KHW),
        "w2": uinit(k2w, (HID, 912), 912),
        "b2": uinit(k2b, (HID,), 912),
        "w3": uinit(k3w, (1, HID), HID),
        "b3": uinit(k3b, (1,), HID),
    }


if __name__ == "__main__":
    key = jax.random.PRNGKey(0)
    kx, kp = jax.random.split(key)

    # Linear(912, 64) forces the flattened pooled features to be 6*8*19 = 912,
    # i.e. a single-channel 18x40 input.  batch=130 exercises two grid steps
    # (one full 128-sample tile plus one zero-padded partial tile).
    x = jax.random.normal(kx, (130, 1, 18, 40), jnp.float32)
    params = init_params(kp)

    out = jax.block_until_ready(net_cf_forward(x, params))
    ref = jax.block_until_ready(_ref_forward(x, params))

    assert out.shape == (130, 1), out.shape
    assert jnp.allclose(out, ref, atol=2e-3, rtol=2e-3), (out, ref)

    print("KERNEL_OK")
</pallas_src>

<mosaic_0001>
module attributes {stable_mosaic.version = 11 : i64} {
  func.func @_net_cf_kernel(%arg0: i32, %arg1: memref<1x2x4x9x19x128xf32, #tpu.memory_space<vmem>>, %arg2: memref<54xf32, #tpu.memory_space<smem>>, %arg3: memref<6xf32, #tpu.memory_space<smem>>, %arg4: memref<6x64x192xf32, #tpu.memory_space<vmem>>, %arg5: memref<64x1xf32, #tpu.memory_space<vmem>>, %arg6: memref<64x1xf32, #tpu.memory_space<vmem>>, %arg7: memref<1xf32, #tpu.memory_space<smem>>, %arg8: memref<1x128xf32, #tpu.memory_space<vmem>>, %arg9: memref<192x128xf32, #tpu.memory_space<vmem>>, %arg10: memref<64x128xf32, #tpu.memory_space<vmem>>) attributes {dimension_semantics = [#tpu.dimension_semantics<parallel>], iteration_bounds = array<i64: 2>, scalar_prefetch = 0 : i64, scratch_operands = 2 : i64, tpu.core_type = #tpu.core_type<tc>, window_params = [{transform_indices = @transform_0, window_bounds = array<i64: 1, 2, 4, 9, 19, 128>}, {transform_indices = @transform_1, window_bounds = array<i64: 54>}, {transform_indices = @transform_2, window_bounds = array<i64: 6>}, {pipeline_mode = #tpu.pipeline_mode<synchronous>, transform_indices = @transform_3, window_bounds = array<i64: 6, 64, 192>}, {pipeline_mode = #tpu.pipeline_mode<synchronous>, transform_indices = @transform_4, window_bounds = array<i64: 64, 1>}, {pipeline_mode = #tpu.pipeline_mode<synchronous>, transform_indices = @transform_5, window_bounds = array<i64: 64, 1>}, {transform_indices = @transform_6, window_bounds = array<i64: 1>}, {transform_indices = @transform_7, window_bounds = array<i64: 1, 128>}]} {
    %cst = arith.constant 0.000000e+00 : f32
    %0 = vector.broadcast %cst : f32 to vector<64x128xf32>
    %c0 = arith.constant 0 : index
    %c0_0 = arith.constant 0 : index
    %1 = vector.load %arg10[%c0, %c0_0] : memref<64x128xf32, #tpu.memory_space<vmem>>, vector<64x128xf32>
    tpu.vector_store %arg10[%c0, %c0_0], %0 {strides = array<i32>} : memref<64x128xf32, #tpu.memory_space<vmem>>, vector<64x128xf32>,
    %cst_1 = arith.constant 0.000000e+00 : f32
    %2 = vector.broadcast %cst_1 : f32 to vector<192x128xf32>
    %c0_2 = arith.constant 0 : index
    %c0_3 = arith.constant 0 : index
    %3 = vector.load %arg9[%c0_2, %c0_3] : memref<192x128xf32, #tpu.memory_space<vmem>>, vector<192x128xf32>
    tpu.vector_store %arg9[%c0_2, %c0_3], %2 {strides = array<i32>} : memref<192x128xf32, #tpu.memory_space<vmem>>, vector<192x128xf32>,
    %c0_i32 = arith.constant 0 : i32
    %c6_i32 = arith.constant 6 : i32
    %4 = arith.addi %c0_i32, %c6_i32 : i32
    %c1_i32 = arith.constant 1 : i32
    scf.for %arg11 = %c0_i32 to %4 step %c1_i32  : i32 {
      %c1_i32_16 = arith.constant 1 : i32
      %20 = arith.muli %arg11, %c1_i32_16 : i32
      %c0_i32_17 = arith.constant 0 : i32
      %21 = arith.addi %c0_i32_17, %20 : i32
      %c9_i32 = arith.constant 9 : i32
      %22 = arith.muli %21, %c9_i32 : i32
      %c0_i32_18 = arith.constant 0 : i32
      %23 = arith.addi %22, %c0_i32_18 : i32
      %24 = arith.index_cast %23 : i32 to index
      %25 = memref.load %arg2[%24] : memref<54xf32, #tpu.memory_space<smem>>
      %c9_i32_19 = arith.constant 9 : i32
      %26 = arith.muli %21, %c9_i32_19 : i32
      %c1_i32_20 = arith.constant 1 : i32
      %27 = arith.addi %26, %c1_i32_20 : i32
      %28 = arith.index_cast %27 : i32 to index
      %29 = memref.load %arg2[%28] : memref<54xf32, #tpu.memory_space<smem>>
      %c9_i32_21 = arith.constant 9 : i32
      %30 = arith.muli %21, %c9_i32_21 : i32
      %c2_i32 = arith.constant 2 : i32
      %31 = arith.addi %30, %c2_i32 : i32
      %32 = arith.index_cast %31 : i32 to index
      %33 = memref.load %arg2[%32] : memref<54xf32, #tpu.memory_space<smem>>
      %c9_i32_22 = arith.constant 9 : i32
      %34 = arith.muli %21, %c9_i32_22 : i32
      %c3_i32 = arith.constant 3 : i32
      %35 = arith.addi %34, %c3_i32 : i32
      %36 = arith.index_cast %35 : i32 to index
      %37 = memref.load %arg2[%36] : memref<54xf32, #tpu.memory_space<smem>>
      %c9_i32_23 = arith.constant 9 : i32
      %38 = arith.muli %21, %c9_i32_23 : i32
      %c4_i32 = arith.constant 4 : i32
      %39 = arith.addi %38, %c4_i32 : i32
      %40 = arith.index_cast %39 : i32 to index
      %41 = memref.load %arg2[%40] : memref<54xf32, #tpu.memory_space<smem>>
      %c9_i32_24 = arith.constant 9 : i32
      %42 = arith.muli %21, %c9_i32_24 : i32
      %c5_i32 = arith.constant 5 : i32
      %43 = arith.addi %42, %c5_i32 : i32
      %44 = arith.index_cast %43 : i32 to index
      %45 = memref.load %arg2[%44] : memref<54xf32, #tpu.memory_space<smem>>
      %c9_i32_25 = arith.constant 9 : i32
      %46 = arith.muli %21, %c9_i32_25 : i32
      %c6_i32_26 = arith.constant 6 : i32
      %47 = arith.addi %46, %c6_i32_26 : i32
      %48 = arith.index_cast %47 : i32 to index
      %49 = memref.load %arg2[%48] : memref<54xf32, #tpu.memory_space<smem>>
      %c9_i32_27 = arith.constant 9 : i32
      %50 = arith.muli %21, %c9_i32_27 : i32
      %c7_i32 = arith.constant 7 : i32
      %51 = arith.addi %50, %c7_i32 : i32
      %52 = arith.index_cast %51 : i32 to index
      %53 = memref.load %arg2[%52] : memref<54xf32, #tpu.memory_space<smem>>
      %c9_i32_28 = arith.constant 9 : i32
      %54 = arith.muli %21, %c9_i32_28 : i32
      %c8_i32 = arith.constant 8 : i32
      %55 = arith.addi %54, %c8_i32 : i32
      %56 = arith.index_cast %55 : i32 to index
      %57 = memref.load %arg2[%56] : memref<54xf32, #tpu.memory_space<smem>>
      %58 = arith.index_cast %21 : i32 to index
      %59 = memref.load %arg3[%58] : memref<6xf32, #tpu.memory_space<smem>>
      %c0_29 = arith.constant 0 : index
      %c0_30 = arith.constant 0 : index
      %c0_31 = arith.constant 0 : index
      %c0_32 = arith.constant 0 : index
      %c0_33 = arith.constant 0 : index
      %c0_34 = arith.constant 0 : index
      %60 = vector.load %arg1[%c0_29, %c0_30, %c0_31, %c0_32, %c0_33, %c0_34] : memref<1x2x4x9x19x128xf32, #tpu.memory_space<vmem>>, vector<1x1x1x4x19x128xf32>
      %61 = vector.shape_cast %60 : vector<1x1x1x4x19x128xf32> to vector<4x19x128xf32>
      %62 = vector.broadcast %25 : f32 to vector<4x19x128xf32>
      %63 = arith.mulf %62, %61 : vector<4x19x128xf32>
      %c0_35 = arith.constant 0 : index
      %c0_36 = arith.constant 0 : index
      %c1 = arith.constant 1 : index
      %c0_37 = arith.constant 0 : index
      %c0_38 = arith.constant 0 : index
      %c0_39 = arith.constant 0 : index
      %64 = vector.load %arg1[%c0_35, %c0_36, %c1, %c0_37, %c0_38, %c0_39] : memref<1x2x4x9x19x128xf32, #tpu.memory_space<vmem>>, vector<1x1x1x4x19x128xf32>
      %65 = vector.shape_cast %64 : vector<1x1x1x4x19x128xf32> to vector<4x19x128xf32>
      %66 = vector.broadcast %29 : f32 to vector<4x19x128xf32>
      %67 = arith.mulf %66, %65 : vector<4x19x128xf32>
      %68 = arith.addf %63, %67 : vector<4x19x128xf32>
      %c0_40 = arith.constant 0 : index
      %c0_41 = arith.constant 0 : index
      %c2 = arith.constant 2 : index
      %c0_42 = arith.constant 0 : index
      %c0_43 = arith.constant 0 : index
      %c0_44 = arith.constant 0 : index
      %69 = vector.load %arg1[%c0_40, %c0_41, %c2, %c0_42, %c0_43, %c0_44] : memref<1x2x4x9x19x128xf32, #tpu.memory_space<vmem>>, vector<1x1x1x4x19x128xf32>
      %70 = vector.shape_cast %69 : vector<1x1x1x4x19x128xf32> to vector<4x19x128xf32>
      %71 = vector.broadcast %33 : f32 to vector<4x19x128xf32>
      %72 = arith.mulf %71, %70 : vector<4x19x128xf32>
      %73 = arith.addf %68, %72 : vector<4x19x128xf32>
      %c0_45 = arith.constant 0 : index
      %c1_46 = arith.constant 1 : index
      %c0_47 = arith.constant 0 : index
      %c0_48 = arith.constant 0 : index
      %c0_49 = arith.constant 0 : index
      %c0_50 = arith.constant 0 : index
      %74 = vector.load %arg1[%c0_45, %c1_46, %c0_47, %c0_48, %c0_49, %c0_50] : memref<1x2x4x9x19x128xf32, #tpu.memory_space<vmem>>, vector<1x1x1x4x19x128xf32>
      %75 = vector.shape_cast %74 : vector<1x1x1x4x19x128xf32> to vector<4x19x128xf32>
      %76 = vector.broadcast %37 : f32 to vector<4x19x128xf32>
      %77 = arith.mulf %76, %75 : vector<4x19x128xf32>
      %78 = arith.addf %73, %77 : vector<4x19x128xf32>
      %c0_51 = arith.constant 0 : index
      %c1_52 = arith.constant 1 : index
      %c1_53 = arith.constant 1 : index
      %c0_54 = arith.constant 0 : index
      %c0_55 = arith.constant 0 : index
      %c0_56 = arith.constant 0 : index
      %79 = vector.load %arg1[%c0_51, %c1_52, %c1_53, %c0_54, %c0_55, %c0_56] : memref<1x2x4x9x19x128xf32, #tpu.memory_space<vmem>>, vector<1x1x1x4x19x128xf32>
      %80 = vector.shape_cast %79 : vector<1x1x1x4x19x128xf32> to vector<4x19x128xf32>
      %81 = vector.broadcast %41 : f32 to vector<4x19x128xf32>
      %82 = arith.mulf %81, %80 : vector<4x19x128xf32>
      %83 = arith.addf %78, %82 : vector<4x19x128xf32>
      %c0_57 = arith.constant 0 : index
      %c1_58 = arith.constant 1 : index
      %c2_59 = arith.constant 2 : index
      %c0_60 = arith.constant 0 : index
      %c0_61 = arith.constant 0 : index
      %c0_62 = arith.constant 0 : index
      %84 = vector.load %arg1[%c0_57, %c1_58, %c2_59, %c0_60, %c0_61, %c0_62] : memref<1x2x4x9x19x128xf32, #tpu.memory_space<vmem>>, vector<1x1x1x4x19x128xf32>
      %85 = vector.shape_cast %84 : vector<1x1x1x4x19x128xf32> to vector<4x19x128xf32>
      %86 = vector.broadcast %45 : f32 to vector<4x19x128xf32>
      %87 = arith.mulf %86, %85 : vector<4x19x128xf32>
      %88 = arith.addf %83, %87 : vector<4x19x128xf32>
      %c0_63 = arith.constant 0 : index
      %c0_64 = arith.constant 0 : index
      %c0_65 = arith.constant 0 : index
      %c1_66 = arith.constant 1 : index
      %c0_67 = arith.constant 0 : index
      %c0_68 = arith.constant 0 : index
      %89 = vector.load %arg1[%c0_63, %c0_64, %c0_65, %c1_66, %c0_67, %c0_68] : memref<1x2x4x9x19x128xf32, #tpu.memory_space<vmem>>, vector<1x1x1x4x19x128xf32>
      %90 = vector.shape_cast %89 : vector<1x1x1x4x19x128xf32> to vector<4x19x128xf32>
      %91 = vector.broadcast %49 : f32 to vector<4x19x128xf32>
      %92 = arith.mulf %91, %90 : vector<4x19x128xf32>
      %93 = arith.addf %88, %92 : vector<4x19x128xf32>
      %c0_69 = arith.constant 0 : index
      %c0_70 = arith.constant 0 : index
      %c1_71 = arith.constant 1 : index
      %c1_72 = arith.constant 1 : index
      %c0_73 = arith.constant 0 : index
      %c0_74 = arith.constant 0 : index
      %94 = vector.load %arg1[%c0_69, %c0_70, %c1_71, %c1_72, %c0_73, %c0_74] : memref<1x2x4x9x19x128xf32, #tpu.memory_space<vmem>>, vector<1x1x1x4x19x128xf32>
      %95 = vector.shape_cast %94 : vector<1x1x1x4x19x128xf32> to vector<4x19x128xf32>
      %96 = vector.broadcast %53 : f32 to vector<4x19x128xf32>
      %97 = arith.mulf %96, %95 : vector<4x19x128xf32>
      %98 = arith.addf %93, %97 : vector<4x19x128xf32>
      %c0_75 = arith.constant 0 : index
      %c0_76 = arith.constant 0 : index
      %c2_77 = arith.constant 2 : index
      %c1_78 = arith.constant 1 : index
      %c0_79 = arith.constant 0 : index
      %c0_80 = arith.constant 0 : index
      %99 = vector.load %arg1[%c0_75, %c0_76, %c2_77, %c1_78, %c0_79, %c0_80] : memref<1x2x4x9x19x128xf32, #tpu.memory_space<vmem>>, vector<1x1x1x4x19x128xf32>
      %100 = vector.shape_cast %99 : vector<1x1x1x4x19x128xf32> to vector<4x19x128xf32>
      %101 = vector.broadcast %57 : f32 to vector<4x19x128xf32>
      %102 = arith.mulf %101, %100 : vector<4x19x128xf32>
      %103 = arith.addf %98, %102 : vector<4x19x128xf32>
      %c0_81 = arith.constant 0 : index
      %c0_82 = arith.constant 0 : index
      %c1_83 = arith.constant 1 : index
      %c0_84 = arith.constant 0 : index
      %c0_85 = arith.constant 0 : index
      %c0_86 = arith.constant 0 : index
      %104 = vector.load %arg1[%c0_81, %c0_82, %c1_83, %c0_84, %c0_85, %c0_86] : memref<1x2x4x9x19x128xf32, #tpu.memory_space<vmem>>, vector<1x1x1x4x19x128xf32>
      %105 = vector.shape_cast %104 : vector<1x1x1x4x19x128xf32> to vector<4x19x128xf32>
      %106 = vector.broadcast %25 : f32 to vector<4x19x128xf32>
      %107 = arith.mulf %106, %105 : vector<4x19x128xf32>
      %c0_87 = arith.constant 0 : index
      %c0_88 = arith.constant 0 : index
      %c2_89 = arith.constant 2 : index
      %c0_90 = arith.constant 0 : index
      %c0_91 = arith.constant 0 : index
      %c0_92 = arith.constant 0 : index
      %108 = vector.load %arg1[%c0_87, %c0_88, %c2_89, %c0_90, %c0_91, %c0_92] : memref<1x2x4x9x19x128xf32, #tpu.memory_space<vmem>>, vector<1x1x1x4x19x128xf32>
      %109 = vector.shape_cast %108 : vector<1x1x1x4x19x128xf32> to vector<4x19x128xf32>
      %110 = vector.broadcast %29 : f32 to vector<4x19x128xf32>
      %111 = arith.mulf %110, %109 : vector<4x19x128xf32>
      %112 = arith.addf %107, %111 : vector<4x19x128xf32>
      %c0_93 = arith.constant 0 : index
      %c0_94 = arith.constant 0 : index
      %c3 = arith.constant 3 : index
      %c0_95 = arith.constant 0 : index
      %c0_96 = arith.constant 0 : index
      %c0_97 = arith.constant 0 : index
      %113 = vector.load %arg1[%c0_93, %c0_94, %c3, %c0_95, %c0_96, %c0_97] : memref<1x2x4x9x19x128xf32, #tpu.memory_space<vmem>>, vector<1x1x1x4x19x128xf32>
      %114 = vector.shape_cast %113 : vector<1x1x1x4x19x128xf32> to vector<4x19x128xf32>
      %115 = vector.broadcast %33 : f32 to vector<4x19x128xf32>
      %116 = arith.mulf %115, %114 : vector<4x19x128xf32>
      %117 = arith.addf %112, %116 : vector<4x19x128xf32>
      %c0_98 = arith.constant 0 : index
      %c1_99 = arith.constant 1 : index
      %c1_100 = arith.constant 1 : index
      %c0_101 = arith.constant 0 : index
      %c0_102 = arith.constant 0 : index
      %c0_103 = arith.constant 0 : index
      %118 = vector.load %arg1[%c0_98, %c1_99, %c1_100, %c0_101, %c0_102, %c0_103] : memref<1x2x4x9x19x128xf32, #tpu.memory_space<vmem>>, vector<1x1x1x4x19x128xf32>
      %119 = vector.shape_cast %118 : vector<1x1x1x4x19x128xf32> to vector<4x19x128xf32>
      %120 = vector.broadcast %37 : f32 to vector<4x19x128xf32>
      %121 = arith.mulf %120, %119 : vector<4x19x128xf32>
      %122 = arith.addf %117, %121 : vector<4x19x128xf32>
      %c0_104 = arith.constant 0 : index
      %c1_105 = arith.constant 1 : index
      %c2_106 = arith.constant 2 : index
      %c0_107 = arith.constant 0 : index
      %c0_108 = arith.constant 0 : index
      %c0_109 = arith.constant 0 : index
      %123 = vector.load %arg1[%c0_104, %c1_105, %c2_106, %c0_107, %c0_108, %c0_109] : memref<1x2x4x9x19x128xf32, #tpu.memory_space<vmem>>, vector<1x1x1x4x19x128xf32>
      %124 = vector.shape_cast %123 : vector<1x1x1x4x19x128xf32> to vector<4x19x128xf32>
      %125 = vector.broadcast %41 : f32 to vector<4x19x128xf32>
      %126 = arith.mulf %125, %124 : vector<4x19x128xf32>
      %127 = arith.addf %122, %126 : vector<4x19x128xf32>
      %c0_110 = arith.constant 0 : index
      %c1_111 = arith.constant 1 : index
      %c3_112 = arith.constant 3 : index
      %c0_113 = arith.constant 0 : index
      %c0_114 = arith.constant 0 : index
      %c0_115 = arith.constant 0 : index
      %128 = vector.load %arg1[%c0_110, %c1_111, %c3_112, %c0_113, %c0_114, %c0_115] : memref<1x2x4x9x19x128xf32, #tpu.memory_space<vmem>>, vector<1x1x1x4x19x128xf32>
      %129 = vector.shape_cast %128 : vector<1x1x1x4x19x128xf32> to vector<4x19x128xf32>
      %130 = vector.broadcast %45 : f32 to vector<4x19x128xf32>
      %131 = arith.mulf %130, %129 : vector<4x19x128xf32>
      %132 = arith.addf %127, %131 : vector<4x19x128xf32>
      %c0_116 = arith.constant 0 : index
      %c0_117 = arith.constant 0 : index
      %c1_118 = arith.constant 1 : index
      %c1_119 = arith.constant 1 : index
      %c0_120 = arith.constant 0 : index
      %c0_121 = arith.constant 0 : index
      %133 = vector.load %arg1[%c0_116, %c0_117, %c1_118, %c1_119, %c0_120, %c0_121] : memref<1x2x4x9x19x128xf32, #tpu.memory_space<vmem>>, vector<1x1x1x4x19x128xf32>
      %134 = vector.shape_cast %133 : vector<1x1x1x4x19x128xf32> to vector<4x19x128xf32>
      %135 = vector.broadcast %49 : f32 to vector<4x19x128xf32>
      %136 = arith.mulf %135, %134 : vector<4x19x128xf32>
      %137 = arith.addf %132, %136 : vector<4x19x128xf32>
      %c0_122 = arith.constant 0 : index
      %c0_123 = arith.constant 0 : index
      %c2_124 = arith.constant 2 : index
      %c1_125 = arith.constant 1 : index
      %c0_126 = arith.constant 0 : index
      %c0_127 = arith.constant 0 : index
      %138 = vector.load %arg1[%c0_122, %c0_123, %c2_124, %c1_125, %c0_126, %c0_127] : memref<1x2x4x9x19x128xf32, #tpu.memory_space<vmem>>, vector<1x1x1x4x19x128xf32>
      %139 = vector.shape_cast %138 : vector<1x1x1x4x19x128xf32> to vector<4x19x128xf32>
      %140 = vector.broadcast %53 : f32 to vector<4x19x128xf32>
      %141 = arith.mulf %140, %139 : vector<4x19x128xf32>
      %142 = arith.addf %137, %141 : vector<4x19x128xf32>
      %c0_128 = arith.constant 0 : index
      %c0_129 = arith.constant 0 : index
      %c3_130 = arith.constant 3 : index
      %c1_131 = arith.constant 1 : index
      %c0_132 = arith.constant 0 : index
      %c0_133 = arith.constant 0 : index
      %143 = vector.load %arg1[%c0_128, %c0_129, %c3_130, %c1_131, %c0_132, %c0_133] : memref<1x2x4x9x19x128xf32, #tpu.memory_space<vmem>>, vector<1x1x1x4x19x128xf32>
      %144 = vector.shape_cast %143 : vector<1x1x1x4x19x128xf32> to vector<4x19x128xf32>
      %145 = vector.broadcast %57 : f32 to vector<4x19x128xf32>
      %146 = arith.mulf %145, %144 : vector<4x19x128xf32>
      %147 = arith.addf %142, %146 : vector<4x19x128xf32>
      %148 = arith.maximumf %103, %147 : vector<4x19x128xf32>
      %c0_134 = arith.constant 0 : index
      %c1_135 = arith.constant 1 : index
      %c0_136 = arith.constant 0 : index
      %c0_137 = arith.constant 0 : index
      %c0_138 = arith.constant 0 : index
      %c0_139 = arith.constant 0 : index
      %149 = vector.load %arg1[%c0_134, %c1_135, %c0_136, %c0_137, %c0_138, %c0_139] : memref<1x2x4x9x19x128xf32, #tpu.memory_space<vmem>>, vector<1x1x1x4x19x128xf32>
      %150 = vector.shape_cast %149 : vector<1x1x1x4x19x128xf32> to vector<4x19x128xf32>
      %151 = vector.broadcast %25 : f32 to vector<4x19x128xf32>
      %152 = arith.mulf %151, %150 : vector<4x19x128xf32>
      %c0_140 = arith.constant 0 : index
      %c1_141 = arith.constant 1 : index
      %c1_142 = arith.constant 1 : index
      %c0_143 = arith.constant 0 : index
      %c0_144 = arith.constant 0 : index
      %c0_145 = arith.constant 0 : index
      %153 = vector.load %arg1[%c0_140, %c1_141, %c1_142, %c0_143, %c0_144, %c0_145] : memref<1x2x4x9x19x128xf32, #tpu.memory_space<vmem>>, vector<1x1x1x4x19x128xf32>
      %154 = vector.shape_cast %153 : vector<1x1x1x4x19x128xf32> to vector<4x19x128xf32>
      %155 = vector.broadcast %29 : f32 to vector<4x19x128xf32>
      %156 = arith.mulf %155, %154 : vector<4x19x128xf32>
      %157 = arith.addf %152, %156 : vector<4x19x128xf32>
      %c0_146 = arith.constant 0 : index
      %c1_147 = arith.constant 1 : index
      %c2_148 = arith.constant 2 : index
      %c0_149 = arith.constant 0 : index
      %c0_150 = arith.constant 0 : index
      %c0_151 = arith.constant 0 : index
      %158 = vector.load %arg1[%c0_146, %c1_147, %c2_148, %c0_149, %c0_150, %c0_151] : memref<1x2x4x9x19x128xf32, #tpu.memory_space<vmem>>, vector<1x1x1x4x19x128xf32>
      %159 = vector.shape_cast %158 : vector<1x1x1x4x19x128xf32> to vector<4x19x128xf32>
      %160 = vector.broadcast %33 : f32 to vector<4x19x128xf32>
      %161 = arith.mulf %160, %159 : vector<4x19x128xf32>
      %162 = arith.addf %157, %161 : vector<4x19x128xf32>
      %c0_152 = arith.constant 0 : index
      %c0_153 = arith.constant 0 : index
      %c0_154 = arith.constant 0 : index
      %c1_155 = arith.constant 1 : index
      %c0_156 = arith.constant 0 : index
      %c0_157 = arith.constant 0 : index
      %163 = vector.load %arg1[%c0_152, %c0_153, %c0_154, %c1_155, %c0_156, %c0_157] : memref<1x2x4x9x19x128xf32, #tpu.memory_space<vmem>>, vector<1x1x1x4x19x128xf32>
      %164 = vector.shape_cast %163 : vector<1x1x1x4x19x128xf32> to vector<4x19x128xf32>
      %165 = vector.broadcast %37 : f32 to vector<4x19x128xf32>
      %166 = arith.mulf %165, %164 : vector<4x19x128xf32>
      %167 = arith.addf %162, %166 : vector<4x19x128xf32>
      %c0_158 = arith.constant 0 : index
      %c0_159 = arith.constant 0 : index
      %c1_160 = arith.constant 1 : index
      %c1_161 = arith.constant 1 : index
      %c0_162 = arith.constant 0 : index
      %c0_163 = arith.constant 0 : index
      %168 = vector.load %arg1[%c0_158, %c0_159, %c1_160, %c1_161, %c0_162, %c0_163] : memref<1x2x4x9x19x128xf32, #tpu.memory_space<vmem>>, vector<1x1x1x4x19x128xf32>
      %169 = vector.shape_cast %168 : vector<1x1x1x4x19x128xf32> to vector<4x19x128xf32>
      %170 = vector.broadcast %41 : f32 to vector<4x19x128xf32>
      %171 = arith.mulf %170, %169 : vector<4x19x128xf32>
      %172 = arith.addf %167, %171 : vector<4x19x128xf32>
      %c0_164 = arith.constant 0 : index
      %c0_165 = arith.constant 0 : index
      %c2_166 = arith.constant 2 : index
      %c1_167 = arith.constant 1 : index
      %c0_168 = arith.constant 0 : index
      %c0_169 = arith.constant 0 : index
      %173 = vector.load %arg1[%c0_164, %c0_165, %c2_166, %c1_167, %c0_168, %c0_169] : memref<1x2x4x9x19x128xf32, #tpu.memory_space<vmem>>, vector<1x1x1x4x19x128xf32>
      %174 = vector.shape_cast %173 : vector<1x1x1x4x19x128xf32> to vector<4x19x128xf32>
      %175 = vector.broadcast %45 : f32 to vector<4x19x128xf32>
      %176 = arith.mulf %175, %174 : vector<4x19x128xf32>
      %177 = arith.addf %172, %176 : vector<4x19x128xf32>
      %c0_170 = arith.constant 0 : index
      %c1_171 = arith.constant 1 : index
      %c0_172 = arith.constant 0 : index
      %c1_173 = arith.constant 1 : index
      %c0_174 = arith.constant 0 : index
      %c0_175 = arith.constant 0 : index
      %178 = vector.load %arg1[%c0_170, %c1_171, %c0_172, %c1_173, %c0_174, %c0_175] : memref<1x2x4x9x19x128xf32, #tpu.memory_space<vmem>>, vector<1x1x1x4x19x128xf32>
      %179 = vector.shape_cast %178 : vector<1x1x1x4x19x128xf32> to vector<4x19x128xf32>
      %180 = vector.broadcast %49 : f32 to vector<4x19x128xf32>
      %181 = arith.mulf %180, %179 : vector<4x19x128xf32>
      %182 = arith.addf %177, %181 : vector<4x19x128xf32>
      %c0_176 = arith.constant 0 : index
      %c1_177 = arith.constant 1 : index
      %c1_178 = arith.constant 1 : index
      %c1_179 = arith.constant 1 : index
      %c0_180 = arith.constant 0 : index
      %c0_181 = arith.constant 0 : index
      %183 = vector.load %arg1[%c0_176, %c1_177, %c1_178, %c1_179, %c0_180, %c0_181] : memref<1x2x4x9x19x128xf32, #tpu.memory_space<vmem>>, vector<1x1x1x4x19x128xf32>
      %184 = vector.shape_cast %183 : vector<1x1x1x4x19x128xf32> to vector<4x19x128xf32>
      %185 = vector.broadcast %53 : f32 to vector<4x19x128xf32>
      %186 = arith.mulf %185, %184 : vector<4x19x128xf32>
      %187 = arith.addf %182, %186 : vector<4x19x128xf32>
      %c0_182 = arith.constant 0 : index
      %c1_183 = arith.constant 1 : index
      %c2_184 = arith.constant 2 : index
      %c1_185 = arith.constant 1 : index
      %c0_186 = arith.constant 0 : index
      %c0_187 = arith.constant 0 : index
      %188 = vector.load %arg1[%c0_182, %c1_183, %c2_184, %c1_185, %c0_186, %c0_187] : memref<1x2x4x9x19x128xf32, #tpu.memory_space<vmem>>, vector<1x1x1x4x19x128xf32>
      %189 = vector.shape_cast %188 : vector<1x1x1x4x19x128xf32> to vector<4x19x128xf32>
      %190 = vector.broadcast %57 : f32 to vector<4x19x128xf32>
      %191 = arith.mulf %190, %189 : vector<4x19x128xf32>
      %192 = arith.addf %187, %191 : vector<4x19x128xf32>
      %193 = arith.maximumf %148, %192 : vector<4x19x128xf32>
      %c0_188 = arith.constant 0 : index
      %c1_189 = arith.constant 1 : index
      %c1_190 = arith.constant 1 : index
      %c0_191 = arith.constant 0 : index
      %c0_192 = arith.constant 0 : index
      %c0_193 = arith.constant 0 : index
      %194 = vector.load %arg1[%c0_188, %c1_189, %c1_190, %c0_191, %c0_192, %c0_193] : memref<1x2x4x9x19x128xf32, #tpu.memory_space<vmem>>, vector<1x1x1x4x19x128xf32>
      %195 = vector.shape_cast %194 : vector<1x1x1x4x19x128xf32> to vector<4x19x128xf32>
      %196 = vector.broadcast %25 : f32 to vector<4x19x128xf32>
      %197 = arith.mulf %196, %195 : vector<4x19x128xf32>
      %c0_194 = arith.constant 0 : index
      %c1_195 = arith.constant 1 : index
      %c2_196 = arith.constant 2 : index
      %c0_197 = arith.constant 0 : index
      %c0_198 = arith.constant 0 : index
      %c0_199 = arith.constant 0 : index
      %198 = vector.load %arg1[%c0_194, %c1_195, %c2_196, %c0_197, %c0_198, %c0_199] : memref<1x2x4x9x19x128xf32, #tpu.memory_space<vmem>>, vector<1x1x1x4x19x128xf32>
      %199 = vector.shape_cast %198 : vector<1x1x1x4x19x128xf32> to vector<4x19x128xf32>
      %200 = vector.broadcast %29 : f32 to vector<4x19x128xf32>
      %201 = arith.mulf %200, %199 : vector<4x19x128xf32>
      %202 = arith.addf %197, %201 : vector<4x19x128xf32>
      %c0_200 = arith.constant 0 : index
      %c1_201 = arith.constant 1 : index
      %c3_202 = arith.constant 3 : index
      %c0_203 = arith.constant 0 : index
      %c0_204 = arith.constant 0 : index
      %c0_205 = arith.constant 0 : index
      %203 = vector.load %arg1[%c0_200, %c1_201, %c3_202, %c0_203, %c0_204, %c0_205] : memref<1x2x4x9x19x128xf32, #tpu.memory_space<vmem>>, vector<1x1x1x4x19x128xf32>
      %204 = vector.shape_cast %203 : vector<1x1x1x4x19x128xf32> to vector<4x19x128xf32>
      %205 = vector.broadcast %33 : f32 to vector<4x19x128xf32>
      %206 = arith.mulf %205, %204 : vector<4x19x128xf32>
      %207 = arith.addf %202, %206 : vector<4x19x128xf32>
      %c0_206 = arith.constant 0 : index
      %c0_207 = arith.constant 0 : index
      %c1_208 = arith.constant 1 : index
      %c1_209 = arith.constant 1 : index
      %c0_210 = arith.constant 0 : index
      %c0_211 = arith.constant 0 : index
      %208 = vector.load %arg1[%c0_206, %c0_207, %c1_208, %c1_209, %c0_210, %c0_211] : memref<1x2x4x9x19x128xf32, #tpu.memory_space<vmem>>, vector<1x1x1x4x19x128xf32>
      %209 = vector.shape_cast %208 : vector<1x1x1x4x19x128xf32> to vector<4x19x128xf32>
      %210 = vector.broadcast %37 : f32 to vector<4x19x128xf32>
      %211 = arith.mulf %210, %209 : vector<4x19x128xf32>
      %212 = arith.addf %207, %211 : vector<4x19x128xf32>
      %c0_212 = arith.constant 0 : index
      %c0_213 = arith.constant 0 : index
      %c2_214 = arith.constant 2 : index
      %c1_215 = arith.constant 1 : index
      %c0_216 = arith.constant 0 : index
      %c0_217 = arith.constant 0 : index
      %213 = vector.load %arg1[%c0_212, %c0_213, %c2_214, %c1_215, %c0_216, %c0_217] : memref<1x2x4x9x19x128xf32, #tpu.memory_space<vmem>>, vector<1x1x1x4x19x128xf32>
      %214 = vector.shape_cast %213 : vector<1x1x1x4x19x128xf32> to vector<4x19x128xf32>
      %215 = vector.broadcast %41 : f32 to vector<4x19x128xf32>
      %216 = arith.mulf %215, %214 : vector<4x19x128xf32>
      %217 = arith.addf %212, %216 : vector<4x19x128xf32>
      %c0_218 = arith.constant 0 : index
      %c0_219 = arith.constant 0 : index
      %c3_220 = arith.constant 3 : index
      %c1_221 = arith.constant 1 : index
      %c0_222 = arith.constant 0 : index
      %c0_223 = arith.constant 0 : index
      %218 = vector.load %arg1[%c0_218, %c0_219, %c3_220, %c1_221, %c0_222, %c0_223] : memref<1x2x4x9x19x128xf32, #tpu.memory_space<vmem>>, vector<1x1x1x4x19x128xf32>
      %219 = vector.shape_cast %218 : vector<1x1x1x4x19x128xf32> to vector<4x19x128xf32>
      %220 = vector.broadcast %45 : f32 to vector<4x19x128xf32>
      %221 = arith.mulf %220, %219 : vector<4x19x128xf32>
      %222 = arith.addf %217, %221 : vector<4x19x128xf32>
      %c0_224 = arith.constant 0 : index
      %c1_225 = arith.constant 1 : index
      %c1_226 = arith.constant 1 : index
      %c1_227 = arith.constant 1 : index
      %c0_228 = arith.constant 0 : index
      %c0_229 = arith.constant 0 : index
      %223 = vector.load %arg1[%c0_224, %c1_225, %c1_226, %c1_227, %c0_228, %c0_229] : memref<1x2x4x9x19x128xf32, #tpu.memory_space<vmem>>, vector<1x1x1x4x19x128xf32>
      %224 = vector.shape_cast %223 : vector<1x1x1x4x19x128xf32> to vector<4x19x128xf32>
      %225 = vector.broadcast %49 : f32 to vector<4x19x128xf32>
      %226 = arith.mulf %225, %224 : vector<4x19x128xf32>
      %227 = arith.addf %222, %226 : vector<4x19x128xf32>
      %c0_230 = arith.constant 0 : index
      %c1_231 = arith.constant 1 : index
      %c2_232 = arith.constant 2 : index
      %c1_233 = arith.constant 1 : index
      %c0_234 = arith.constant 0 : index
      %c0_235 = arith.constant 0 : index
      %228 = vector.load %arg1[%c0_230, %c1_231, %c2_232, %c1_233, %c0_234, %c0_235] : memref<1x2x4x9x19x128xf32, #tpu.memory_space<vmem>>, vector<1x1x1x4x19x128xf32>
      %229 = vector.shape_cast %228 : vector<1x1x1x4x19x128xf32> to vector<4x19x128xf32>
      %230 = vector.broadcast %53 : f32 to vector<4x19x128xf32>
      %231 = arith.mulf %230, %229 : vector<4x19x128xf32>
      %232 = arith.addf %227, %231 : vector<4x19x128xf32>
      %c0_236 = arith.constant 0 : index
      %c1_237 = arith.constant 1 : index
      %c3_238 = arith.constant 3 : index
      %c1_239 = arith.constant 1 : index
      %c0_240 = arith.constant 0 : index
      %c0_241 = arith.constant 0 : index
      %233 = vector.load %arg1[%c0_236, %c1_237, %c3_238, %c1_239, %c0_240, %c0_241] : memref<1x2x4x9x19x128xf32, #tpu.memory_space<vmem>>, vector<1x1x1x4x19x128xf32>
      %234 = vector.shape_cast %233 : vector<1x1x1x4x19x128xf32> to vector<4x19x128xf32>
      %235 = vector.broadcast %57 : f32 to vector<4x19x128xf32>
      %236 = arith.mulf %235, %234 : vector<4x19x128xf32>
      %237 = arith.addf %232, %236 : vector<4x19x128xf32>
      %238 = arith.maximumf %193, %237 : vector<4x19x128xf32>
      %239 = vector.broadcast %59 : f32 to vector<4x19x128xf32>
      %240 = arith.addf %238, %239 : vector<4x19x128xf32>
      %cst_242 = arith.constant 0.000000e+00 : f32
      %241 = vector.broadcast %cst_242 : f32 to vector<4x19x128xf32>
      %242 = arith.maximumf %240, %241 : vector<4x19x128xf32>
      %243 = vector.extract_strided_slice %242 {offsets = [0, 0, 0], sizes = [1, 19, 128], strides = [1, 1, 1]} : vector<4x19x128xf32> to vector<1x19x128xf32>
      %244 = vector.shape_cast %243 : vector<1x19x128xf32> to vector<19x128xf32>
      %c0_243 = arith.constant 0 : index
      %c0_244 = arith.constant 0 : index
      %245 = vector.load %arg9[%c0_243, %c0_244] : memref<192x128xf32, #tpu.memory_space<vmem>>, vector<19x128xf32>
      tpu.vector_store %arg9[%c0_243, %c0_244], %244 {strides = array<i32>} : memref<192x128xf32, #tpu.memory_space<vmem>>, vector<19x128xf32>,
      %246 = vector.extract_strided_slice %242 {offsets = [1, 0, 0], sizes = [1, 19, 128], strides = [1, 1, 1]} : vector<4x19x128xf32> to vector<1x19x128xf32>
      %247 = vector.shape_cast %246 : vector<1x19x128xf32> to vector<19x128xf32>
      %c24 = arith.constant 24 : index
      %c0_245 = arith.constant 0 : index
      %248 = vector.load %arg9[%c24, %c0_245] : memref<192x128xf32, #tpu.memory_space<vmem>>, vector<19x128xf32>
      tpu.vector_store %arg9[%c24, %c0_245], %247 {strides = array<i32>} : memref<192x128xf32, #tpu.memory_space<vmem>>, vector<19x128xf32>,
      %249 = vector.extract_strided_slice %242 {offsets = [2, 0, 0], sizes = [1, 19, 128], strides = [1, 1, 1]} : vector<4x19x128xf32> to vector<1x19x128xf32>
      %250 = vector.shape_cast %249 : vector<1x19x128xf32> to vector<19x128xf32>
      %c48 = arith.constant 48 : index
      %c0_246 = arith.constant 0 : index
      %251 = vector.load %arg9[%c48, %c0_246] : memref<192x128xf32, #tpu.memory_space<vmem>>, vector<19x128xf32>
      tpu.vector_store %arg9[%c48, %c0_246], %250 {strides = array<i32>} : memref<192x128xf32, #tpu.memory_space<vmem>>, vector<19x128xf32>,
      %252 = vector.extract_strided_slice %242 {offsets = [3, 0, 0], sizes = [1, 19, 128], strides = [1, 1, 1]} : vector<4x19x128xf32> to vector<1x19x128xf32>
      %253 = vector.shape_cast %252 : vector<1x19x128xf32> to vector<19x128xf32>
      %c72 = arith.constant 72 : index
      %c0_247 = arith.constant 0 : index
      %254 = vector.load %arg9[%c72, %c0_247] : memref<192x128xf32, #tpu.memory_space<vmem>>, vector<19x128xf32>
      tpu.vector_store %arg9[%c72, %c0_247], %253 {strides = array<i32>} : memref<192x128xf32, #tpu.memory_space<vmem>>, vector<19x128xf32>,
      %c0_248 = arith.constant 0 : index
      %c0_249 = arith.constant 0 : index
      %c0_250 = arith.constant 0 : index
      %c4 = arith.constant 4 : index
      %c0_251 = arith.constant 0 : index
      %c0_252 = arith.constant 0 : index
      %255 = vector.load %arg1[%c0_248, %c0_249, %c0_250, %c4, %c0_251, %c0_252] : memref<1x2x4x9x19x128xf32, #tpu.memory_space<vmem>>, vector<1x1x1x4x19x128xf32>
      %256 = vector.shape_cast %255 : vector<1x1x1x4x19x128xf32> to vector<4x19x128xf32>
      %257 = vector.broadcast %25 : f32 to vector<4x19x128xf32>
      %258 = arith.mulf %257, %256 : vector<4x19x128xf32>
      %c0_253 = arith.constant 0 : index
      %c0_254 = arith.constant 0 : index
      %c1_255 = arith.constant 1 : index
      %c4_256 = arith.constant 4 : index
      %c0_257 = arith.constant 0 : index
      %c0_258 = arith.constant 0 : index
      %259 = vector.load %arg1[%c0_253, %c0_254, %c1_255, %c4_256, %c0_257, %c0_258] : memref<1x2x4x9x19x128xf32, #tpu.memory_space<vmem>>, vector<1x1x1x4x19x128xf32>
      %260 = vector.shape_cast %259 : vector<1x1x1x4x19x128xf32> to vector<4x19x128xf32>
      %261 = vector.broadcast %29 : f32 to vector<4x19x128xf32>
      %262 = arith.mulf %261, %260 : vector<4x19x128xf32>
      %263 = arith.addf %258, %262 : vector<4x19x128xf32>
      %c0_259 = arith.constant 0 : index
      %c0_260 = arith.constant 0 : index
      %c2_261 = arith.constant 2 : index
      %c4_262 = arith.constant 4 : index
      %c0_263 = arith.constant 0 : index
      %c0_264 = arith.constant 0 : index
      %264 = vector.load %arg1[%c0_259, %c0_260, %c2_261, %c4_262, %c0_263, %c0_264] : memref<1x2x4x9x19x128xf32, #tpu.memory_space<vmem>>, vector<1x1x1x4x19x128xf32>
      %265 = vector.shape_cast %264 : vector<1x1x1x4x19x128xf32> to vector<4x19x128xf32>
      %266 = vector.broadcast %33 : f32 to vector<4x19x128xf32>
      %267 = arith.mulf %266, %265 : vector<4x19x128xf32>
      %268 = arith.addf %263, %267 : vector<4x19x128xf32>
      %c0_265 = arith.constant 0 : index
      %c1_266 = arith.constant 1 : index
      %c0_267 = arith.constant 0 : index
      %c4_268 = arith.constant 4 : index
      %c0_269 = arith.constant 0 : index
      %c0_270 = arith.constant 0 : index
      %269 = vector.load %arg1[%c0_265, %c1_266, %c0_267, %c4_268, %c0_269, %c0_270] : memref<1x2x4x9x19x128xf32, #tpu.memory_space<vmem>>, vector<1x1x1x4x19x128xf32>
      %270 = vector.shape_cast %269 : vector<1x1x1x4x19x128xf32> to vector<4x19x128xf32>
      %271 = vector.broadcast %37 : f32 to vector<4x19x128xf32>
      %272 = arith.mulf %271, %270 : vector<4x19x128xf32>
      %273 = arith.addf %268, %272 : vector<4x19x128xf32>
      %c0_271 = arith.constant 0 : index
      %c1_272 = arith.constant 1 : index
      %c1_273 = arith.constant 1 : index
      %c4_274 = arith.constant 4 : index
      %c0_275 = arith.constant 0 : index
      %c0_276 = arith.constant 0 : index
      %274 = vector.load %arg1[%c0_271, %c1_272, %c1_273, %c4_274, %c0_275, %c0_276] : memref<1x2x4x9x19x128xf32, #tpu.memory_space<vmem>>, vector<1x1x1x4x19x128xf32>
      %275 = vector.shape_cast %274 : vector<1x1x1x4x19x128xf32> to vector<4x19x128xf32>
      %276 = vector.broadcast %41 : f32 to vector<4x19x128xf32>
      %277 = arith.mulf %276, %275 : vector<4x19x128xf32>
      %278 = arith.addf %273, %277 : vector<4x19x128xf32>
      %c0_277 = arith.constant 0 : index
      %c1_278 = arith.constant 1 : index
      %c2_279 = arith.constant 2 : index
      %c4_280 = arith.constant 4 : index
      %c0_281 = arith.constant 0 : index
      %c0_282 = arith.constant 0 : index
      %279 = vector.load %arg1[%c0_277, %c1_278, %c2_279, %c4_280, %c0_281, %c0_282] : memref<1x2x4x9x19x128xf32, #tpu.memory_space<vmem>>, vector<1x1x1x4x19x128xf32>
      %280 = vector.shape_cast %279 : vector<1x1x1x4x19x128xf32> to vector<4x19x128xf32>
      %281 = vector.broadcast %45 : f32 to vector<4x19x128xf32>
      %282 = arith.mulf %281, %280 : vector<4x19x128xf32>
      %283 = arith.addf %278, %282 : vector<4x19x128xf32>
      %c0_283 = arith.constant 0 : index
      %c0_284 = arith.constant 0 : index
      %c0_285 = arith.constant 0 : index
      %c5 = arith.constant 5 : index
      %c0_286 = arith.constant 0 : index
      %c0_287 = arith.constant 0 : index
      %284 = vector.load %arg1[%c0_283, %c0_284, %c0_285, %c5, %c0_286, %c0_287] : memref<1x2x4x9x19x128xf32, #tpu.memory_space<vmem>>, vector<1x1x1x4x19x128xf32>
      %285 = vector.shape_cast %284 : vector<1x1x1x4x19x128xf32> to vector<4x19x128xf32>
      %286 = vector.broadcast %49 : f32 to vector<4x19x128xf32>
      %287 = arith.mulf %286, %285 : vector<4x19x128xf32>
      %288 = arith.addf %283, %287 : vector<4x19x128xf32>
      %c0_288 = arith.constant 0 : index
      %c0_289 = arith.constant 0 : index
      %c1_290 = arith.constant 1 : index
      %c5_291 = arith.constant 5 : index
      %c0_292 = arith.constant 0 : index
      %c0_293 = arith.constant 0 : index
      %289 = vector.load %arg1[%c0_288, %c0_289, %c1_290, %c5_291, %c0_292, %c0_293] : memref<1x2x4x9x19x128xf32, #tpu.memory_space<vmem>>, vector<1x1x1x4x19x128xf32>
      %290 = vector.shape_cast %289 : vector<1x1x1x4x19x128xf32> to vector<4x19x128xf32>
      %291 = vector.broadcast %53 : f32 to vector<4x19x128xf32>
      %292 = arith.mulf %291, %290 : vector<4x19x128xf32>
      %293 = arith.addf %288, %292 : vector<4x19x128xf32>
      %c0_294 = arith.constant 0 : index
      %c0_295 = arith.constant 0 : index
      %c2_296 = arith.constant 2 : index
      %c5_297 = arith.constant 5 : index
      %c0_298 = arith.constant 0 : index
      %c0_299 = arith.constant 0 : index
      %294 = vector.load %arg1[%c0_294, %c0_295, %c2_296, %c5_297, %c0_298, %c0_299] : memref<1x2x4x9x19x128xf32, #tpu.memory_space<vmem>>, vector<1x1x1x4x19x128xf32>
      %295 = vector.shape_cast %294 : vector<1x1x1x4x19x128xf32> to vector<4x19x128xf32>
      %296 = vector.broadcast %57 : f32 to vector<4x19x128xf32>
      %297 = arith.mulf %296, %295 : vector<4x19x128xf32>
      %298 = arith.addf %293, %297 : vector<4x19x128xf32>
      %c0_300 = arith.constant 0 : index
      %c0_301 = arith.constant 0 : index
      %c1_302 = arith.constant 1 : index
      %c4_303 = arith.constant 4 : index
      %c0_304 = arith.constant 0 : index
      %c0_305 = arith.constant 0 : index
      %299 = vector.load %arg1[%c0_300, %c0_301, %c1_302, %c4_303, %c0_304, %c0_305] : memref<1x2x4x9x19x128xf32, #tpu.memory_space<vmem>>, vector<1x1x1x4x19x128xf32>
      %300 = vector.shape_cast %299 : vector<1x1x1x4x19x128xf32> to vector<4x19x128xf32>
      %301 = vector.broadcast %25 : f32 to vector<4x19x128xf32>
      %302 = arith.mulf %301, %300 : vector<4x19x128xf32>
      %c0_306 = arith.constant 0 : index
      %c0_307 = arith.constant 0 : index
      %c2_308 = arith.constant 2 : index
      %c4_309 = arith.constant 4 : index
      %c0_310 = arith.constant 0 : index
      %c0_311 = arith.constant 0 : index
      %303 = vector.load %arg1[%c0_306, %c0_307, %c2_308, %c4_309, %c0_310, %c0_311] : memref<1x2x4x9x19x128xf32, #tpu.memory_space<vmem>>, vector<1x1x1x4x19x128xf32>
      %304 = vector.shape_cast %303 : vector<1x1x1x4x19x128xf32> to vector<4x19x128xf32>
      %305 = vector.broadcast %29 : f32 to vector<4x19x128xf32>
      %306 = arith.mulf %305, %304 : vector<4x19x128xf32>
      %307 = arith.addf %302, %306 : vector<4x19x128xf32>
      %c0_312 = arith.constant 0 : index
      %c0_313 = arith.constant 0 : index
      %c3_314 = arith.constant 3 : index
      %c4_315 = arith.constant 4 : index
      %c0_316 = arith.constant 0 : index
      %c0_317 = arith.constant 0 : index
      %308 = vector.load %arg1[%c0_312, %c0_313, %c3_314, %c4_315, %c0_316, %c0_317] : memref<1x2x4x9x19x128xf32, #tpu.memory_space<vmem>>, vector<1x1x1x4x19x128xf32>
      %309 = vector.shape_cast %308 : vector<1x1x1x4x19x128xf32> to vector<4x19x128xf32>
      %310 = vector.broadcast %33 : f32 to vector<4x19x128xf32>
      %311 = arith.mulf %310, %309 : vector<4x19x128xf32>
      %312 = arith.addf %307, %311 : vector<4x19x128xf32>
      %c0_318 = arith.constant 0 : index
      %c1_319 = arith.constant 1 : index
      %c1_320 = arith.constant 1 : index
      %c4_321 = arith.constant 4 : index
      %c0_322 = arith.constant 0 : index
      %c0_323 = arith.constant 0 : index
      %313 = vector.load %arg1[%c0_318, %c1_319, %c1_320, %c4_321, %c0_322, %c0_323] : memref<1x2x4x9x19x128xf32, #tpu.memory_space<vmem>>, vector<1x1x1x4x19x128xf32>
      %314 = vector.shape_cast %313 : vector<1x1x1x4x19x128xf32> to vector<4x19x128xf32>
      %315 = vector.broadcast %37 : f32 to vector<4x19x128xf32>
      %316 = arith.mulf %315, %314 : vector<4x19x128xf32>
      %317 = arith.addf %312, %316 : vector<4x19x128xf32>
      %c0_324 = arith.constant 0 : index
      %c1_325 = arith.constant 1 : index
      %c2_326 = arith.constant 2 : index
      %c4_327 = arith.constant 4 : index
      %c0_328 = arith.constant 0 : index
      %c0_329 = arith.constant 0 : index
      %318 = vector.load %arg1[%c0_324, %c1_325, %c2_326, %c4_327, %c0_328, %c0_329] : memref<1x2x4x9x19x128xf32, #tpu.memory_space<vmem>>, vector<1x1x1x4x19x128xf32>
      %319 = vector.shape_cast %318 : vector<1x1x1x4x19x128xf32> to vector<4x19x128xf32>
      %320 = vector.broadcast %41 : f32 to vector<4x19x128xf32>
      %321 = arith.mulf %320, %319 : vector<4x19x128xf32>
      %322 = arith.addf %317, %321 : vector<4x19x128xf32>
      %c0_330 = arith.constant 0 : index
      %c1_331 = arith.constant 1 : index
      %c3_332 = arith.constant 3 : index
      %c4_333 = arith.constant 4 : index
      %c0_334 = arith.constant 0 : index
      %c0_335 = arith.constant 0 : index
      %323 = vector.load %arg1[%c0_330, %c1_331, %c3_332, %c4_333, %c0_334, %c0_335] : memref<1x2x4x9x19x128xf32, #tpu.memory_space<vmem>>, vector<1x1x1x4x19x128xf32>
      %324 = vector.shape_cast %323 : vector<1x1x1x4x19x128xf32> to vector<4x19x128xf32>
      %325 = vector.broadcast %45 : f32 to vector<4x19x128xf32>
      %326 = arith.mulf %325, %324 : vector<4x19x128xf32>
      %327 = arith.addf %322, %326 : vector<4x19x128xf32>
      %c0_336 = arith.constant 0 : index
      %c0_337 = arith.constant 0 : index
      %c1_338 = arith.constant 1 : index
      %c5_339 = arith.constant 5 : index
      %c0_340 = arith.constant 0 : index
      %c0_341 = arith.constant 0 : index
      %328 = vector.load %arg1[%c0_336, %c0_337, %c1_338, %c5_339, %c0_340, %c0_341] : memref<1x2x4x9x19x128xf32, #tpu.memory_space<vmem>>, vector<1x1x1x4x19x128xf32>
      %329 = vector.shape_cast %328 : vector<1x1x1x4x19x128xf32> to vector<4x19x128xf32>
      %330 = vector.broadcast %49 : f32 to vector<4x19x128xf32>
      %331 = arith.mulf %330, %329 : vector<4x19x128xf32>
      %332 = arith.addf %327, %331 : vector<4x19x128xf32>
      %c0_342 = arith.constant 0 : index
      %c0_343 = arith.constant 0 : index
      %c2_344 = arith.constant 2 : index
      %c5_345 = arith.constant 5 : index
      %c0_346 = arith.constant 0 : index
      %c0_347 = arith.constant 0 : index
      %333 = vector.load %arg1[%c0_342, %c0_343, %c2_344, %c5_345, %c0_346, %c0_347] : memref<1x2x4x9x19x128xf32, #tpu.memory_space<vmem>>, vector<1x1x1x4x19x128xf32>
      %334 = vector.shape_cast %333 : vector<1x1x1x4x19x128xf32> to vector<4x19x128xf32>
      %335 = vector.broadcast %53 : f32 to vector<4x19x128xf32>
      %336 = arith.mulf %335, %334 : vector<4x19x128xf32>
      %337 = arith.addf %332, %336 : vector<4x19x128xf32>
      %c0_348 = arith.constant 0 : index
      %c0_349 = arith.constant 0 : index
      %c3_350 = arith.constant 3 : index
      %c5_351 = arith.constant 5 : index
      %c0_352 = arith.constant 0 : index
      %c0_353 = arith.constant 0 : index
      %338 = vector.load %arg1[%c0_348, %c0_349, %c3_350, %c5_351, %c0_352, %c0_353] : memref<1x2x4x9x19x128xf32, #tpu.memory_space<vmem>>, vector<1x1x1x4x19x128xf32>
      %339 = vector.shape_cast %338 : vector<1x1x1x4x19x128xf32> to vector<4x19x128xf32>
      %340 = vector.broadcast %57 : f32 to vector<4x19x128xf32>
      %341 = arith.mulf %340, %339 : vector<4x19x128xf32>
      %342 = arith.addf %337, %341 : vector<4x19x128xf32>
      %343 = arith.maximumf %298, %342 : vector<4x19x128xf32>
      %c0_354 = arith.constant 0 : index
      %c1_355 = arith.constant 1 : index
      %c0_356 = arith.constant 0 : index
      %c4_357 = arith.constant 4 : index
      %c0_358 = arith.constant 0 : index
      %c0_359 = arith.constant 0 : index
      %344 = vector.load %arg1[%c0_354, %c1_355, %c0_356, %c4_357, %c0_358, %c0_359] : memref<1x2x4x9x19x128xf32, #tpu.memory_space<vmem>>, vector<1x1x1x4x19x128xf32>
      %345 = vector.shape_cast %344 : vector<1x1x1x4x19x128xf32> to vector<4x19x128xf32>
      %346 = vector.broadcast %25 : f32 to vector<4x19x128xf32>
      %347 = arith.mulf %346, %345 : vector<4x19x128xf32>
      %c0_360 = arith.constant 0 : index
      %c1_361 = arith.constant 1 : index
      %c1_362 = arith.constant 1 : index
      %c4_363 = arith.constant 4 : index
      %c0_364 = arith.constant 0 : index
      %c0_365 = arith.constant 0 : index
      %348 = vector.load %arg1[%c0_360, %c1_361, %c1_362, %c4_363, %c0_364, %c0_365] : memref<1x2x4x9x19x128xf32, #tpu.memory_space<vmem>>, vector<1x1x1x4x19x128xf32>
      %349 = vector.shape_cast %348 : vector<1x1x1x4x19x128xf32> to vector<4x19x128xf32>
      %350 = vector.broadcast %29 : f32 to vector<4x19x128xf32>
      %351 = arith.mulf %350, %349 : vector<4x19x128xf32>
      %352 = arith.addf %347, %351 : vector<4x19x128xf32>
      %c0_366 = arith.constant 0 : index
      %c1_367 = arith.constant 1 : index
      %c2_368 = arith.constant 2 : index
      %c4_369 = arith.constant 4 : index
      %c0_370 = arith.constant 0 : index
      %c0_371 = arith.constant 0 : index
      %353 = vector.load %arg1[%c0_366, %c1_367, %c2_368, %c4_369, %c0_370, %c0_371] : memref<1x2x4x9x19x128xf32, #tpu.memory_space<vmem>>, vector<1x1x1x4x19x128xf32>
      %354 = vector.shape_cast %353 : vector<1x1x1x4x19x128xf32> to vector<4x19x128xf32>
      %355 = vector.broadcast %33 : f32 to vector<4x19x128xf32>
      %356 = arith.mulf %355, %354 : vector<4x19x128xf32>
      %357 = arith.addf %352, %356 : vector<4x19x128xf32>
      %c0_372 = arith.constant 0 : index
      %c0_373 = arith.constant 0 : index
      %c0_374 = arith.constant 0 : index
      %c5_375 = arith.constant 5 : index
      %c0_376 = arith.constant 0 : index
      %c0_377 = arith.constant 0 : index
      %358 = vector.load %arg1[%c0_372, %c0_373, %c0_374, %c5_375, %c0_376, %c0_377] : memref<1x2x4x9x19x128xf32, #tpu.memory_space<vmem>>, vector<1x1x1x4x19x128xf32>
      %359 = vector.shape_cast %358 : vector<1x1x1x4x19x128xf32> to vector<4x19x128xf32>
      %360 = vector.broadcast %37 : f32 to vector<4x19x128xf32>
      %361 = arith.mulf %360, %359 : vector<4x19x128xf32>
      %362 = arith.addf %357, %361 : vector<4x19x128xf32>
      %c0_378 = arith.constant 0 : index
      %c0_379 = arith.constant 0 : index
      %c1_380 = arith.constant 1 : index
      %c5_381 = arith.constant 5 : index
      %c0_382 = arith.constant 0 : index
      %c0_383 = arith.constant 0 : index
      %363 = vector.load %arg1[%c0_378, %c0_379, %c1_380, %c5_381, %c0_382, %c0_383] : memref<1x2x4x9x19x128xf32, #tpu.memory_space<vmem>>, vector<1x1x1x4x19x128xf32>
      %364 = vector.shape_cast %363 : vector<1x1x1x4x19x128xf32> to vector<4x19x128xf32>
      %365 = vector.broadcast %41 : f32 to vector<4x19x128xf32>
      %366 = arith.mulf %365, %364 : vector<4x19x128xf32>
      %367 = arith.addf %362, %366 : vector<4x19x128xf32>
      %c0_384 = arith.constant 0 : index
      %c0_385 = arith.constant 0 : index
      %c2_386 = arith.constant 2 : index
      %c5_387 = arith.constant 5 : index
      %c0_388 = arith.constant 0 : index
      %c0_389 = arith.constant 0 : index
      %368 = vector.load %arg1[%c0_384, %c0_385, %c2_386, %c5_387, %c0_388, %c0_389] : memref<1x2x4x9x19x128xf32, #tpu.memory_space<vmem>>, vector<1x1x1x4x19x128xf32>
      %369 = vector.shape_cast %368 : vector<1x1x1x4x19x128xf32> to vector<4x19x128xf32>
      %370 = vector.broadcast %45 : f32 to vector<4x19x128xf32>
      %371 = arith.mulf %370, %369 : vector<4x19x128xf32>
      %372 = arith.addf %367, %371 : vector<4x19x128xf32>
      %c0_390 = arith.constant 0 : index
      %c1_391 = arith.constant 1 : index
      %c0_392 = arith.constant 0 : index
      %c5_393 = arith.constant 5 : index
      %c0_394 = arith.constant 0 : index
      %c0_395 = arith.constant 0 : index
      %373 = vector.load %arg1[%c0_390, %c1_391, %c0_392, %c5_393, %c0_394, %c0_395] : memref<1x2x4x9x19x128xf32, #tpu.memory_space<vmem>>, vector<1x1x1x4x19x128xf32>
      %374 = vector.shape_cast %373 : vector<1x1x1x4x19x128xf32> to vector<4x19x128xf32>
      %375 = vector.broadcast %49 : f32 to vector<4x19x128xf32>
      %376 = arith.mulf %375, %374 : vector<4x19x128xf32>
      %377 = arith.addf %372, %376 : vector<4x19x128xf32>
      %c0_396 = arith.constant 0 : index
      %c1_397 = arith.constant 1 : index
      %c1_398 = arith.constant 1 : index
      %c5_399 = arith.constant 5 : index
      %c0_400 = arith.constant 0 : index
      %c0_401 = arith.constant 0 : index
      %378 = vector.load %arg1[%c0_396, %c1_397, %c1_398, %c5_399, %c0_400, %c0_401] : memref<1x2x4x9x19x128xf32, #tpu.memory_space<vmem>>, vector<1x1x1x4x19x128xf32>
      %379 = vector.shape_cast %378 : vector<1x1x1x4x19x128xf32> to vector<4x19x128xf32>
      %380 = vector.broadcast %53 : f32 to vector<4x19x128xf32>
      %381 = arith.mulf %380, %379 : vector<4x19x128xf32>
      %382 = arith.addf %377, %381 : vector<4x19x128xf32>
      %c0_402 = arith.constant 0 : index
      %c1_403 = arith.constant 1 : index
      %c2_404 = arith.constant 2 : index
      %c5_405 = arith.constant 5 : index
      %c0_406 = arith.constant 0 : index
      %c0_407 = arith.constant 0 : index
      %383 = vector.load %arg1[%c0_402, %c1_403, %c2_404, %c5_405, %c0_406, %c0_407] : memref<1x2x4x9x19x128xf32, #tpu.memory_space<vmem>>, vector<1x1x1x4x19x128xf32>
      %384 = vector.shape_cast %383 : vector<1x1x1x4x19x128xf32> to vector<4x19x128xf32>
      %385 = vector.broadcast %57 : f32 to vector<4x19x128xf32>
      %386 = arith.mulf %385, %384 : vector<4x19x128xf32>
      %387 = arith.addf %382, %386 : vector<4x19x128xf32>
      %388 = arith.maximumf %343, %387 : vector<4x19x128xf32>
      %c0_408 = arith.constant 0 : index
      %c1_409 = arith.constant 1 : index
      %c1_410 = arith.constant 1 : index
      %c4_411 = arith.constant 4 : index
      %c0_412 = arith.constant 0 : index
      %c0_413 = arith.constant 0 : index
      %389 = vector.load %arg1[%c0_408, %c1_409, %c1_410, %c4_411, %c0_412, %c0_413] : memref<1x2x4x9x19x128xf32, #tpu.memory_space<vmem>>, vector<1x1x1x4x19x128xf32>
      %390 = vector.shape_cast %389 : vector<1x1x1x4x19x128xf32> to vector<4x19x128xf32>
      %391 = vector.broadcast %25 : f32 to vector<4x19x128xf32>
      %392 = arith.mulf %391, %390 : vector<4x19x128xf32>
      %c0_414 = arith.constant 0 : index
      %c1_415 = arith.constant 1 : index
      %c2_416 = arith.constant 2 : index
      %c4_417 = arith.constant 4 : index
      %c0_418 = arith.constant 0 : index
      %c0_419 = arith.constant 0 : index
      %393 = vector.load %arg1[%c0_414, %c1_415, %c2_416, %c4_417, %c0_418, %c0_419] : memref<1x2x4x9x19x128xf32, #tpu.memory_space<vmem>>, vector<1x1x1x4x19x128xf32>
      %394 = vector.shape_cast %393 : vector<1x1x1x4x19x128xf32> to vector<4x19x128xf32>
      %395 = vector.broadcast %29 : f32 to vector<4x19x128xf32>
      %396 = arith.mulf %395, %394 : vector<4x19x128xf32>
      %397 = arith.addf %392, %396 : vector<4x19x128xf32>
      %c0_420 = arith.constant 0 : index
      %c1_421 = arith.constant 1 : index
      %c3_422 = arith.constant 3 : index
      %c4_423 = arith.constant 4 : index
      %c0_424 = arith.constant 0 : index
      %c0_425 = arith.constant 0 : index
      %398 = vector.load %arg1[%c0_420, %c1_421, %c3_422, %c4_423, %c0_424, %c0_425] : memref<1x2x4x9x19x128xf32, #tpu.memory_space<vmem>>, vector<1x1x1x4x19x128xf32>
      %399 = vector.shape_cast %398 : vector<1x1x1x4x19x128xf32> to vector<4x19x128xf32>
      %400 = vector.broadcast %33 : f32 to vector<4x19x128xf32>
      %401 = arith.mulf %400, %399 : vector<4x19x128xf32>
      %402 = arith.addf %397, %401 : vector<4x19x128xf32>
      %c0_426 = arith.constant 0 : index
      %c0_427 = arith.constant 0 : index
      %c1_428 = arith.constant 1 : index
      %c5_429 = arith.constant 5 : index
      %c0_430 = arith.constant 0 : index
      %c0_431 = arith.constant 0 : index
      %403 = vector.load %arg1[%c0_426, %c0_427, %c1_428, %c5_429, %c0_430, %c0_431] : memref<1x2x4x9x19x128xf32, #tpu.memory_space<vmem>>, vector<1x1x1x4x19x128xf32>
      %404 = vector.shape_cast %403 : vector<1x1x1x4x19x128xf32> to vector<4x19x128xf32>
      %405 = vector.broadcast %37 : f32 to vector<4x19x128xf32>
      %406 = arith.mulf %405, %404 : vector<4x19x128xf32>
      %407 = arith.addf %402, %406 : vector<4x19x128xf32>
      %c0_432 = arith.constant 0 : index
      %c0_433 = arith.constant 0 : index
      %c2_434 = arith.constant 2 : index
      %c5_435 = arith.constant 5 : index
      %c0_436 = arith.constant 0 : index
      %c0_437 = arith.constant 0 : index
      %408 = vector.load %arg1[%c0_432, %c0_433, %c2_434, %c5_435, %c0_436, %c0_437] : memref<1x2x4x9x19x128xf32, #tpu.memory_space<vmem>>, vector<1x1x1x4x19x128xf32>
      %409 = vector.shape_cast %408 : vector<1x1x1x4x19x128xf32> to vector<4x19x128xf32>
      %410 = vector.broadcast %41 : f32 to vector<4x19x128xf32>
      %411 = arith.mulf %410, %409 : vector<4x19x128xf32>
      %412 = arith.addf %407, %411 : vector<4x19x128xf32>
      %c0_438 = arith.constant 0 : index
      %c0_439 = arith.constant 0 : index
      %c3_440 = arith.constant 3 : index
      %c5_441 = arith.constant 5 : index
      %c0_442 = arith.constant 0 : index
      %c0_443 = arith.constant 0 : index
      %413 = vector.load %arg1[%c0_438, %c0_439, %c3_440, %c5_441, %c0_442, %c0_443] : memref<1x2x4x9x19x128xf32, #tpu.memory_space<vmem>>, vector<1x1x1x4x19x128xf32>
      %414 = vector.shape_cast %413 : vector<1x1x1x4x19x128xf32> to vector<4x19x128xf32>
      %415 = vector.broadcast %45 : f32 to vector<4x19x128xf32>
      %416 = arith.mulf %415, %414 : vector<4x19x128xf32>
      %417 = arith.addf %412, %416 : vector<4x19x128xf32>
      %c0_444 = arith.constant 0 : index
      %c1_445 = arith.constant 1 : index
      %c1_446 = arith.constant 1 : index
      %c5_447 = arith.constant 5 : index
      %c0_448 = arith.constant 0 : index
      %c0_449 = arith.constant 0 : index
      %418 = vector.load %arg1[%c0_444, %c1_445, %c1_446, %c5_447, %c0_448, %c0_449] : memref<1x2x4x9x19x128xf32, #tpu.memory_space<vmem>>, vector<1x1x1x4x19x128xf32>
      %419 = vector.shape_cast %418 : vector<1x1x1x4x19x128xf32> to vector<4x19x128xf32>
      %420 = vector.broadcast %49 : f32 to vector<4x19x128xf32>
      %421 = arith.mulf %420, %419 : vector<4x19x128xf32>
      %422 = arith.addf %417, %421 : vector<4x19x128xf32>
      %c0_450 = arith.constant 0 : index
      %c1_451 = arith.constant 1 : index
      %c2_452 = arith.constant 2 : index
      %c5_453 = arith.constant 5 : index
      %c0_454 = arith.constant 0 : index
      %c0_455 = arith.constant 0 : index
      %423 = vector.load %arg1[%c0_450, %c1_451, %c2_452, %c5_453, %c0_454, %c0_455] : memref<1x2x4x9x19x128xf32, #tpu.memory_space<vmem>>, vector<1x1x1x4x19x128xf32>
      %424 = vector.shape_cast %423 : vector<1x1x1x4x19x128xf32> to vector<4x19x128xf32>
      %425 = vector.broadcast %53 : f32 to vector<4x19x128xf32>
      %426 = arith.mulf %425, %424 : vector<4x19x128xf32>
      %427 = arith.addf %422, %426 : vector<4x19x128xf32>
      %c0_456 = arith.constant 0 : index
      %c1_457 = arith.constant 1 : index
      %c3_458 = arith.constant 3 : index
      %c5_459 = arith.constant 5 : index
      %c0_460 = arith.constant 0 : index
      %c0_461 = arith.constant 0 : index
      %428 = vector.load %arg1[%c0_456, %c1_457, %c3_458, %c5_459, %c0_460, %c0_461] : memref<1x2x4x9x19x128xf32, #tpu.memory_space<vmem>>, vector<1x1x1x4x19x128xf32>
      %429 = vector.shape_cast %428 : vector<1x1x1x4x19x128xf32> to vector<4x19x128xf32>
      %430 = vector.broadcast %57 : f32 to vector<4x19x128xf32>
      %431 = arith.mulf %430, %429 : vector<4x19x128xf32>
      %432 = arith.addf %427, %431 : vector<4x19x128xf32>
      %433 = arith.maximumf %388, %432 : vector<4x19x128xf32>
      %434 = vector.broadcast %59 : f32 to vector<4x19x128xf32>
      %435 = arith.addf %433, %434 : vector<4x19x128xf32>
      %cst_462 = arith.constant 0.000000e+00 : f32
      %436 = vector.broadcast %cst_462 : f32 to vector<4x19x128xf32>
      %437 = arith.maximumf %435, %436 : vector<4x19x128xf32>
      %438 = vector.extract_strided_slice %437 {offsets = [0, 0, 0], sizes = [1, 19, 128], strides = [1, 1, 1]} : vector<4x19x128xf32> to vector<1x19x128xf32>
      %439 = vector.shape_cast %438 : vector<1x19x128xf32> to vector<19x128xf32>
      %c96 = arith.constant 96 : index
      %c0_463 = arith.constant 0 : index
      %440 = vector.load %arg9[%c96, %c0_463] : memref<192x128xf32, #tpu.memory_space<vmem>>, vector<19x128xf32>
      tpu.vector_store %arg9[%c96, %c0_463], %439 {strides = array<i32>} : memref<192x128xf32, #tpu.memory_space<vmem>>, vector<19x128xf32>,
      %441 = vector.extract_strided_slice %437 {offsets = [1, 0, 0], sizes = [1, 19, 128], strides = [1, 1, 1]} : vector<4x19x128xf32> to vector<1x19x128xf32>
      %442 = vector.shape_cast %441 : vector<1x19x128xf32> to vector<19x128xf32>
      %c120 = arith.constant 120 : index
      %c0_464 = arith.constant 0 : index
      %443 = vector.load %arg9[%c120, %c0_464] : memref<192x128xf32, #tpu.memory_space<vmem>>, vector<19x128xf32>
      tpu.vector_store %arg9[%c120, %c0_464], %442 {strides = array<i32>} : memref<192x128xf32, #tpu.memory_space<vmem>>, vector<19x128xf32>,
      %444 = vector.extract_strided_slice %437 {offsets = [2, 0, 0], sizes = [1, 19, 128], strides = [1, 1, 1]} : vector<4x19x128xf32> to vector<1x19x128xf32>
      %445 = vector.shape_cast %444 : vector<1x19x128xf32> to vector<19x128xf32>
      %c144 = arith.constant 144 : index
      %c0_465 = arith.constant 0 : index
      %446 = vector.load %arg9[%c144, %c0_465] : memref<192x128xf32, #tpu.memory_space<vmem>>, vector<19x128xf32>
      tpu.vector_store %arg9[%c144, %c0_465], %445 {strides = array<i32>} : memref<192x128xf32, #tpu.memory_space<vmem>>, vector<19x128xf32>,
      %447 = vector.extract_strided_slice %437 {offsets = [3, 0, 0], sizes = [1, 19, 128], strides = [1, 1, 1]} : vector<4x19x128xf32> to vector<1x19x128xf32>
      %448 = vector.shape_cast %447 : vector<1x19x128xf32> to vector<19x128xf32>
      %c168 = arith.constant 168 : index
      %c0_466 = arith.constant 0 : index
      %449 = vector.load %arg9[%c168, %c0_466] : memref<192x128xf32, #tpu.memory_space<vmem>>, vector<19x128xf32>
      tpu.vector_store %arg9[%c168, %c0_466], %448 {strides = array<i32>} : memref<192x128xf32, #tpu.memory_space<vmem>>, vector<19x128xf32>,
      %c0_467 = arith.constant 0 : index
      %c0_468 = arith.constant 0 : index
      %450 = vector.load %arg10[%c0_467, %c0_468] : memref<64x128xf32, #tpu.memory_space<vmem>>, vector<64x128xf32>
      %451 = arith.index_cast %21 : i32 to index
      %c0_469 = arith.constant 0 : index
      %c0_470 = arith.constant 0 : index
      %452 = vector.load %arg4[%451, %c0_469, %c0_470] : memref<6x64x192xf32, #tpu.memory_space<vmem>>, vector<1x64x192xf32>
      %453 = vector.shape_cast %452 : vector<1x64x192xf32> to vector<64x192xf32>
      %c0_471 = arith.constant 0 : index
      %c0_472 = arith.constant 0 : index
      %454 = vector.load %arg9[%c0_471, %c0_472] : memref<192x128xf32, #tpu.memory_space<vmem>>, vector<192x128xf32>
      %cst_473 = arith.constant dense<0.000000e+00> : vector<64x128xf32>
      %455 = tpu.matmul %453, %454, %cst_473 {dimension_numbers = #tpu.dot_dimension_numbers<[1], [0], [0], [1], [0, 0, 1, 1], [], []>} : vector<64x192xf32>, vector<192x128xf32>, vector<64x128xf32> -> vector<64x128xf32>
      %456 = arith.addf %450, %455 : vector<64x128xf32>
      %c0_474 = arith.constant 0 : index
      %c0_475 = arith.constant 0 : index
      %457 = vector.load %arg10[%c0_474, %c0_475] : memref<64x128xf32, #tpu.memory_space<vmem>>, vector<64x128xf32>
      tpu.vector_store %arg10[%c0_474, %c0_475], %456 {strides = array<i32>} : memref<64x128xf32, #tpu.memory_space<vmem>>, vector<64x128xf32>,
    }
    %c6_i32_4 = arith.constant 6 : i32
    %c0_5 = arith.constant 0 : index
    %c0_6 = arith.constant 0 : index
    %5 = vector.load %arg10[%c0_5, %c0_6] : memref<64x128xf32, #tpu.memory_space<vmem>>, vector<64x128xf32>
    %c0_7 = arith.constant 0 : index
    %c0_8 = arith.constant 0 : index
    %6 = vector.load %arg5[%c0_7, %c0_8] : memref<64x1xf32, #tpu.memory_space<vmem>>, vector<64x1xf32>
    %7 = vector.broadcast %6 : vector<64x1xf32> to vector<64x128xf32>
    %8 = arith.addf %5, %7 : vector<64x128xf32>
    %cst_9 = arith.constant 0.000000e+00 : f32
    %9 = vector.broadcast %cst_9 : f32 to vector<64x128xf32>
    %10 = arith.maximumf %8, %9 : vector<64x128xf32>
    %c0_10 = arith.constant 0 : index
    %c0_11 = arith.constant 0 : index
    %11 = vector.load %arg6[%c0_10, %c0_11] : memref<64x1xf32, #tpu.memory_space<vmem>>, vector<64x1xf32>
    %12 = vector.broadcast %11 : vector<64x1xf32> to vector<64x128xf32>
    %13 = arith.mulf %10, %12 : vector<64x128xf32>
    %cst_12 = arith.constant dense<0.000000e+00> : vector<128xf32>
    %14 = vector.multi_reduction <add>, %13, %cst_12 [0] : vector<64x128xf32> to vector<128xf32>
    %15 = vector.shape_cast %14 : vector<128xf32> to vector<1x128xf32>
    %c0_13 = arith.constant 0 : index
    %16 = memref.load %arg7[%c0_13] : memref<1xf32, #tpu.memory_space<smem>>
    %17 = vector.broadcast %16 : f32 to vector<1x128xf32>
    %18 = arith.addf %15, %17 : vector<1x128xf32>
    %c0_14 = arith.constant 0 : index
    %c0_15 = arith.constant 0 : index
    %19 = vector.load %arg8[%c0_14, %c0_15] : memref<1x128xf32, #tpu.memory_space<vmem>>, vector<1x128xf32>
    tpu.vector_store %arg8[%c0_14, %c0_15], %18 {strides = array<i32>} : memref<1x128xf32, #tpu.memory_space<vmem>>, vector<1x128xf32>,
    return
  }
  func.func @transform_0(%arg0: i32) -> (i32, i32, i32, i32, i32, i32) {
    %c0_i32 = arith.constant 0 : i32
    %c0_i32_0 = arith.constant 0 : i32
    %c0_i32_1 = arith.constant 0 : i32
    %c0_i32_2 = arith.constant 0 : i32
    %c0_i32_3 = arith.constant 0 : i32
    %c0_i32_4 = arith.constant 0 : i32
    return %arg0, %c0_i32, %c0_i32_0, %c0_i32_1, %c0_i32_2, %c0_i32_3 : i32, i32, i32, i32, i32, i32
  }
  func.func @transform_1(%arg0: i32) -> i32 {
    %c0_i32 = arith.constant 0 : i32
    %c0_i32_0 = arith.constant 0 : i32
    return %c0_i32 : i32
  }
  func.func @transform_2(%arg0: i32) -> i32 {
    %c0_i32 = arith.constant 0 : i32
    %c0_i32_0 = arith.constant 0 : i32
    return %c0_i32 : i32
  }
  func.func @transform_3(%arg0: i32) -> (i32, i32, i32) {
    %c0_i32 = arith.constant 0 : i32
    %c0_i32_0 = arith.constant 0 : i32
    %c0_i32_1 = arith.constant 0 : i32
    %c0_i32_2 = arith.constant 0 : i32
    return %c0_i32, %c0_i32_0, %c0_i32_1 : i32, i32, i32
  }
  func.func @transform_4(%arg0: i32) -> (i32, i32) {
    %c0_i32 = arith.constant 0 : i32
    %c0_i32_0 = arith.constant 0 : i32
    %c0_i32_1 = arith.constant 0 : i32
    return %c0_i32, %c0_i32_0 : i32, i32
  }
  func.func @transform_5(%arg0: i32) -> (i32, i32) {
    %c0_i32 = arith.constant 0 : i32
    %c0_i32_0 = arith.constant 0 : i32
    %c0_i32_1 = arith.constant 0 : i32
    return %c0_i32, %c0_i32_0 : i32, i32
  }
  func.func @transform_6(%arg0: i32) -> i32 {
    %c0_i32 = arith.constant 0 : i32
    %c0_i32_0 = arith.constant 0 : i32
    return %c0_i32 : i32
  }
  func.func @transform_7(%arg0: i32) -> (i32, i32) {
    %c0_i32 = arith.constant 0 : i32
    %c0_i32_0 = arith.constant 0 : i32
    return %c0_i32, %arg0 : i32, i32
  }
}

</mosaic_0001>

<bundles_post_ra>
// kernel: net_cf_forward.1
= control target key start
LH: loop header
LB: loop body
LE: loop exit
PB: predicated region body
PF: predicated region fallthrough
CT: control target
= control target key end

     0   :  { %s6191_s0 = inlined_call_operand.vmem [shape: f32[2,2,4,9,19,128], index: 0, kind: input, shape index: {}]   ;;  %s6192_s1 = inlined_call_operand.vmem [shape: f32[54], index: 1, kind: input, shape index: {}]   ;;  %s6193_s2 = inlined_call_operand.vmem [shape: f32[6], index: 2, kind: input, shape index: {}]   ;;  %s6194_s3 = inlined_call_operand.vmem [shape: f32[6,64,192], index: 3, kind: input, shape index: {}]   ;;  %s6195_s4 = inlined_call_operand.vmem [shape: f32[64,1], index: 4, kind: input, shape index: {}]   ;;  %s6196_s5 = inlined_call_operand.vmem [shape: f32[64,1], index: 5, kind: input, shape index: {}]   ;;  %s6197_s6 = inlined_call_operand.<no memory space> [shape: f32[1], index: 6, kind: input, shape index: {}]   ;;  %s6198_s7 = inlined_call_operand.vmem [shape: f32[1,256], index: 7, kind: output, shape index: {}]  }
   0x1   :  { %12 = sst [smem:[#allocation4]] %s6197_s6 }
   0x2   :  { %13 = vsyncpa [#allocation6], 0 }
   0x3   :  { %14 = vsyncpa [#allocation8], 0  ;;  %s3579_s26 = smov 0  }
   0x4 LB: > { %s3585_s27 = sadd.s32 4294967295, %s3525_s26   ;;  %p2981_p0 = scmp.ge.s32.totalorder %s3525_s26, 1  ;;  %s3525_s26 = sphi %s3579_s26, %s20_s26  }
   0x5   : > { %p203_p1 = scmp.lt.s32.totalorder %s3525_s26, 3  ;;  %s216_s29 = sshll.u32 %s6192_s1, 4  ;;  %s217_s29 = int_to_ptr.vmem [resolvable:$true] %s216_s29 }
   0x6   : > { %p6199_p3 = scmp.eq.s32.totalorder %s3585_s27, 0  ;;  %s227_s10 = sshll.u32 %s6193_s2, 4  ;;  %s228_s10 = int_to_ptr.vmem [resolvable:$true] %s227_s10 }
   0x7   : > { %p3592_p2 = pnand %p2981_p0, %p203_p1  ;;  %s3477_s12 = scalar_lea.vmem %s217_s29, 16 }
   0x8   : > { %p3478_p6 = scmp.ne.s32.totalorder %s217_s29, %s3477_s12  ;;  %p3485_p10 = scmp.lt.s32.totalorder %s217_s29, %s217_s29 }
   0x9   : > { %s6220_s30 = scalar_select %p3592_p2, 1, 0 }
   0xa   : > { %p3443_p4 = pneg %p3592_p2  ;;  %p3486_p11 = scmp.lt.s32.totalorder %s3477_s12, %s3477_s12 }
   0xc   : > { %p3604_p5 = pnand %p6199_p3, %p3443_p4  ;;  %p3487_p12 = por %p3486_p11, %p3485_p10 }
   0xe   : > { %p3479_p7 = pneg %p3604_p5 }
  0x10   : > { %p3480_p8 = pnand %p3479_p7, %p3478_p6 }
  0x12   : > { %p3481_p9 = pneg %p3480_p8 }
  0x14   : > { %p3488_p13 = pnand %p3487_p12, %p3481_p9 }
  0x16   : > { %3491 = shalt.err (!%p3488_p13)
}
  0x17   : > { %s3531_s13 = smov [#allocation5]   ;;  %s3492_s14 = scalar_lea.vmem %s228_s10, 16 }
  0x18   : > { %3446 = dma.vmem_to_smem (!%p3604_p5), %s217_s29, 16, %s3531_s13, [#allocation6]  }
  0x19   : > { %p3493_p0 = scmp.ne.s32.totalorder %s228_s10, %s3492_s14  ;;  %p3500_p3 = scmp.lt.s32.totalorder %s228_s10, %s228_s10 }
  0x1a   : > { %p3501_p2 = scmp.lt.s32.totalorder %s3492_s14, %s3492_s14 }
  0x1b   : > { %p3495_p1 = pnand %p3493_p0, %p3479_p7 }
  0x1c   : > { %p3502_p6 = por %p3501_p2, %p3500_p3 }
  0x1d   : > { %p3496_p4 = pneg %p3495_p1 }
  0x1f   : > { %p3503_p8 = pnand %p3502_p6, %p3496_p4 }
  0x21   : > { %3506 = shalt.err (!%p3503_p8)
}
  0x22   : > { %s3532_s15 = smov [#allocation7]   ;;  %p6222_p9 = scmp.ne.s32.totalorder %s6220_s30, 0 }
  0x23   : > { %3449 = dma.vmem_to_smem (!%p3604_p5), %s228_s10, 16, %s3532_s15, [#allocation8]  }
  0x24   : > { %260 = sbr.rel (%p6222_p9) target bundleno = 805 (0x325), region = 48  ;;  %p6223_p10 = scmp.eq.s32.totalorder (!%p6222_p9), %s3585_s27, 0 }
  0x2b   : > { %3516 = dma.done.wait (%p6223_p10), [#allocation6], 16   ;;  %p6224_p11 = pmov %p6223_p10 }
  0x2c   : > { %p6225_p7 = pmov %p6223_p10 }
  0x2d   : > { %3518 = vsyncadd (%p6224_p11), [#allocation6], 4294967280 }
  0x2e   : > { %3520 = dma.done.wait (%p6225_p7), [#allocation8], 16   ;;  %p6226_p2 = pmov %p6225_p7 }
  0x30   : > { %3522 = vsyncadd (%p6226_p2), [#allocation8], 4294967280 }
  0x31   : > { %270 = sfence }
  0x32   : > { %p295_p3 = scmp.lt.s32.totalorder %s3585_s27, 1  ;;  %v3533_v0 = vmov 0.0   ;;  %s3640_s23 = smov 0  }
  0x33   : > { %303 = vst [vmem:[#allocation3] sm:$0xff] %v3533_v0  ;;  %304 = vst [vmem:[#allocation3 + $0x8] sm:$0xff] %v3533_v0 }
  0x34   : > { %305 = vst [vmem:[#allocation3 + $0x10] sm:$0xff] %v3533_v0  ;;  %306 = vst [vmem:[#allocation3 + $0x18] sm:$0xff] %v3533_v0  ;;  %s6249_s27 = smov (!%p295_p3, %s3585_s27), 1 }
  0x35   : > { %307 = vst [vmem:[#allocation3 + $0x20] sm:$0xff] %v3533_v0  ;;  %308 = vst [vmem:[#allocation3 + $0x28] sm:$0xff] %v3533_v0  ;;  %s3434_s16 = smul.u32 1728, %s6249_s27  ;;  %s302_s19 = scalar_lea.vmem %s6198_s7, %s6249_s27 }
  0x36   : > { %309 = vst [vmem:[#allocation3 + $0x30] sm:$0xff] %v3533_v0  ;;  %310 = vst [vmem:[#allocation3 + $0x38] sm:$0xff] %v3533_v0 }
  0x37   : > { %313 = vst [vmem:[#allocation2 + $0x10] sm:$0xff] %v3533_v0  ;;  %316 = vst [vmem:[#allocation2 + $0x28] sm:$0xff] %v3533_v0  ;;  %s3638_s22 = scalar_lea.vmem %s6191_s0, %s3434_s16 }
  0x38   : > { %319 = vst [vmem:[#allocation2 + $0x40] sm:$0xff] %v3533_v0  ;;  %322 = vst [vmem:[#allocation2 + $0x58] sm:$0xff] %v3533_v0 }
  0x39   : > { %325 = vst [vmem:[#allocation2 + $0x70] sm:$0xff] %v3533_v0  ;;  %328 = vst [vmem:[#allocation2 + $0x88] sm:$0xff] %v3533_v0 }
  0x3a   : > { %331 = vst [vmem:[#allocation2 + $0xa0] sm:$0xff] %v3533_v0  ;;  %334 = vst [vmem:[#allocation2 + $0xb8] sm:$0xff] %v3533_v0 }
  0x3b LB: >> { %v6201_v1 = vmov 0.0|0.0   ;;  %s3648_s24 = smul.u32 9, %s3529_s23  ;;  %s359_s25 = sld [smem:[#allocation7 + %s3529_s23]]  ;;  %v360_v2 = vld [vmem:[%s3638_s22] sm:$0xff]  ;;  %v361_v3 = vld [vmem:[%s3638_s22 + $0x8] sm:$0xff]  ;;  %v2989_v4 = vld [vmem:[%s3638_s22 + $0xd8] sm:$0xff]  ;;  %s3529_s23 = sphi %s3640_s23, %s340_s23  }
  0x3c   : >> { %3374 = vmatprep.subr.bf16.mxu0 %v6201_v1  ;;  %3410 = vmatprep.subr.bf16.mxu1 %v6201_v1  ;;  %v2990_v5 = vld [vmem:[%s3638_s22 + $0xe0] sm:$0xff]  ;;  %v3001_v7 = vld [vmem:[%s3638_s22 + $0x1b0] sm:$0xff]  ;;  %v3002_v15 = vld [vmem:[%s3638_s22 + $0x1b8] sm:$0xff]  ;;  %vm2612_vm0 = vcmask 523264  }
  0x3d   : >> { %s342_s28 = sld [smem:[#allocation5 + %s3648_s24]]  ;;  %s343_s6 = sadd.s32 1, %s3648_s24  ;;  %v3695_v20 = vld [vmem:[%s3638_s22 + $0x360] sm:$0xff]  ;;  %v3698_v21 = vld [vmem:[%s3638_s22 + $0x368] sm:$0xff]  ;;  %v3709_v28 = vld [vmem:[%s3638_s22 + $0x438] sm:$0xff] }
  0x3e   : >> { %s344_s29 = sld [smem:[#allocation5 + %s343_s6]]  ;;  %s345_s30 = sadd.s32 2, %s3648_s24  ;;  %v3712_v29 = vld [vmem:[%s3638_s22 + $0x440] sm:$0xff]  ;;  %v3726_v38 = vld [vmem:[%s3638_s22 + $0x510] sm:$0xff]  ;;  %v3729_v39 = vld [vmem:[%s3638_s22 + $0x518] sm:$0xff] }
  0x3f   : >> { %s346_s8 = sld [smem:[#allocation5 + %s345_s30]]  ;;  %s347_s9 = sadd.s32 3, %s3648_s24  ;;  %v3732_v40 = vld [vmem:[%s3638_s22 + $0x18] sm:$0xff]  ;;  %v3739_v43 = vld [vmem:[%s3638_s22 + $0x20] sm:$0xff]  ;;  %v3745_v45 = vld [vmem:[%s3638_s22 + $0xf0] sm:$0xff] }
  0x40   : >> { %s3655_s10 = sld [smem:[#allocation5 + %s347_s9]]  ;;  %s349_s11 = sadd.s32 4, %s3648_s24  ;;  %v3755_v51 = vld [vmem:[%s3638_s22 + $0xf8] sm:$0xff]  ;;  %v3085_v52 = vld [vmem:[%s3638_s22 + $0x288] sm:$0xff]  ;;  %v3086_v53 = vld [vmem:[%s3638_s22 + $0x290] sm:$0xff] }
  0x41   : >> { %s3658_s12 = sld [smem:[#allocation5 + %s349_s11]]  ;;  %s351_s13 = sadd.s32 5, %s3648_s24  ;;  %v3674_v8 = vstv %s359_s25  ;;  %v3764_v56 = vld [vmem:[%s3638_s22 + $0x1c8] sm:$0xff]  ;;  %v3767_v57 = vld [vmem:[%s3638_s22 + $0x1d0] sm:$0xff] }
  0x42   : >> { %s3664_s14 = sld [smem:[#allocation5 + %s351_s13]]  ;;  %s353_s15 = sadd.s32 6, %s3648_s24 }
  0x43   : >> { %s3668_s16 = sld [smem:[#allocation5 + %s353_s15]]  ;;  %s355_s17 = sadd.s32 7, %s3648_s24  ;;  %v3671_v6 = vstv %s342_s28 }
  0x44   : >> { %s3676_s18 = sld [smem:[#allocation5 + %s355_s17]]  ;;  %s357_s20 = sadd.s32 8, %s3648_s24  ;;  %v373_v9 = vmul.f32 %v3671_v6, %v360_v2  ;;  %v374_v10 = vmul.f32 %v3671_v6, %v361_v3  ;;  %v3681_v11 = vstv %s344_s29  ;;  %v689_v12 = vmul.f32 %v2989_v4, %v3671_v6 }
  0x45   : >> { %s3684_s21 = sld [smem:[#allocation5 + %s357_s20]]  ;;  %v399_v13 = vmul.f32 %v2989_v4, %v3681_v11  ;;  %v400_v14 = vmul.f32 %v2990_v5, %v3681_v11  ;;  %v3689_v16 = vstv %s346_s8  ;;  %v690_v17 = vmul.f32 %v2990_v5, %v3671_v6  ;;  %s3373_s24 = sshll.u32 %s3529_s23, 7 }
  0x46   : >> { %v437_v18 = vmul.f32 %v3001_v7, %v3689_v16  ;;  %v438_v19 = vmul.f32 %v3002_v15, %v3689_v16  ;;  %v3701_v22 = vstv %s3655_s10  ;;  %v701_v23 = vmul.f32 %v3001_v7, %v3681_v11  ;;  %s5638_s6 = scalar_lea.vmem %s6194_s3, %s3373_s24  ;;  %s340_s23 = sadd.s32 1, %s3529_s23  }
  0x47   : >> { %v411_v24 = vadd.f32 %v399_v13, %v373_v9  ;;  %v412_v25 = vadd.f32 %v400_v14, %v374_v10  ;;  %v475_v26 = vmul.f32 %v3695_v20, %v3701_v22  ;;  %v476_v27 = vmul.f32 %v3698_v21, %v3701_v22  ;;  %v3790_v13 = vld [vmem:[%s3638_s22 + $0x5f0] sm:$0xff]  ;;  %p337_p5 = scmp.ge.s32.totalorder %s340_s23, 6  }
  0x48   : >> { %v3715_v30 = vstv %s3658_s12  ;;  %v3718_v31 = vstv %s3664_s14  ;;  %v702_v32 = vmul.f32 %v3002_v15, %v3681_v11  ;;  %v713_v33 = vadd.f32 %v701_v23, %v689_v12  ;;  %v3787_v12 = vld [vmem:[%s3638_s22 + $0x5e8] sm:$0xff]  ;;  %s2899_s15 = sld [smem:[#allocation4]] (%p337_p5) }
  0x49   : >> { %v449_v34 = vadd.f32 %v437_v18, %v411_v24  ;;  %v450_v35 = vadd.f32 %v438_v19, %v412_v25  ;;  %v513_v36 = vmul.f32 %v3709_v28, %v3715_v30  ;;  %v514_v37 = vmul.f32 %v3712_v29, %v3715_v30 }
  0x4a   : >> { %v551_v41 = vmul.f32 %v3726_v38, %v3718_v31  ;;  %v552_v42 = vmul.f32 %v3729_v39, %v3718_v31  ;;  %v3742_v44 = vstv %s3668_s16  ;;  %v3748_v46 = vstv %s3676_s18 }
  0x4b   : >> { %v487_v47 = vadd.f32 %v475_v26, %v449_v34  ;;  %v488_v48 = vadd.f32 %v476_v27, %v450_v35  ;;  %v589_v49 = vmul.f32 %v3732_v40, %v3742_v44  ;;  %v590_v50 = vmul.f32 %v3739_v43, %v3742_v44  ;;  %v3805_v34 = vld [vmem:[%s3638_s22 + $0x2a0] sm:$0xff]  ;;  %v3808_v35 = vld [vmem:[%s3638_s22 + $0x2a8] sm:$0xff] }
  0x4c   : >> { %v627_v54 = vmul.f32 %v3745_v45, %v3748_v46  ;;  %v628_v55 = vmul.f32 %v3755_v51, %v3748_v46  ;;  %v3770_v58 = vstv %s3684_s21  ;;  %v714_v59 = vadd.f32 %v702_v32, %v690_v17 }
  0x4d   : >> { %v525_v60 = vadd.f32 %v513_v36, %v487_v47  ;;  %v526_v61 = vadd.f32 %v514_v37, %v488_v48  ;;  %v665_v62 = vmul.f32 %v3764_v56, %v3770_v58  ;;  %v666_v63 = vmul.f32 %v3767_v57, %v3770_v58 }
  0x4e   : >> { %v738_v0 = vmul.f32 %v3085_v52, %v3689_v16  ;;  %v739_v2 = vmul.f32 %v3086_v53, %v3689_v16  ;;  %v762_v3 = vmul.f32 %v3709_v28, %v3701_v22  ;;  %v763_v4 = vmul.f32 %v3712_v29, %v3701_v22 }
  0x4f   : >> { %v563_v5 = vadd.f32 %v551_v41, %v525_v60  ;;  %v564_v7 = vadd.f32 %v552_v42, %v526_v61  ;;  %v786_v9 = vmul.f32 %v3726_v38, %v3715_v30  ;;  %v787_v10 = vmul.f32 %v3729_v39, %v3715_v30 }
  0x50   : >> { %v750_v14 = vadd.f32 %v738_v0, %v713_v33  ;;  %v751_v15 = vadd.f32 %v739_v2, %v714_v59  ;;  %v823_v17 = vmul.f32 %v3787_v12, %v3718_v31  ;;  %v824_v18 = vmul.f32 %v3790_v13, %v3718_v31 }
  0x51   : >> { %v601_v19 = vadd.f32 %v589_v49, %v563_v5  ;;  %v602_v23 = vadd.f32 %v590_v50, %v564_v7  ;;  %v847_v24 = vmul.f32 %v3745_v45, %v3742_v44  ;;  %v848_v25 = vmul.f32 %v3755_v51, %v3742_v44 }
  0x52   : >> { %v774_v26 = vadd.f32 %v762_v3, %v750_v14  ;;  %v775_v27 = vadd.f32 %v763_v4, %v751_v15  ;;  %v871_v32 = vmul.f32 %v3764_v56, %v3748_v46  ;;  %v872_v33 = vmul.f32 %v3767_v57, %v3748_v46  ;;  %v3843_v15 = vld [vmem:[%s3638_s22 + $0x378] sm:$0xff] }
  0x53   : >> { %v639_v36 = vadd.f32 %v627_v54, %v601_v19  ;;  %v640_v37 = vadd.f32 %v628_v55, %v602_v23  ;;  %v908_v41 = vmul.f32 %v3805_v34, %v3770_v58  ;;  %v909_v42 = vmul.f32 %v3808_v35, %v3770_v58 }
  0x54   : >> { %v798_v47 = vadd.f32 %v786_v9, %v774_v26  ;;  %v799_v48 = vadd.f32 %v787_v10, %v775_v27  ;;  %v944_v49 = vmul.f32 %v3695_v20, %v3671_v6  ;;  %v945_v50 = vmul.f32 %v3698_v21, %v3671_v6  ;;  %v3856_v26 = vld [vmem:[%s3638_s22 + $0x458] sm:$0xff] }
  0x55   : >> { %v3818_v52 = vadd.f32 %v665_v62, %v639_v36  ;;  %v3820_v53 = vadd.f32 %v666_v63, %v640_v37  ;;  %v956_v54 = vmul.f32 %v3709_v28, %v3681_v11  ;;  %v957_v55 = vmul.f32 %v3712_v29, %v3681_v11 }
  0x56   : >> { %v835_v59 = vadd.f32 %v823_v17, %v798_v47  ;;  %v836_v60 = vadd.f32 %v824_v18, %v799_v48  ;;  %v980_v20 = vmul.f32 %v3726_v38, %v3689_v16  ;;  %v981_v21 = vmul.f32 %v3729_v39, %v3689_v16  ;;  %v3846_v17 = vld [vmem:[%s3638_s22 + $0x380] sm:$0xff] }
  0x57   : >> { %v968_v61 = vadd.f32 %v956_v54, %v944_v49  ;;  %v969_v62 = vadd.f32 %v957_v55, %v945_v50  ;;  %v1004_v63 = vmul.f32 %v3732_v40, %v3701_v22  ;;  %v1005_v0 = vmul.f32 %v3739_v43, %v3701_v22 }
  0x58   : >> { %v859_v2 = vadd.f32 %v847_v24, %v835_v59  ;;  %v860_v3 = vadd.f32 %v848_v25, %v836_v60  ;;  %v1028_v4 = vmul.f32 %v3745_v45, %v3715_v30  ;;  %v1029_v5 = vmul.f32 %v3755_v51, %v3715_v30  ;;  %v3853_v25 = vld [vmem:[%s3638_s22 + $0x450] sm:$0xff] }
  0x59   : >> { %v992_v7 = vadd.f32 %v980_v20, %v968_v61  ;;  %v993_v9 = vadd.f32 %v981_v21, %v969_v62  ;;  %v1052_v10 = vmul.f32 %v3764_v56, %v3718_v31  ;;  %v1053_v14 = vmul.f32 %v3767_v57, %v3718_v31 }
  0x5a   : >> { %v883_v18 = vadd.f32 %v871_v32, %v859_v2  ;;  %v884_v19 = vadd.f32 %v872_v33, %v860_v3  ;;  %v1089_v23 = vmul.f32 %v3843_v15, %v3742_v44  ;;  %v1090_v24 = vmul.f32 %v3846_v17, %v3742_v44  ;;  %v3863_v32 = vld [vmem:[%s3638_s22 + $0x528] sm:$0xff]  ;;  %v3866_v33 = vld [vmem:[%s3638_s22 + $0x530] sm:$0xff] }
  0x5b   : >> { %v1016_v27 = vadd.f32 %v1004_v63, %v992_v7  ;;  %v1017_v36 = vadd.f32 %v1005_v0, %v993_v9  ;;  %v1126_v37 = vmul.f32 %v3853_v25, %v3748_v46  ;;  %v1127_v47 = vmul.f32 %v3856_v26, %v3748_v46 }
  0x5c   : >> { %v920_v48 = vadd.f32 %v908_v41, %v883_v18  ;;  %v921_v49 = vadd.f32 %v909_v42, %v884_v19  ;;  %v1163_v50 = vmul.f32 %v3863_v32, %v3770_v58  ;;  %v1164_v54 = vmul.f32 %v3866_v33, %v3770_v58  ;;  %v362_v19 = vld [vmem:[%s3638_s22 + $0x10] sm:$0x7] }
  0x5d   : >> { %v1040_v55 = vadd.f32 %v1028_v4, %v1016_v27  ;;  %v1041_v59 = vadd.f32 %v1029_v5, %v1017_v36  ;;  %v1199_v60 = vmul.f32 %v3709_v28, %v3671_v6  ;;  %v1200_v20 = vmul.f32 %v3712_v29, %v3671_v6 }
  0x5e   : >> { %v932_v21 = vmax.f32 %v3818_v52, %v920_v48  ;;  %v933_v61 = vmax.f32 %v3820_v53, %v921_v49  ;;  %v1211_v41 = vmul.f32 %v3726_v38, %v3681_v11  ;;  %v1212_v42 = vmul.f32 %v3729_v39, %v3681_v11  ;;  %v3908_v48 = vld [vmem:[%s3638_s22 + $0x600] sm:$0xff] }
  0x5f   : >> { %v1064_v62 = vadd.f32 %v1052_v10, %v1040_v55  ;;  %v1065_v63 = vadd.f32 %v1053_v14, %v1041_v59  ;;  %v1235_v0 = vmul.f32 %v3787_v12, %v3689_v16  ;;  %v1236_v28 = vmul.f32 %v3790_v13, %v3689_v16 }
  0x60   : >> { %v1223_v2 = vadd.f32 %v1211_v41, %v1199_v60  ;;  %v1224_v29 = vadd.f32 %v1212_v42, %v1200_v20  ;;  %v1259_v52 = vmul.f32 %v3745_v45, %v3701_v22  ;;  %v1260_v38 = vmul.f32 %v3755_v51, %v3701_v22 }
  0x61   : >> { %v1101_v53 = vadd.f32 %v1089_v23, %v1064_v62  ;;  %v1102_v3 = vadd.f32 %v1090_v24, %v1065_v63  ;;  %v1283_v39 = vmul.f32 %v3764_v56, %v3715_v30  ;;  %v1284_v12 = vmul.f32 %v3767_v57, %v3715_v30 }
  0x62   : >> { %v1247_v13 = vadd.f32 %v1235_v0, %v1223_v2  ;;  %v1248_v4 = vadd.f32 %v1236_v28, %v1224_v29  ;;  %v1307_v5 = vmul.f32 %v3805_v34, %v3718_v31  ;;  %v1308_v7 = vmul.f32 %v3808_v35, %v3718_v31  ;;  %v3003_v28 = vld [vmem:[%s3638_s22 + $0x1c0] sm:$0x7] }
  0x63   : >> { %v1138_v9 = vadd.f32 %v1126_v37, %v1101_v53  ;;  %v1139_v10 = vadd.f32 %v1127_v47, %v1102_v3  ;;  %v1331_v14 = vmul.f32 %v3853_v25, %v3742_v44  ;;  %v1332_v18 = vmul.f32 %v3856_v26, %v3742_v44  ;;  %v3911_v37 = vld [vmem:[%s3638_s22 + $0x608] sm:$0xff]  ;;  %v3929_v53 = vld [vmem:[%s3638_s22 + $0x370] sm:$0x7] }
  0x64   : >> { %v1271_v23 = vadd.f32 %v1259_v52, %v1247_v13  ;;  %v1272_v24 = vadd.f32 %v1260_v38, %v1248_v4  ;;  %v1355_v27 = vmul.f32 %v3863_v32, %v3748_v46  ;;  %v1356_v36 = vmul.f32 %v3866_v33, %v3748_v46  ;;  %v2991_v47 = vld [vmem:[%s3638_s22 + $0xe8] sm:$0x7] }
  0x65   : >> { %v1175_v49 = vadd.f32 %v1163_v50, %v1138_v9  ;;  %v1176_v55 = vadd.f32 %v1164_v54, %v1139_v10  ;;  %v1392_v59 = vmul.f32 %v3908_v48, %v3770_v58  ;;  %v1393_v60 = vmul.f32 %v3911_v37, %v3770_v58 }
  0x66   : >> { %v1295_v20 = vadd.f32 %v1283_v39, %v1271_v23  ;;  %v1296_v41 = vadd.f32 %v1284_v12, %v1272_v24  ;;  %v375_v42 = vmul.f32 %v3671_v6, %v362_v19  ;;  %v376_v62 = vmul.f32 %v3732_v40, %v3671_v6  ;;  %v3936_v39 = vld [vmem:[%s3638_s22 + $0x448] sm:$0x7] }
  0x67   : >> { %v1187_v63 = vmax.f32 %v932_v21, %v1175_v49  ;;  %v1188_v0 = vmax.f32 %v933_v61, %v1176_v55  ;;  %v401_v50 = vmul.f32 %v2991_v47, %v3681_v11  ;;  %v402_v54 = vmul.f32 %v3745_v45, %v3681_v11  ;;  %v3950_v23 = vld [vmem:[%s3638_s22 + $0x28] sm:$0x7] }
  0x68   : >> { %v1319_v2 = vadd.f32 %v1307_v5, %v1295_v20  ;;  %v1320_v29 = vadd.f32 %v1308_v7, %v1296_v41  ;;  %v439_v52 = vmul.f32 %v3003_v28, %v3689_v16  ;;  %v440_v38 = vmul.f32 %v3764_v56, %v3689_v16  ;;  %v3943_v7 = vld [vmem:[%s3638_s22 + $0x520] sm:$0x7] }
  0x69   : >> { %v413_v40 = vadd.f32 %v401_v50, %v375_v42  ;;  %v414_v21 = vadd.f32 %v402_v54, %v376_v62  ;;  %v477_v61 = vmul.f32 %v3929_v53, %v3701_v22  ;;  %v478_v3 = vmul.f32 %v3843_v15, %v3701_v22  ;;  %v3960_v41 = vld [vmem:[%s3638_s22 + $0x100] sm:$0x7]  ;;  %v3963_v42 = vld [vmem:[%s3638_s22 + $0x108] sm:$0xff] }
  0x6a   : >> { %v1343_v12 = vadd.f32 %v1331_v14, %v1319_v2  ;;  %v1344_v13 = vadd.f32 %v1332_v18, %v1320_v29  ;;  %v515_v4 = vmul.f32 %v3936_v39, %v3715_v30  ;;  %v516_v5 = vmul.f32 %v3853_v25, %v3715_v30  ;;  %v3953_v18 = vld [vmem:[%s3638_s22 + $0x30] sm:$0xff]  ;;  %v3970_v2 = vld [vmem:[%s3638_s22 + $0x1d8] sm:$0x7] }
  0x6b   : >> { %v451_v9 = vadd.f32 %v439_v52, %v413_v40  ;;  %v452_v10 = vadd.f32 %v440_v38, %v414_v21  ;;  %v553_v19 = vmul.f32 %v3943_v7, %v3718_v31  ;;  %v554_v14 = vmul.f32 %v3863_v32, %v3718_v31  ;;  %v3087_v21 = vld [vmem:[%s3638_s22 + $0x298] sm:$0x7] }
  0x6c   : >> { %v1367_v24 = vadd.f32 %v1355_v27, %v1343_v12  ;;  %v1368_v49 = vadd.f32 %v1356_v36, %v1344_v13  ;;  %v591_v55 = vmul.f32 %v3950_v23, %v3742_v44  ;;  %v592_v20 = vmul.f32 %v3953_v18, %v3742_v44  ;;  %v3973_v36 = vld [vmem:[%s3638_s22 + $0x1e0] sm:$0xff] }
  0x6d   : >> { %v489_v62 = vadd.f32 %v477_v61, %v451_v9  ;;  %v490_v50 = vadd.f32 %v478_v3, %v452_v10  ;;  %v629_v54 = vmul.f32 %v3960_v41, %v3748_v46  ;;  %v630_v27 = vmul.f32 %v3963_v42, %v3748_v46 }
  0x6e   : >> { %v1404_v29 = vadd.f32 %v1392_v59, %v1367_v24  ;;  %v1405_v52 = vadd.f32 %v1393_v60, %v1368_v49  ;;  %v667_v38 = vmul.f32 %v3970_v2, %v3770_v58  ;;  %v668_v40 = vmul.f32 %v3973_v36, %v3770_v58 }
  0x6f   : >> { %v527_v61 = vadd.f32 %v515_v4, %v489_v62  ;;  %v528_v3 = vadd.f32 %v516_v5, %v490_v50  ;;  %v691_v12 = vmul.f32 %v2991_v47, %v3671_v6  ;;  %v692_v13 = vmul.f32 %v3745_v45, %v3671_v6 }
  0x70   : >> { %v1416_v9 = vmax.f32 %v1187_v63, %v1404_v29  ;;  %v1417_v10 = vmax.f32 %v1188_v0, %v1405_v52  ;;  %v703_v1 = vmul.f32 %v3003_v28, %v3681_v11  ;;  %v704_v59 = vmul.f32 %v3764_v56, %v3681_v11 }
  0x71   : >> { %v565_v60 = vadd.f32 %v553_v19, %v527_v61  ;;  %v566_v24 = vadd.f32 %v554_v14, %v528_v3  ;;  %v740_v49 = vmul.f32 %v3087_v21, %v3689_v16  ;;  %v741_v4 = vmul.f32 %v3805_v34, %v3689_v16 }
  0x72   : >> { %v1429_v5 = vadd.f32 %v3674_v8, %v1416_v9  ;;  %v1430_v47 = vadd.f32 %v3674_v8, %v1417_v10  ;;  %v715_v45 = vadd.f32 %v703_v1, %v691_v12  ;;  %v716_v63 = vadd.f32 %v704_v59, %v692_v13 }
  0x73   : >> { %v603_v0 = vadd.f32 %v591_v55, %v565_v60  ;;  %v604_v62 = vadd.f32 %v592_v20, %v566_v24  ;;  %v764_v28 = vmul.f32 %v3936_v39, %v3701_v22  ;;  %v765_v56 = vmul.f32 %v3853_v25, %v3701_v22  ;;  %v4000_v55 = vld [vmem:[%s3638_s22 + $0x5f8] sm:$0x7]  ;;  %v4015_v24 = vld [vmem:[%s3638_s22 + $0x2b0] sm:$0x7] }
  0x74   : >> { %v1441_v19 = vmax.f32 %v1429_v5, 0.0  ;;  %v1442_v14 = vmax.f32 %v1430_v47, 0.0  ;;  %v752_v50 = vadd.f32 %v740_v49, %v715_v45  ;;  %v753_v29 = vadd.f32 %v741_v4, %v716_v63  ;;  %v4024_v4 = vld [vmem:[%s3638_s22 + $0x2b8] sm:$0xff] }
  0x75   : >> { %v641_v34 = vadd.f32 %v629_v54, %v603_v0  ;;  %v642_v52 = vadd.f32 %v630_v27, %v604_v62  ;;  %v788_v21 = vmul.f32 %v3943_v7, %v3715_v30  ;;  %v789_v1 = vmul.f32 %v3863_v32, %v3715_v30  ;;  %6228 = vst [vmem:[#allocation11_spill] sm:$0xff] %v4024_v4 }
  0x76   : >> { %v3375_v20 = vpack.c.bf16 %v1442_v14, %v1441_v19  ;;  %v776_v61 = vadd.f32 %v764_v28, %v752_v50  ;;  %v777_v3 = vadd.f32 %v765_v56, %v753_v29  ;;  %v825_v12 = vmul.f32 %v4000_v55, %v3718_v31 }
  0x77   : >> { %v4004_v13 = vadd.f32 %v667_v38, %v641_v34  ;;  %v4006_v54 = vadd.f32 %v668_v40, %v642_v52  ;;  %v826_v27 = vmul.f32 %v3908_v48, %v3718_v31  ;;  %v849_v9 = vmul.f32 %v3960_v41, %v3742_v44 }
  0x78   : >> { %3376 = vmatpush1.bf16.msra.mxu0 %v3375_v20  ;;  %3422 = vmatpush1.bf16.msra.mxu1 %v3375_v20  ;;  %v800_v10 = vadd.f32 %v788_v21, %v776_v61  ;;  %v801_v59 = vadd.f32 %v789_v1, %v777_v3  ;;  %v850_v60 = vmul.f32 %v3963_v42, %v3742_v44  ;;  %v6227_v49 = vmov 0.0|0.0   ;;  %v3135_v20 = vld [vmem:[%s3638_s22 + $0x460] sm:$0x7] }
  0x79   : >> { %3377 = vmatprep.subr.bf16.mxu0 %v6227_v49  ;;  %3411 = vmatprep.subr.bf16.mxu1 %v6227_v49  ;;  %v873_v38 = vmul.f32 %v3970_v2, %v3748_v46  ;;  %v874_v40 = vmul.f32 %v3973_v36, %v3748_v46  ;;  %v910_v5 = vmul.f32 %v4015_v24, %v3770_v58 }
  0x7a   : >> { %v837_v47 = vadd.f32 %v825_v12, %v800_v10  ;;  %v838_v45 = vadd.f32 %v826_v27, %v801_v59  ;;  %v911_v63 = vmul.f32 %v4024_v4, %v3770_v58  ;;  %v946_v0 = vmul.f32 %v3929_v53, %v3671_v6  ;;  %v3147_v27 = vld [vmem:[%s3638_s22 + $0x538] sm:$0x7] }
  0x7b   : >> { %v947_v62 = vmul.f32 %v3843_v15, %v3671_v6  ;;  %v958_v28 = vmul.f32 %v3936_v39, %v3681_v11  ;;  %v959_v56 = vmul.f32 %v3853_v25, %v3681_v11  ;;  %v982_v19 = vmul.f32 %v3943_v7, %v3689_v16  ;;  %v3123_v15 = vld [vmem:[%s3638_s22 + $0x388] sm:$0x7] }
  0x7c   : >> { %v861_v14 = vadd.f32 %v849_v9, %v837_v47  ;;  %v862_v50 = vadd.f32 %v850_v60, %v838_v45  ;;  %v983_v29 = vmul.f32 %v3863_v32, %v3689_v16  ;;  %v1006_v53 = vmul.f32 %v3950_v23, %v3701_v22  ;;  %v4058_v60 = vld [vmem:[%s3638_s22 + $0x390] sm:$0xff] }
  0x7d   : >> { %v970_v34 = vadd.f32 %v958_v28, %v946_v0  ;;  %v971_v52 = vadd.f32 %v959_v56, %v947_v62  ;;  %v1007_v21 = vmul.f32 %v3953_v18, %v3701_v22  ;;  %v1030_v1 = vmul.f32 %v3960_v41, %v3715_v30  ;;  %v4064_v0 = vld [vmem:[%s3638_s22 + $0x468] sm:$0xff] }
  0x7e   : >> { %v885_v61 = vadd.f32 %v873_v38, %v861_v14  ;;  %v886_v3 = vadd.f32 %v874_v40, %v862_v50  ;;  %v1031_v12 = vmul.f32 %v3963_v42, %v3715_v30  ;;  %v1054_v23 = vmul.f32 %v3970_v2, %v3718_v31  ;;  %v4070_v14 = vld [vmem:[%s3638_s22 + $0x540] sm:$0xff] }
  0x7f   : >> { %v994_v9 = vadd.f32 %v982_v19, %v970_v34  ;;  %v995_v10 = vadd.f32 %v983_v29, %v971_v52  ;;  %v1055_v59 = vmul.f32 %v3973_v36, %v3718_v31  ;;  %v1091_v47 = vmul.f32 %v3123_v15, %v3742_v44 }
  0x80   : >> { %v922_v45 = vadd.f32 %v910_v5, %v885_v61  ;;  %v923_v38 = vadd.f32 %v911_v63, %v886_v3  ;;  %v1092_v40 = vmul.f32 %v4058_v60, %v3742_v44  ;;  %v1128_v62 = vmul.f32 %v3135_v20, %v3748_v46 }
  0x81   : >> { %v1018_v28 = vadd.f32 %v1006_v53, %v994_v9  ;;  %v1019_v56 = vadd.f32 %v1007_v21, %v995_v10  ;;  %v1129_v19 = vmul.f32 %v4064_v0, %v3748_v46  ;;  %v1165_v50 = vmul.f32 %v3147_v27, %v3770_v58 }
  0x82   : >> { %v934_v29 = vmax.f32 %v4004_v13, %v922_v45  ;;  %v935_v5 = vmax.f32 %v4006_v54, %v923_v38  ;;  %v1166_v63 = vmul.f32 %v4070_v14, %v3770_v58  ;;  %v1201_v15 = vmul.f32 %v3936_v39, %v3671_v6 }
  0x83   : >> { %v1042_v34 = vadd.f32 %v1030_v1, %v1018_v28  ;;  %v1043_v53 = vadd.f32 %v1031_v12, %v1019_v56  ;;  %v1202_v52 = vmul.f32 %v3853_v25, %v3671_v6  ;;  %v1213_v21 = vmul.f32 %v3943_v7, %v3681_v11  ;;  %v365_v56 = vld [vmem:[%s3638_s22 + $0x28] sm:$0x7] }
  0x84   : >> { %v1214_v61 = vmul.f32 %v3863_v32, %v3681_v11  ;;  %v1237_v13 = vmul.f32 %v4000_v55, %v3689_v16  ;;  %v1238_v54 = vmul.f32 %v3908_v48, %v3689_v16  ;;  %v1261_v39 = vmul.f32 %v3960_v41, %v3701_v22 }
  0x85   : >> { %v1066_v1 = vadd.f32 %v1054_v23, %v1042_v34  ;;  %v1067_v3 = vadd.f32 %v1055_v59, %v1043_v53  ;;  %v1225_v25 = vadd.f32 %v1213_v21, %v1201_v15  ;;  %v1262_v7 = vmul.f32 %v3963_v42, %v3701_v22  ;;  %v3159_v59 = vld [vmem:[%s3638_s22 + $0x610] sm:$0x7]  ;;  %v2994_v53 = vld [vmem:[%s3638_s22 + $0x100] sm:$0x7] }
  0x86   : >> { %v1226_v12 = vadd.f32 %v1214_v61, %v1202_v52  ;;  %v1285_v32 = vmul.f32 %v3970_v2, %v3715_v30  ;;  %v1286_v55 = vmul.f32 %v3973_v36, %v3715_v30  ;;  %v1309_v48 = vmul.f32 %v4015_v24, %v3718_v31 }
  0x87   : >> { %v1103_v41 = vadd.f32 %v1091_v47, %v1066_v1  ;;  %v1104_v23 = vadd.f32 %v1092_v40, %v1067_v3  ;;  %v1249_v9 = vadd.f32 %v1237_v13, %v1225_v25  ;;  %v1310_v10 = vmul.f32 %v4024_v4, %v3718_v31  ;;  %v4110_v40 = vld [vmem:[%s3638_s22 + $0x618] sm:$0xff] }
  0x88   : >> { %v1250_v45 = vadd.f32 %v1238_v54, %v1226_v12  ;;  %v1333_v38 = vmul.f32 %v3135_v20, %v3742_v44  ;;  %v1334_v2 = vmul.f32 %v4064_v0, %v3742_v44  ;;  %v1357_v28 = vmul.f32 %v3147_v27, %v3748_v46  ;;  %6229 = vst [vmem:[#allocation12_spill] sm:$0xff] %v4110_v40  ;;  %v3006_v3 = vld [vmem:[%s3638_s22 + $0x1d8] sm:$0x7] }
  0x89   : >> { %v1140_v15 = vadd.f32 %v1128_v62, %v1103_v41  ;;  %v1141_v34 = vadd.f32 %v1129_v19, %v1104_v23  ;;  %v1273_v24 = vadd.f32 %v1261_v39, %v1249_v9  ;;  %v1358_v47 = vmul.f32 %v4070_v14, %v3748_v46  ;;  %v4127_v41 = vld [vmem:[%s3638_s22 + $0x388] sm:$0x7]  ;;  %v4132_v9 = vld [vmem:[%s3638_s22 + $0x460] sm:$0x7] }
  0x8a   : >> { %v1274_v52 = vadd.f32 %v1262_v7, %v1250_v45  ;;  %v1394_v21 = vmul.f32 %v3159_v59, %v3770_v58  ;;  %v1395_v20 = vmul.f32 %v4110_v40, %v3770_v58  ;;  %v377_v27 = vmul.f32 %v3739_v43, %v3671_v6 }
  0x8b   : >> { %v1177_v61 = vadd.f32 %v1165_v50, %v1140_v15  ;;  %v1178_v62 = vadd.f32 %v1166_v63, %v1141_v34  ;;  %v1297_v19 = vadd.f32 %v1285_v32, %v1273_v24  ;;  %v378_v13 = vmul.f32 %v3671_v6, %v365_v56  ;;  %v4141_v15 = vld [vmem:[%s3638_s22 + $0x538] sm:$0x7]  ;;  %v4149_v24 = vld [vmem:[%s3638_s22 + $0x40] sm:$0x7] }
  0x8c   : >> { %v1298_v54 = vadd.f32 %v1286_v55, %v1274_v52  ;;  %v403_v39 = vmul.f32 %v3755_v51, %v3681_v11  ;;  %v404_v1 = vmul.f32 %v2994_v53, %v3681_v11  ;;  %v441_v25 = vmul.f32 %v3767_v57, %v3689_v16  ;;  %v4146_v34 = vld [vmem:[%s3638_s22 + $0x38] sm:$0xff] }
  0x8d   : >> { %v1189_v7 = vmax.f32 %v934_v29, %v1177_v61  ;;  %v1190_v12 = vmax.f32 %v935_v5, %v1178_v62  ;;  %v1321_v43 = vadd.f32 %v1309_v48, %v1297_v19  ;;  %v442_v50 = vmul.f32 %v3006_v3, %v3689_v16  ;;  %v4158_v62 = vld [vmem:[%s3638_s22 + $0x110] sm:$0xff] }
  0x8e   : >> { %v1322_v63 = vadd.f32 %v1310_v10, %v1298_v54  ;;  %v415_v32 = vadd.f32 %v403_v39, %v377_v27  ;;  %v416_v55 = vadd.f32 %v404_v1, %v378_v13  ;;  %v479_v23 = vmul.f32 %v3846_v17, %v3701_v22  ;;  %v4161_v39 = vld [vmem:[%s3638_s22 + $0x118] sm:$0x7]  ;;  %v4166_v1 = vld [vmem:[%s3638_s22 + $0x1e8] sm:$0xff] }
  0x8f   : >> { %v1345_v59 = vadd.f32 %v1333_v38, %v1321_v43  ;;  %v480_v29 = vmul.f32 %v4127_v41, %v3701_v22  ;;  %v517_v5 = vmul.f32 %v3856_v26, %v3715_v30  ;;  %v518_v48 = vmul.f32 %v4132_v9, %v3715_v30 }
  0x90   : >> { %v1346_v10 = vadd.f32 %v1334_v2, %v1322_v63  ;;  %v453_v45 = vadd.f32 %v441_v25, %v415_v32  ;;  %v454_v56 = vadd.f32 %v442_v50, %v416_v55  ;;  %v555_v38 = vmul.f32 %v3866_v33, %v3718_v31  ;;  %v4169_v25 = vld [vmem:[%s3638_s22 + $0x1f0] sm:$0x7] }
  0x91   : >> { %v1369_v52 = vadd.f32 %v1357_v28, %v1345_v59  ;;  %v556_v27 = vmul.f32 %v4141_v15, %v3718_v31  ;;  %v593_v2 = vmul.f32 %v4146_v34, %v3742_v44  ;;  %v594_v61 = vmul.f32 %v4149_v24, %v3742_v44 }
  0x92   : >> { %v1370_v19 = vadd.f32 %v1358_v47, %v1346_v10  ;;  %v491_v13 = vadd.f32 %v479_v23, %v453_v45  ;;  %v492_v54 = vadd.f32 %v480_v29, %v454_v56  ;;  %v631_v28 = vmul.f32 %v4158_v62, %v3748_v46  ;;  %v3090_v29 = vld [vmem:[%s3638_s22 + $0x2b0] sm:$0x7] }
  0x93   : >> { %v1406_v43 = vadd.f32 %v1394_v21, %v1369_v52  ;;  %v632_v50 = vmul.f32 %v4161_v39, %v3748_v46  ;;  %v669_v63 = vmul.f32 %v4166_v1, %v3770_v58  ;;  %v670_v47 = vmul.f32 %v4169_v25, %v3770_v58 }
  0x94   : >> { %v1407_v32 = vadd.f32 %v1395_v20, %v1370_v19  ;;  %v529_v55 = vadd.f32 %v517_v5, %v491_v13  ;;  %v530_v23 = vadd.f32 %v518_v48, %v492_v54  ;;  %v693_v59 = vmul.f32 %v3755_v51, %v3671_v6 }
  0x95   : >> { %v1418_v10 = vmax.f32 %v1189_v7, %v1406_v43  ;;  %v694_v45 = vmul.f32 %v2994_v53, %v3671_v6  ;;  %v705_v21 = vmul.f32 %v3767_v57, %v3681_v11  ;;  %v706_v56 = vmul.f32 %v3006_v3, %v3681_v11 }
  0x96   : >> { %v1419_v52 = vmax.f32 %v1190_v12, %v1407_v32  ;;  %v567_v40 = vadd.f32 %v555_v38, %v529_v55  ;;  %v568_v4 = vadd.f32 %v556_v27, %v530_v23  ;;  %v742_v20 = vmul.f32 %v3808_v35, %v3689_v16 }
  0x97   : >> { %v1431_v5 = vadd.f32 %v3674_v8, %v1418_v10  ;;  %v717_v48 = vadd.f32 %v705_v21, %v693_v59  ;;  %v718_v19 = vadd.f32 %v706_v56, %v694_v45  ;;  %v743_v51 = vmul.f32 %v3090_v29, %v3689_v16  ;;  %v4215_v56 = vld [vmem:[%s3638_s22 + $0x2c0] sm:$0xff] }
  0x98   : >> { %v1432_v7 = vadd.f32 %v3674_v8, %v1419_v52  ;;  %v605_v53 = vadd.f32 %v593_v2, %v567_v40  ;;  %v606_v13 = vadd.f32 %v594_v61, %v568_v4  ;;  %v766_v57 = vmul.f32 %v3856_v26, %v3701_v22  ;;  %v4198_v61 = vld [vmem:[%s3638_s22 + $0x610] sm:$0x7] }
  0x99   : >> { %v1443_v3 = vmax.f32 %v1431_v5, 0.0  ;;  %v754_v12 = vadd.f32 %v742_v20, %v717_v48  ;;  %v755_v38 = vadd.f32 %v743_v51, %v718_v19  ;;  %v767_v35 = vmul.f32 %v4132_v9, %v3701_v22 }
  0x9a   : >> { %v1444_v27 = vmax.f32 %v1432_v7, 0.0  ;;  %v643_v54 = vadd.f32 %v631_v28, %v605_v53  ;;  %v644_v43 = vadd.f32 %v632_v50, %v606_v13  ;;  %v790_v32 = vmul.f32 %v3866_v33, %v3715_v30 }
  0x9b   : >> { %1455 = vst [vmem:[#allocation2 + $0x10] sm:$0x7] %v1443_v3  ;;  %v778_v40 = vadd.f32 %v766_v57, %v754_v12  ;;  %v779_v4 = vadd.f32 %v767_v35, %v755_v38  ;;  %v791_v2 = vmul.f32 %v4141_v15, %v3715_v30  ;;  %v827_v55 = vmul.f32 %v3911_v37, %v3718_v31  ;;  %v3126_v35 = vld [vmem:[%s3638_s22 + $0x3a0] sm:$0x7] }
  0x9c   : >> { %v4202_v23 = vadd.f32 %v669_v63, %v643_v54  ;;  %v4204_v28 = vadd.f32 %v670_v47, %v644_v43  ;;  %v828_v50 = vmul.f32 %v4198_v61, %v3718_v31  ;;  %v851_v59 = vmul.f32 %v4158_v62, %v3742_v44  ;;  %v4218_v63 = vld [vmem:[%s3638_s22 + $0x2c8] sm:$0x7] }
  0x9d   : >> { %v802_v29 = vadd.f32 %v790_v32, %v778_v40  ;;  %v803_v10 = vadd.f32 %v791_v2, %v779_v4  ;;  %v852_v45 = vmul.f32 %v4161_v39, %v3742_v44  ;;  %v875_v21 = vmul.f32 %v4166_v1, %v3748_v46 }
  0x9e   : >> { %v876_v47 = vmul.f32 %v4169_v25, %v3748_v46  ;;  %v912_v52 = vmul.f32 %v4215_v56, %v3770_v58  ;;  %v913_v20 = vmul.f32 %v4218_v63, %v3770_v58  ;;  %v948_v5 = vmul.f32 %v3846_v17, %v3671_v6 }
  0x9f   : >> { %v839_v48 = vadd.f32 %v827_v55, %v802_v29  ;;  %v840_v19 = vadd.f32 %v828_v50, %v803_v10  ;;  %v949_v51 = vmul.f32 %v4127_v41, %v3671_v6  ;;  %v960_v7 = vmul.f32 %v3856_v26, %v3681_v11  ;;  %v4250_v29 = vld [vmem:[%s3638_s22 + $0x398] sm:$0xff] }
  0xa0   : >> { %v961_v53 = vmul.f32 %v4132_v9, %v3681_v11  ;;  %v984_v13 = vmul.f32 %v3866_v33, %v3689_v16  ;;  %v985_v57 = vmul.f32 %v4141_v15, %v3689_v16  ;;  %v1008_v17 = vmul.f32 %v4146_v34, %v3701_v22 }
  0xa1   : >> { %v863_v3 = vadd.f32 %v851_v59, %v839_v48  ;;  %v864_v12 = vadd.f32 %v852_v45, %v840_v19  ;;  %v972_v41 = vadd.f32 %v960_v7, %v948_v5  ;;  %v1009_v38 = vmul.f32 %v4149_v24, %v3701_v22  ;;  %v3138_v24 = vld [vmem:[%s3638_s22 + $0x478] sm:$0x7] }
  0xa2   : >> { %v2590_v54 = vld [vmem:[#allocation2 + $0x10] sm:$0xff]  ;;  %v973_v43 = vadd.f32 %v961_v53, %v949_v51  ;;  %v1032_v32 = vmul.f32 %v4158_v62, %v3715_v30  ;;  %v1033_v40 = vmul.f32 %v4161_v39, %v3715_v30  ;;  %v1056_v4 = vmul.f32 %v4166_v1, %v3718_v31 }
  0xa3   : >> { %v3378_v2 = vpack.c.bf16 %v1444_v27, %v2590_v54  ;;  %v887_v55 = vadd.f32 %v875_v21, %v863_v3  ;;  %v888_v50 = vadd.f32 %v876_v47, %v864_v12  ;;  %v996_v59 = vadd.f32 %v984_v13, %v972_v41  ;;  %v4259_v47 = vld [vmem:[%s3638_s22 + $0x470] sm:$0xff] }
  0xa4   : >> { %v997_v10 = vadd.f32 %v985_v57, %v973_v43  ;;  %v1057_v45 = vmul.f32 %v4169_v25, %v3718_v31  ;;  %v1093_v5 = vmul.f32 %v4250_v29, %v3742_v44  ;;  %v1094_v48 = vmul.f32 %v3126_v35, %v3742_v44  ;;  %v3150_v51 = vld [vmem:[%s3638_s22 + $0x550] sm:$0x7]  ;;  %v4268_v57 = vld [vmem:[%s3638_s22 + $0x548] sm:$0xff] }
  0xa5   : >> { %3379 = vmatpush1.bf16.msra.mxu0 %v3378_v2  ;;  %3423 = vmatpush1.bf16.msra.mxu1 %v3378_v2  ;;  %v924_v27 = vadd.f32 %v912_v52, %v887_v55  ;;  %v925_v19 = vadd.f32 %v913_v20, %v888_v50  ;;  %v1020_v21 = vadd.f32 %v1008_v17, %v996_v59 }
  0xa6   : >> { %3380 = vmatprep.subr.bf16.mxu0 %v6227_v49  ;;  %3412 = vmatprep.subr.bf16.mxu1 %v6227_v49  ;;  %v1021_v7 = vadd.f32 %v1009_v38, %v997_v10  ;;  %v1130_v53 = vmul.f32 %v4259_v47, %v3748_v46  ;;  %v1131_v13 = vmul.f32 %v3138_v24, %v3748_v46 }
  0xa7   : >> { %v936_v3 = vmax.f32 %v4202_v23, %v924_v27  ;;  %v937_v52 = vmax.f32 %v4204_v28, %v925_v19  ;;  %v1044_v20 = vadd.f32 %v1032_v32, %v1020_v21  ;;  %v1167_v17 = vmul.f32 %v4268_v57, %v3770_v58  ;;  %v4307_v21 = vld [vmem:[%s3638_s22 + $0x620] sm:$0xff] }
  0xa8   : >> { %v1045_v12 = vadd.f32 %v1033_v40, %v1021_v7  ;;  %v1168_v41 = vmul.f32 %v3150_v51, %v3770_v58  ;;  %v1203_v38 = vmul.f32 %v3856_v26, %v3671_v6  ;;  %v1204_v35 = vmul.f32 %v4132_v9, %v3671_v6 }
  0xa9   : >> { %v1068_v54 = vadd.f32 %v1056_v4, %v1044_v20  ;;  %v1215_v43 = vmul.f32 %v3866_v33, %v3681_v11  ;;  %v1216_v23 = vmul.f32 %v4141_v15, %v3681_v11  ;;  %v1239_v28 = vmul.f32 %v3911_v37, %v3689_v16 }
  0xaa   : >> { %v1069_v32 = vadd.f32 %v1057_v45, %v1045_v12  ;;  %v1240_v40 = vmul.f32 %v4198_v61, %v3689_v16  ;;  %v1263_v26 = vmul.f32 %v4158_v62, %v3701_v22  ;;  %v1264_v9 = vmul.f32 %v4161_v39, %v3701_v22 }
  0xab   : >> { %v1105_v4 = vadd.f32 %v1093_v5, %v1068_v54  ;;  %v1227_v2 = vadd.f32 %v1215_v43, %v1203_v38  ;;  %v1228_v33 = vadd.f32 %v1216_v23, %v1204_v35  ;;  %v1287_v15 = vmul.f32 %v4166_v1, %v3715_v30  ;;  %v3162_v5 = vld [vmem:[%s3638_s22 + $0x628] sm:$0x7] }
  0xac   : >> { %v1106_v55 = vadd.f32 %v1094_v48, %v1069_v32  ;;  %v1288_v37 = vmul.f32 %v4169_v25, %v3715_v30  ;;  %v1311_v61 = vmul.f32 %v4215_v56, %v3718_v31  ;;  %v1312_v50 = vmul.f32 %v4218_v63, %v3718_v31 }
  0xad   : >> { %v1142_v59 = vadd.f32 %v1130_v53, %v1105_v4  ;;  %v1251_v10 = vadd.f32 %v1239_v28, %v1227_v2  ;;  %v1252_v39 = vadd.f32 %v1240_v40, %v1228_v33  ;;  %v1335_v45 = vmul.f32 %v4259_v47, %v3742_v44 }
  0xae   : >> { %v1143_v27 = vadd.f32 %v1131_v13, %v1106_v55  ;;  %v1336_v19 = vmul.f32 %v3138_v24, %v3742_v44  ;;  %v1359_v48 = vmul.f32 %v4268_v57, %v3748_v46  ;;  %v1360_v25 = vmul.f32 %v3150_v51, %v3748_v46  ;;  %v4335_v55 = vld [vmem:[%s3638_s22 + $0x48] sm:$0xff] }
  0xaf   : >> { %v1179_v7 = vadd.f32 %v1167_v17, %v1142_v59  ;;  %v1275_v20 = vadd.f32 %v1263_v26, %v1251_v10  ;;  %v1276_v63 = vadd.f32 %v1264_v9, %v1252_v39  ;;  %v1396_v53 = vmul.f32 %v4307_v21, %v3770_v58  ;;  %v4347_v39 = vld [vmem:[%s3638_s22 + $0x120] sm:$0xff] }
  0xb0   : >> { %v1180_v12 = vadd.f32 %v1168_v41, %v1143_v27  ;;  %v1397_v38 = vmul.f32 %v3162_v5, %v3770_v58  ;;  %v379_v13 = vmul.f32 %v3953_v18, %v3671_v6  ;;  %v380_v24 = vmul.f32 %v4146_v34, %v3671_v6 }
  0xb1   : >> { %v1191_v35 = vmax.f32 %v936_v3, %v1179_v7  ;;  %v1299_v54 = vadd.f32 %v1287_v15, %v1275_v20  ;;  %v1300_v51 = vadd.f32 %v1288_v37, %v1276_v63  ;;  %v405_v17 = vmul.f32 %v3963_v42, %v3681_v11  ;;  %v4338_v37 = vld [vmem:[%s3638_s22 + $0x50] sm:$0xff]  ;;  %v4355_v20 = vld [vmem:[%s3638_s22 + $0x1f8] sm:$0xff]  ;;  %v4358_v63 = vld [vmem:[%s3638_s22 + $0x200] sm:$0xff] }
  0xb2   : >> { %v1192_v43 = vmax.f32 %v937_v52, %v1180_v12  ;;  %v406_v23 = vmul.f32 %v4158_v62, %v3681_v11  ;;  %v443_v41 = vmul.f32 %v3973_v36, %v3689_v16  ;;  %v444_v18 = vmul.f32 %v4166_v1, %v3689_v16 }
  0xb3   : >> { %v1323_v28 = vadd.f32 %v1311_v61, %v1299_v54  ;;  %v1324_v34 = vadd.f32 %v1312_v50, %v1300_v51  ;;  %v417_v3 = vadd.f32 %v405_v17, %v379_v13  ;;  %v481_v32 = vmul.f32 %v4058_v60, %v3701_v22 }
  0xb4   : >> { %v418_v40 = vadd.f32 %v406_v23, %v380_v24  ;;  %v482_v52 = vmul.f32 %v4250_v29, %v3701_v22  ;;  %v519_v26 = vmul.f32 %v4064_v0, %v3715_v30  ;;  %v520_v9 = vmul.f32 %v4259_v47, %v3715_v30 }
  0xb5   : >> { %v1347_v4 = vadd.f32 %v1335_v45, %v1323_v28  ;;  %v1348_v2 = vadd.f32 %v1336_v19, %v1324_v34  ;;  %v455_v33 = vadd.f32 %v443_v41, %v417_v3  ;;  %v557_v15 = vmul.f32 %v4070_v14, %v3718_v31  ;;  %v4350_v19 = vld [vmem:[%s3638_s22 + $0x128] sm:$0xff] }
  0xb6   : >> { %v456_v61 = vadd.f32 %v444_v18, %v418_v40  ;;  %v558_v50 = vmul.f32 %v4268_v57, %v3718_v31  ;;  %v595_v59 = vmul.f32 %v4335_v55, %v3742_v44  ;;  %v596_v10 = vmul.f32 %v4338_v37, %v3742_v44 }
  0xb7   : >> { %v1371_v45 = vadd.f32 %v1359_v48, %v1347_v4  ;;  %v1372_v5 = vadd.f32 %v1360_v25, %v1348_v2  ;;  %v493_v27 = vadd.f32 %v481_v32, %v455_v33  ;;  %v633_v7 = vmul.f32 %v4347_v39, %v3748_v46 }
  0xb8   : >> { %v494_v12 = vadd.f32 %v482_v52, %v456_v61  ;;  %v634_v13 = vmul.f32 %v4350_v19, %v3748_v46  ;;  %v671_v24 = vmul.f32 %v4355_v20, %v3770_v58  ;;  %v672_v48 = vmul.f32 %v4358_v63, %v3770_v58 }
  0xb9   : >> { %v1408_v25 = vadd.f32 %v1396_v53, %v1371_v45  ;;  %v1409_v54 = vadd.f32 %v1397_v38, %v1372_v5  ;;  %v531_v51 = vadd.f32 %v519_v26, %v493_v27  ;;  %v695_v17 = vmul.f32 %v3963_v42, %v3671_v6  ;;  %v6230_v53 = vld [vmem:[#allocation11_spill] sm:$0xff]  ;;  %v6231_v27 = vld [vmem:[#allocation12_spill] sm:$0xff] }
  0xba   : >> { %v532_v23 = vadd.f32 %v520_v9, %v494_v12  ;;  %v696_v41 = vmul.f32 %v4158_v62, %v3671_v6  ;;  %v707_v18 = vmul.f32 %v3973_v36, %v3681_v11  ;;  %v708_v28 = vmul.f32 %v4166_v1, %v3681_v11 }
  0xbb   : >> { %v1420_v34 = vmax.f32 %v1191_v35, %v1408_v25  ;;  %v1421_v3 = vmax.f32 %v1192_v43, %v1409_v54  ;;  %v569_v32 = vadd.f32 %v557_v15, %v531_v51  ;;  %v744_v38 = vmul.f32 %v6230_v53, %v3689_v16 }
  0xbc   : >> { %v570_v40 = vadd.f32 %v558_v50, %v532_v23  ;;  %v719_v52 = vadd.f32 %v707_v18, %v695_v17  ;;  %v720_v26 = vadd.f32 %v708_v28, %v696_v41  ;;  %v745_v42 = vmul.f32 %v4215_v56, %v3689_v16  ;;  %v4401_v23 = vld [vmem:[%s3638_s22 + $0x2d0] sm:$0xff] }
  0xbd   : >> { %v1433_v62 = vadd.f32 %v3674_v8, %v1420_v34  ;;  %v1434_v9 = vadd.f32 %v3674_v8, %v1421_v3  ;;  %v607_v36 = vadd.f32 %v595_v59, %v569_v32  ;;  %v768_v1 = vmul.f32 %v4064_v0, %v3701_v22 }
  0xbe   : >> { %v608_v35 = vadd.f32 %v596_v10, %v570_v40  ;;  %v756_v43 = vadd.f32 %v744_v38, %v719_v52  ;;  %v757_v4 = vadd.f32 %v745_v42, %v720_v26  ;;  %v769_v2 = vmul.f32 %v4259_v47, %v3701_v22 }
  0xbf   : >> { %v1445_v33 = vmax.f32 %v1433_v62, 0.0  ;;  %v1446_v15 = vmax.f32 %v1434_v9, 0.0  ;;  %v645_v61 = vadd.f32 %v633_v7, %v607_v36  ;;  %v792_v56 = vmul.f32 %v4070_v14, %v3715_v30 }
  0xc0   : >> { %v646_v50 = vadd.f32 %v634_v13, %v608_v35  ;;  %v780_v45 = vadd.f32 %v768_v1, %v756_v43  ;;  %v781_v59 = vadd.f32 %v769_v2, %v757_v4  ;;  %v793_v5 = vmul.f32 %v4268_v57, %v3715_v30 }
  0xc1   : >> { %1458 = vst [vmem:[#allocation2 + $0x28] sm:$0x7] %v1446_v15  ;;  %v4388_v10 = vadd.f32 %v671_v24, %v645_v61  ;;  %v829_v12 = vmul.f32 %v6231_v27, %v3718_v31  ;;  %v830_v25 = vmul.f32 %v4307_v21, %v3718_v31  ;;  %v853_v7 = vmul.f32 %v4347_v39, %v3742_v44  ;;  %v4404_v24 = vld [vmem:[%s3638_s22 + $0x2d8] sm:$0xff] }
  0xc2   : >> { %v4396_v54 = vadd.f32 %v672_v48, %v646_v50  ;;  %v804_v13 = vadd.f32 %v792_v56, %v780_v45  ;;  %v805_v51 = vadd.f32 %v793_v5, %v781_v59  ;;  %v854_v17 = vmul.f32 %v4350_v19, %v3742_v44  ;;  %6232 = vst [vmem:[#allocation11_spill] sm:$0xff] %v4404_v24  ;;  %v4439_v56 = vld [vmem:[%s3638_s22 + $0x3a8] sm:$0xff]  ;;  %v4442_v5 = vld [vmem:[%s3638_s22 + $0x3b0] sm:$0xff] }
  0xc3   : >> { %v877_v41 = vmul.f32 %v4355_v20, %v3748_v46  ;;  %v878_v18 = vmul.f32 %v4358_v63, %v3748_v46  ;;  %v914_v28 = vmul.f32 %v4401_v23, %v3770_v58  ;;  %v915_v48 = vmul.f32 %v4404_v24, %v3770_v58 }
  0xc4   : >> { %v841_v34 = vadd.f32 %v829_v12, %v804_v13  ;;  %v842_v3 = vadd.f32 %v830_v25, %v805_v51  ;;  %v950_v32 = vmul.f32 %v4058_v60, %v3671_v6  ;;  %v951_v53 = vmul.f32 %v4250_v29, %v3671_v6  ;;  %v4447_v25 = vld [vmem:[%s3638_s22 + $0x480] sm:$0xff] }
  0xc5   : >> { %v962_v38 = vmul.f32 %v4064_v0, %v3681_v11  ;;  %v963_v40 = vmul.f32 %v4259_v47, %v3681_v11  ;;  %v986_v52 = vmul.f32 %v4070_v14, %v3689_v16  ;;  %v987_v26 = vmul.f32 %v4268_v57, %v3689_v16 }
  0xc6   : >> { %v865_v42 = vadd.f32 %v853_v7, %v841_v34  ;;  %v866_v62 = vadd.f32 %v854_v17, %v842_v3  ;;  %v1010_v60 = vmul.f32 %v4335_v55, %v3701_v22  ;;  %v1011_v29 = vmul.f32 %v4338_v37, %v3701_v22  ;;  %v4456_v17 = vld [vmem:[%s3638_s22 + $0x488] sm:$0xff]  ;;  %v4463_v3 = vld [vmem:[%s3638_s22 + $0x558] sm:$0xff] }
  0xc7   : >> { %v974_v9 = vadd.f32 %v962_v38, %v950_v32  ;;  %v975_v36 = vadd.f32 %v963_v40, %v951_v53  ;;  %v1034_v1 = vmul.f32 %v4347_v39, %v3715_v30  ;;  %v1035_v35 = vmul.f32 %v4350_v19, %v3715_v30  ;;  %v4472_v32 = vld [vmem:[%s3638_s22 + $0x560] sm:$0xff] }
  0xc8   : >> { %v2593_v43 = vld [vmem:[#allocation2 + $0x28] sm:$0xff]  ;;  %v889_v4 = vadd.f32 %v877_v41, %v865_v42  ;;  %v890_v2 = vadd.f32 %v878_v18, %v866_v62  ;;  %v1058_v15 = vmul.f32 %v4355_v20, %v3718_v31  ;;  %v1059_v61 = vmul.f32 %v4358_v63, %v3718_v31 }
  0xc9   : >> { %v3381_v50 = vpack.c.bf16 %v2593_v43, %v1445_v33  ;;  %v998_v45 = vadd.f32 %v986_v52, %v974_v9  ;;  %v999_v59 = vadd.f32 %v987_v26, %v975_v36  ;;  %v1095_v12 = vmul.f32 %v4439_v56, %v3742_v44 }
  0xca   : >> { %v4449_v7 = vadd.f32 %v914_v28, %v889_v4  ;;  %v4451_v13 = vadd.f32 %v915_v48, %v890_v2  ;;  %v1096_v51 = vmul.f32 %v4442_v5, %v3742_v44  ;;  %v1132_v33 = vmul.f32 %v4447_v25, %v3748_v46 }
  0xcb   : >> { %3382 = vmatpush1.bf16.msra.mxu0 %v3381_v50  ;;  %3424 = vmatpush1.bf16.msra.mxu1 %v3381_v50  ;;  %v1022_v41 = vadd.f32 %v1010_v60, %v998_v45  ;;  %v1023_v18 = vadd.f32 %v1011_v29, %v999_v59  ;;  %v1133_v34 = vmul.f32 %v4456_v17, %v3748_v46 }
  0xcc   : >> { %3383 = vmatprep.subr.bf16.mxu0 %v6227_v49  ;;  %3413 = vmatprep.subr.bf16.mxu1 %v6227_v49  ;;  %v938_v28 = vmax.f32 %v4388_v10, %v4449_v7  ;;  %v939_v48 = vmax.f32 %v4396_v54, %v4451_v13  ;;  %v1169_v53 = vmul.f32 %v4463_v3, %v3770_v58  ;;  %v4510_v7 = vld [vmem:[%s3638_s22 + $0x630] sm:$0xff]  ;;  %v2997_v13 = vld [vmem:[%s3638_s22 + $0x118] sm:$0x7] }
  0xcd   : >> { %v1046_v38 = vadd.f32 %v1034_v1, %v1022_v41  ;;  %v1047_v40 = vadd.f32 %v1035_v35, %v1023_v18  ;;  %v1170_v52 = vmul.f32 %v4472_v32, %v3770_v58  ;;  %v1205_v26 = vmul.f32 %v4064_v0, %v3671_v6 }
  0xce   : >> { %v1206_v42 = vmul.f32 %v4259_v47, %v3671_v6  ;;  %v1217_v10 = vmul.f32 %v4070_v14, %v3681_v11  ;;  %v1218_v54 = vmul.f32 %v4268_v57, %v3681_v11  ;;  %v1241_v62 = vmul.f32 %v6231_v27, %v3689_v16 }
  0xcf   : >> { %v1070_v60 = vadd.f32 %v1058_v15, %v1046_v38  ;;  %v1071_v29 = vadd.f32 %v1059_v61, %v1047_v40  ;;  %v1242_v9 = vmul.f32 %v4307_v21, %v3689_v16  ;;  %v1265_v0 = vmul.f32 %v4347_v39, %v3701_v22  ;;  %v368_v61 = vld [vmem:[%s3638_s22 + $0x40] sm:$0x7]  ;;  %v4516_v38 = vld [vmem:[%s3638_s22 + $0x638] sm:$0xff] }
  0xd0   : >> { %v1229_v36 = vadd.f32 %v1217_v10, %v1205_v26  ;;  %v1230_v47 = vadd.f32 %v1218_v54, %v1206_v42  ;;  %v1266_v14 = vmul.f32 %v4350_v19, %v3701_v22  ;;  %v1289_v57 = vmul.f32 %v4355_v20, %v3715_v30  ;;  %6233 = vst [vmem:[#allocation12_spill] sm:$0xff] %v4516_v38 }
  0xd1   : >> { %v1107_v27 = vadd.f32 %v1095_v12, %v1070_v60  ;;  %v1108_v1 = vadd.f32 %v1096_v51, %v1071_v29  ;;  %v1290_v35 = vmul.f32 %v4358_v63, %v3715_v30  ;;  %v1313_v21 = vmul.f32 %v4401_v23, %v3718_v31  ;;  %v3009_v29 = vld [vmem:[%s3638_s22 + $0x1f0] sm:$0x7] }
  0xd2   : >> { %v1253_v43 = vadd.f32 %v1241_v62, %v1229_v36  ;;  %v1254_v4 = vadd.f32 %v1242_v9, %v1230_v47  ;;  %v1314_v2 = vmul.f32 %v4404_v24, %v3718_v31  ;;  %v1337_v15 = vmul.f32 %v4447_v25, %v3742_v44 }
  0xd3   : >> { %v1144_v50 = vadd.f32 %v1132_v33, %v1107_v27  ;;  %v1145_v45 = vadd.f32 %v1133_v34, %v1108_v1  ;;  %v1338_v59 = vmul.f32 %v4456_v17, %v3742_v44  ;;  %v1361_v12 = vmul.f32 %v4463_v3, %v3748_v46  ;;  %v4536_v27 = vld [vmem:[%s3638_s22 + $0x478] sm:$0x7] }
  0xd4   : >> { %v1277_v51 = vadd.f32 %v1265_v0, %v1253_v43  ;;  %v1278_v41 = vadd.f32 %v1266_v14, %v1254_v4  ;;  %v1362_v18 = vmul.f32 %v4472_v32, %v3748_v46  ;;  %v1398_v33 = vmul.f32 %v4510_v7, %v3770_v58 }
  0xd5   : >> { %v1181_v34 = vadd.f32 %v1169_v53, %v1144_v50  ;;  %v1182_v40 = vadd.f32 %v1170_v52, %v1145_v45  ;;  %v1399_v26 = vmul.f32 %v4516_v38, %v3770_v58  ;;  %v381_v42 = vmul.f32 %v3671_v6, %v368_v61  ;;  %v4547_v61 = vld [vmem:[%s3638_s22 + $0x550] sm:$0x7]  ;;  %v4550_v50 = vld [vmem:[%s3638_s22 + $0x58] sm:$0x7] }
  0xd6   : >> { %v1301_v10 = vadd.f32 %v1289_v57, %v1277_v51  ;;  %v1302_v54 = vadd.f32 %v1290_v35, %v1278_v41  ;;  %v382_v62 = vmul.f32 %v4335_v55, %v3671_v6  ;;  %v407_v60 = vmul.f32 %v2997_v13, %v3681_v11  ;;  %v4533_v55 = vld [vmem:[%s3638_s22 + $0x3a0] sm:$0x7] }
  0xd7   : >> { %v1193_v9 = vmax.f32 %v938_v28, %v1181_v34  ;;  %v1194_v0 = vmax.f32 %v939_v48, %v1182_v40  ;;  %v408_v53 = vmul.f32 %v4347_v39, %v3681_v11  ;;  %v445_v52 = vmul.f32 %v3009_v29, %v3689_v16 }
  0xd8   : >> { %v1325_v36 = vadd.f32 %v1313_v21, %v1301_v10  ;;  %v1326_v47 = vadd.f32 %v1314_v2, %v1302_v54  ;;  %v419_v14 = vadd.f32 %v407_v60, %v381_v42  ;;  %v446_v57 = vmul.f32 %v4355_v20, %v3689_v16  ;;  %v4564_v54 = vld [vmem:[%s3638_s22 + $0x130] sm:$0x7]  ;;  %v4570_v60 = vld [vmem:[%s3638_s22 + $0x208] sm:$0x7] }
  0xd9   : >> { %v420_v28 = vadd.f32 %v408_v53, %v382_v62  ;;  %v483_v48 = vmul.f32 %v4533_v55, %v3701_v22  ;;  %v484_v1 = vmul.f32 %v4439_v56, %v3701_v22  ;;  %v521_v35 = vmul.f32 %v4536_v27, %v3715_v30  ;;  %v4567_v62 = vld [vmem:[%s3638_s22 + $0x138] sm:$0xff] }
  0xda   : >> { %v1349_v21 = vadd.f32 %v1337_v15, %v1325_v36  ;;  %v1350_v43 = vadd.f32 %v1338_v59, %v1326_v47  ;;  %v457_v4 = vadd.f32 %v445_v52, %v419_v14  ;;  %v522_v2 = vmul.f32 %v4447_v25, %v3715_v30  ;;  %v4557_v15 = vld [vmem:[%s3638_s22 + $0x60] sm:$0xff] }
  0xdb   : >> { %v458_v45 = vadd.f32 %v446_v57, %v420_v28  ;;  %v559_v51 = vmul.f32 %v4547_v61, %v3718_v31  ;;  %v560_v41 = vmul.f32 %v4463_v3, %v3718_v31  ;;  %v597_v59 = vmul.f32 %v4550_v50, %v3742_v44 }
  0xdc   : >> { %v1373_v34 = vadd.f32 %v1361_v12, %v1349_v21  ;;  %v1374_v40 = vadd.f32 %v1362_v18, %v1350_v43  ;;  %v495_v42 = vadd.f32 %v483_v48, %v457_v4  ;;  %v598_v10 = vmul.f32 %v4557_v15, %v3742_v44  ;;  %v4577_v12 = vld [vmem:[%s3638_s22 + $0x210] sm:$0xff]  ;;  %v3093_v48 = vld [vmem:[%s3638_s22 + $0x2c8] sm:$0x7] }
  0xdd   : >> { %v496_v53 = vadd.f32 %v484_v1, %v458_v45  ;;  %v635_v52 = vmul.f32 %v4564_v54, %v3748_v46  ;;  %v636_v36 = vmul.f32 %v4567_v62, %v3748_v46  ;;  %v673_v18 = vmul.f32 %v4570_v60, %v3770_v58 }
  0xde   : >> { %v1410_v47 = vadd.f32 %v1398_v33, %v1373_v34  ;;  %v1411_v14 = vadd.f32 %v1399_v26, %v1374_v40  ;;  %v533_v57 = vadd.f32 %v521_v35, %v495_v42  ;;  %v674_v28 = vmul.f32 %v4577_v12, %v3770_v58 }
  0xdf   : >> { %v534_v21 = vadd.f32 %v522_v2, %v496_v53  ;;  %v697_v1 = vmul.f32 %v2997_v13, %v3671_v6  ;;  %v698_v43 = vmul.f32 %v4347_v39, %v3671_v6  ;;  %v709_v4 = vmul.f32 %v3009_v29, %v3681_v11 }
  0xe0   : >> { %v1422_v45 = vmax.f32 %v1193_v9, %v1410_v47  ;;  %v1423_v38 = vmax.f32 %v1194_v0, %v1411_v14  ;;  %v571_v24 = vadd.f32 %v559_v51, %v533_v57  ;;  %v710_v33 = vmul.f32 %v4355_v20, %v3681_v11 }
  0xe1   : >> { %v572_v26 = vadd.f32 %v560_v41, %v534_v21  ;;  %v721_v35 = vadd.f32 %v709_v4, %v697_v1  ;;  %v746_v34 = vmul.f32 %v3093_v48, %v3689_v16  ;;  %v747_v2 = vmul.f32 %v4401_v23, %v3689_v16 }
  0xe2   : >> { %v1435_v13 = vadd.f32 %v3674_v8, %v1422_v45  ;;  %v1436_v39 = vadd.f32 %v3674_v8, %v1423_v38  ;;  %v609_v40 = vadd.f32 %v597_v59, %v571_v24  ;;  %v722_v29 = vadd.f32 %v710_v33, %v698_v43  ;;  %v4604_v38 = vld [vmem:[%s3638_s22 + $0x628] sm:$0x7]  ;;  %v4621_v33 = vld [vmem:[%s3638_s22 + $0x2e0] sm:$0x7] }
  0xe3   : >> { %v610_v9 = vadd.f32 %v598_v10, %v572_v26  ;;  %v758_v0 = vadd.f32 %v746_v34, %v721_v35  ;;  %v770_v51 = vmul.f32 %v4536_v27, %v3701_v22  ;;  %v771_v20 = vmul.f32 %v4447_v25, %v3701_v22  ;;  %v4628_v35 = vld [vmem:[%s3638_s22 + $0x2e8] sm:$0xff] }
  0xe4   : >> { %v1447_v41 = vmax.f32 %v1435_v13, 0.0  ;;  %v1448_v42 = vmax.f32 %v1436_v39, 0.0  ;;  %v647_v53 = vadd.f32 %v635_v52, %v609_v40  ;;  %v759_v47 = vadd.f32 %v747_v2, %v722_v29 }
  0xe5   : >> { %v648_v23 = vadd.f32 %v636_v36, %v610_v9  ;;  %v782_v14 = vadd.f32 %v770_v51, %v758_v0  ;;  %v794_v57 = vmul.f32 %v4547_v61, %v3715_v30  ;;  %v795_v24 = vmul.f32 %v4463_v3, %v3715_v30 }
  0xe6   : >> { %v3384_v59 = vpack.c.bf16 %v1448_v42, %v1447_v41  ;;  %v4606_v10 = vadd.f32 %v673_v18, %v647_v53  ;;  %v783_v48 = vadd.f32 %v771_v20, %v759_v47  ;;  %v831_v52 = vmul.f32 %v4604_v38, %v3718_v31  ;;  %v3129_v42 = vld [vmem:[%s3638_s22 + $0x3b8] sm:$0x7] }
  0xe7   : >> { %v4610_v21 = vadd.f32 %v674_v28, %v648_v23  ;;  %v806_v36 = vadd.f32 %v794_v57, %v782_v14  ;;  %v832_v1 = vmul.f32 %v4510_v7, %v3718_v31  ;;  %v855_v43 = vmul.f32 %v4564_v54, %v3742_v44  ;;  %v3141_v57 = vld [vmem:[%s3638_s22 + $0x490] sm:$0x7] }
  0xe8   : >> { %3385 = vmatpush1.bf16.msra.mxu0 %v3384_v59  ;;  %3425 = vmatpush1.bf16.msra.mxu1 %v3384_v59  ;;  %v807_v4 = vadd.f32 %v795_v24, %v783_v48  ;;  %v856_v18 = vmul.f32 %v4567_v62, %v3742_v44  ;;  %v879_v45 = vmul.f32 %v4570_v60, %v3748_v46 }
  0xe9   : >> { %3386 = vmatprep.subr.bf16.mxu0 %v6227_v49  ;;  %3414 = vmatprep.subr.bf16.mxu1 %v6227_v49  ;;  %v843_v28 = vadd.f32 %v831_v52, %v806_v36  ;;  %v880_v26 = vmul.f32 %v4577_v12, %v3748_v46  ;;  %v916_v34 = vmul.f32 %v4621_v33, %v3770_v58  ;;  %v3153_v52 = vld [vmem:[%s3638_s22 + $0x568] sm:$0x7] }
  0xea   : >> { %v844_v2 = vadd.f32 %v832_v1, %v807_v4  ;;  %v917_v13 = vmul.f32 %v4628_v35, %v3770_v58  ;;  %v952_v39 = vmul.f32 %v4533_v55, %v3671_v6  ;;  %v953_v40 = vmul.f32 %v4439_v56, %v3671_v6  ;;  %v4664_v4 = vld [vmem:[%s3638_s22 + $0x3c0] sm:$0xff] }
  0xeb   : >> { %v867_v29 = vadd.f32 %v855_v43, %v843_v28  ;;  %v964_v9 = vmul.f32 %v4536_v27, %v3681_v11  ;;  %v965_v0 = vmul.f32 %v4447_v25, %v3681_v11  ;;  %v988_v51 = vmul.f32 %v4547_v61, %v3689_v16 }
  0xec   : >> { %v868_v20 = vadd.f32 %v856_v18, %v844_v2  ;;  %v989_v41 = vmul.f32 %v4463_v3, %v3689_v16  ;;  %v1012_v55 = vmul.f32 %v4550_v50, %v3701_v22  ;;  %v1013_v56 = vmul.f32 %v4557_v15, %v3701_v22 }
  0xed   : >> { %v891_v53 = vadd.f32 %v879_v45, %v867_v29  ;;  %v976_v47 = vadd.f32 %v964_v9, %v952_v39  ;;  %v977_v23 = vadd.f32 %v965_v0, %v953_v40  ;;  %v1036_v14 = vmul.f32 %v4564_v54, %v3715_v30  ;;  %v4668_v45 = vld [vmem:[%s3638_s22 + $0x498] sm:$0xff]  ;;  %v4678_v9 = vld [vmem:[%s3638_s22 + $0x570] sm:$0xff] }
  0xee   : >> { %v892_v24 = vadd.f32 %v880_v26, %v868_v20  ;;  %v1037_v59 = vmul.f32 %v4567_v62, %v3715_v30  ;;  %v1060_v50 = vmul.f32 %v4570_v60, %v3718_v31  ;;  %v1061_v48 = vmul.f32 %v4577_v12, %v3718_v31 }
  0xef   : >> { %v4661_v36 = vadd.f32 %v916_v34, %v891_v53  ;;  %v1000_v1 = vadd.f32 %v988_v51, %v976_v47  ;;  %v1001_v43 = vadd.f32 %v989_v41, %v977_v23  ;;  %v1097_v18 = vmul.f32 %v3129_v42, %v3742_v44 }
  0xf0   : >> { %v929_v28 = vadd.f32 %v917_v13, %v892_v24  ;;  %v1098_v26 = vmul.f32 %v4664_v4, %v3742_v44  ;;  %v1134_v2 = vmul.f32 %v3141_v57, %v3748_v46  ;;  %v1135_v39 = vmul.f32 %v4668_v45, %v3748_v46 }
  0xf1   : >> { %v940_v34 = vmax.f32 %v4606_v10, %v4661_v36  ;;  %v1024_v40 = vadd.f32 %v1012_v55, %v1000_v1  ;;  %v1025_v29 = vadd.f32 %v1013_v56, %v1001_v43  ;;  %v1171_v0 = vmul.f32 %v3153_v52, %v3770_v58  ;;  %v3165_v36 = vld [vmem:[%s3638_s22 + $0x640] sm:$0x7]  ;;  %v371_v1 = vld [vmem:[%s3638_s22 + $0x58] sm:$0x7] }
  0xf2   : >> { %v941_v51 = vmax.f32 %v4610_v21, %v929_v28  ;;  %v1172_v13 = vmul.f32 %v4678_v9, %v3770_v58  ;;  %v1207_v20 = vmul.f32 %v4536_v27, %v3671_v6  ;;  %v1208_v41 = vmul.f32 %v4447_v25, %v3671_v6 }
  0xf3   : >> { %v1048_v42 = vadd.f32 %v1036_v14, %v1024_v40  ;;  %v1049_v53 = vadd.f32 %v1037_v59, %v1025_v29  ;;  %v1219_v10 = vmul.f32 %v4547_v61, %v3681_v11  ;;  %v1220_v55 = vmul.f32 %v4463_v3, %v3681_v11 }
  0xf4   : >> { %v1243_v21 = vmul.f32 %v4604_v38, %v3689_v16  ;;  %v1244_v56 = vmul.f32 %v4510_v7, %v3689_v16  ;;  %v1267_v27 = vmul.f32 %v4564_v54, %v3701_v22  ;;  %v1268_v25 = vmul.f32 %v4567_v62, %v3701_v22 }
  0xf5   : >> { %v1072_v47 = vadd.f32 %v1060_v50, %v1048_v42  ;;  %v1073_v23 = vadd.f32 %v1061_v48, %v1049_v53  ;;  %v1231_v61 = vadd.f32 %v1219_v10, %v1207_v20  ;;  %v1232_v14 = vadd.f32 %v1220_v55, %v1208_v41  ;;  %v3000_v41 = vld [vmem:[%s3638_s22 + $0x130] sm:$0x7] }
  0xf6   : >> { %v1291_v3 = vmul.f32 %v4570_v60, %v3715_v30  ;;  %v1292_v38 = vmul.f32 %v4577_v12, %v3715_v30  ;;  %v1315_v7 = vmul.f32 %v4621_v33, %v3718_v31  ;;  %v1316_v54 = vmul.f32 %v4628_v35, %v3718_v31 }
  0xf7   : >> { %v1109_v24 = vadd.f32 %v1097_v18, %v1072_v47  ;;  %v1110_v59 = vadd.f32 %v1098_v26, %v1073_v23  ;;  %v1255_v50 = vadd.f32 %v1243_v21, %v1231_v61  ;;  %v1256_v48 = vadd.f32 %v1244_v56, %v1232_v14  ;;  %v4717_v26 = vld [vmem:[%s3638_s22 + $0x648] sm:$0xff] }
  0xf8   : >> { %v1339_v43 = vmul.f32 %v3141_v57, %v3742_v44  ;;  %v1340_v60 = vmul.f32 %v4668_v45, %v3742_v44  ;;  %v1363_v28 = vmul.f32 %v3153_v52, %v3748_v46  ;;  %v1364_v33 = vmul.f32 %v4678_v9, %v3748_v46  ;;  %6234 = vst [vmem:[#allocation13_spill] sm:$0xff] %v4717_v26  ;;  %v3012_v21 = vld [vmem:[%s3638_s22 + $0x208] sm:$0x7] }
  0xf9   : >> { %v1146_v40 = vadd.f32 %v1134_v2, %v1109_v24  ;;  %v1147_v29 = vadd.f32 %v1135_v39, %v1110_v59  ;;  %v1279_v20 = vadd.f32 %v1267_v27, %v1255_v50  ;;  %v1280_v18 = vadd.f32 %v1268_v25, %v1256_v48  ;;  %v4741_v59 = vld [vmem:[%s3638_s22 + $0x490] sm:$0x7] }
  0xfa   : >> { %v1400_v42 = vmul.f32 %v3165_v36, %v3770_v58  ;;  %v1401_v57 = vmul.f32 %v4717_v26, %v3770_v58  ;;  %v383_v52 = vmul.f32 %v4338_v37, %v3671_v6  ;;  %v384_v53 = vmul.f32 %v3671_v6, %v371_v1  ;;  %v3156_v26 = vld [vmem:[%s3638_s22 + $0x580] sm:$0x7] }
  0xfb   : >> { %v1183_v10 = vadd.f32 %v1171_v0, %v1146_v40  ;;  %v1184_v55 = vadd.f32 %v1172_v13, %v1147_v29  ;;  %v1303_v2 = vadd.f32 %v1291_v3, %v1279_v20  ;;  %v1304_v39 = vadd.f32 %v1292_v38, %v1280_v18  ;;  %v4734_v13 = vld [vmem:[%s3638_s22 + $0x3b8] sm:$0x7]  ;;  %v4755_v40 = vld [vmem:[%s3638_s22 + $0x68] sm:$0xff] }
  0xfc   : >> { %v409_v56 = vmul.f32 %v4350_v19, %v3681_v11  ;;  %v410_v27 = vmul.f32 %v3000_v41, %v3681_v11  ;;  %v447_v25 = vmul.f32 %v4358_v63, %v3689_v16  ;;  %v448_v47 = vmul.f32 %v3012_v21, %v3689_v16 }
  0xfd   : >> { %v1195_v37 = vmax.f32 %v940_v34, %v1183_v10  ;;  %v1196_v23 = vmax.f32 %v941_v51, %v1184_v55  ;;  %v1327_v61 = vadd.f32 %v1315_v7, %v1303_v2  ;;  %v1328_v0 = vadd.f32 %v1316_v54, %v1304_v39  ;;  %v4748_v54 = vld [vmem:[%s3638_s22 + $0x568] sm:$0x7] }
  0xfe   : >> { %v421_v14 = vadd.f32 %v409_v56, %v383_v52  ;;  %v422_v3 = vadd.f32 %v410_v27, %v384_v53  ;;  %v485_v38 = vmul.f32 %v4442_v5, %v3701_v22  ;;  %v486_v24 = vmul.f32 %v4734_v13, %v3701_v22  ;;  %v4765_v53 = vld [vmem:[%s3638_s22 + $0x140] sm:$0xff]  ;;  %v4768_v10 = vld [vmem:[%s3638_s22 + $0x148] sm:$0x7]  ;;  %v4775_v56 = vld [vmem:[%s3638_s22 + $0x218] sm:$0xff] }
  0xff   : >> { %v1351_v50 = vadd.f32 %v1339_v43, %v1327_v61  ;;  %v1352_v34 = vadd.f32 %v1340_v60, %v1328_v0  ;;  %v523_v51 = vmul.f32 %v4456_v17, %v3715_v30  ;;  %v524_v7 = vmul.f32 %v4741_v59, %v3715_v30  ;;  %v4758_v60 = vld [vmem:[%s3638_s22 + $0x70] sm:$0x7]  ;;  %v3096_v0 = vld [vmem:[%s3638_s22 + $0x2e0] sm:$0x7] }
 0x100   : >> { %v459_v48 = vadd.f32 %v447_v25, %v421_v14  ;;  %v460_v36 = vadd.f32 %v448_v47, %v422_v3  ;;  %v561_v1 = vmul.f32 %v4472_v32, %v3718_v31  ;;  %v562_v43 = vmul.f32 %v4748_v54, %v3718_v31 }
 0x101   : >> { %v1375_v29 = vadd.f32 %v1363_v28, %v1351_v50  ;;  %v1376_v20 = vadd.f32 %v1364_v33, %v1352_v34  ;;  %v599_v18 = vmul.f32 %v4755_v40, %v3742_v44  ;;  %v600_v52 = vmul.f32 %v4758_v60, %v3742_v44  ;;  %v4778_v33 = vld [vmem:[%s3638_s22 + $0x220] sm:$0x7] }
 0x102   : >> { %v497_v55 = vadd.f32 %v485_v38, %v459_v48  ;;  %v498_v2 = vadd.f32 %v486_v24, %v460_v36  ;;  %v637_v39 = vmul.f32 %v4765_v53, %v3748_v46  ;;  %v638_v28 = vmul.f32 %v4768_v10, %v3748_v46 }
 0x103   : >> { %v1412_v27 = vadd.f32 %v1400_v42, %v1375_v29  ;;  %v1413_v25 = vadd.f32 %v1401_v57, %v1376_v20  ;;  %v675_v47 = vmul.f32 %v4775_v56, %v3770_v58  ;;  %v676_v61 = vmul.f32 %v4778_v33, %v3770_v58  ;;  %v6235_v29 = vld [vmem:[#allocation11_spill] sm:$0xff] }
 0x104   : >> { %v535_v14 = vadd.f32 %v523_v51, %v497_v55  ;;  %v536_v3 = vadd.f32 %v524_v7, %v498_v2  ;;  %v699_v38 = vmul.f32 %v4350_v19, %v3671_v6  ;;  %v700_v24 = vmul.f32 %v3000_v41, %v3671_v6 }
 0x105   : >> { %v1424_v50 = vmax.f32 %v1195_v37, %v1412_v27  ;;  %v1425_v34 = vmax.f32 %v1196_v23, %v1413_v25  ;;  %v711_v42 = vmul.f32 %v4358_v63, %v3681_v11  ;;  %v712_v57 = vmul.f32 %v3012_v21, %v3681_v11 }
 0x106   : >> { %v573_v48 = vadd.f32 %v561_v1, %v535_v14  ;;  %v574_v36 = vadd.f32 %v562_v43, %v536_v3  ;;  %v748_v20 = vmul.f32 %v6235_v29, %v3689_v16  ;;  %v749_v51 = vmul.f32 %v3096_v0, %v3689_v16 }
 0x107   : >> { %v1437_v7 = vadd.f32 %v3674_v8, %v1424_v50  ;;  %v1438_v19 = vadd.f32 %v3674_v8, %v1425_v34  ;;  %v723_v41 = vadd.f32 %v711_v42, %v699_v38  ;;  %v724_v37 = vadd.f32 %v712_v57, %v700_v24  ;;  %v6236_v24 = vld [vmem:[#allocation12_spill] sm:$0xff] }
 0x108   : >> { %v611_v23 = vadd.f32 %v599_v18, %v573_v48  ;;  %v612_v55 = vadd.f32 %v600_v52, %v574_v36  ;;  %v772_v63 = vmul.f32 %v4456_v17, %v3701_v22  ;;  %v773_v21 = vmul.f32 %v4741_v59, %v3701_v22  ;;  %v4805_v52 = vld [vmem:[%s3638_s22 + $0x640] sm:$0x7] }
 0x109   : >> { %v1449_v1 = vmax.f32 %v1437_v7, 0.0  ;;  %v1450_v43 = vmax.f32 %v1438_v19, 0.0  ;;  %v760_v2 = vadd.f32 %v748_v20, %v723_v41  ;;  %v761_v27 = vadd.f32 %v749_v51, %v724_v37  ;;  %v4824_v51 = vld [vmem:[%s3638_s22 + $0x2f0] sm:$0xff] }
 0x10a   : >> { %v649_v25 = vadd.f32 %v637_v39, %v611_v23  ;;  %v650_v0 = vadd.f32 %v638_v28, %v612_v55  ;;  %v796_v14 = vmul.f32 %v4472_v32, %v3715_v30  ;;  %v797_v18 = vmul.f32 %v4748_v54, %v3715_v30 }
 0x10b   : >> { %1461 = vst [vmem:[#allocation2 + $0x40] sm:$0x7] %v1449_v1  ;;  %v784_v3 = vadd.f32 %v772_v63, %v760_v2  ;;  %v785_v38 = vadd.f32 %v773_v21, %v761_v27  ;;  %v833_v50 = vmul.f32 %v6236_v24, %v3718_v31  ;;  %v834_v39 = vmul.f32 %v4805_v52, %v3718_v31 }
 0x10c   : >> { %v4811_v28 = vadd.f32 %v675_v47, %v649_v25  ;;  %v4813_v34 = vadd.f32 %v676_v61, %v650_v0  ;;  %v857_v42 = vmul.f32 %v4765_v53, %v3742_v44  ;;  %v858_v57 = vmul.f32 %v4768_v10, %v3742_v44  ;;  %v4827_v47 = vld [vmem:[%s3638_s22 + $0x2f8] sm:$0x7] }
 0x10d   : >> { %v808_v48 = vadd.f32 %v796_v14, %v784_v3  ;;  %v809_v36 = vadd.f32 %v797_v18, %v785_v38  ;;  %v881_v29 = vmul.f32 %v4775_v56, %v3748_v46  ;;  %v882_v20 = vmul.f32 %v4778_v33, %v3748_v46  ;;  %v3132_v14 = vld [vmem:[%s3638_s22 + $0x3d0] sm:$0x7] }
 0x10e   : >> { %v918_v61 = vmul.f32 %v4824_v51, %v3770_v58  ;;  %v919_v7 = vmul.f32 %v4827_v47, %v3770_v58  ;;  %v954_v19 = vmul.f32 %v4442_v5, %v3671_v6  ;;  %v955_v41 = vmul.f32 %v4734_v13, %v3671_v6 }
 0x10f   : >> { %v845_v37 = vadd.f32 %v833_v50, %v808_v48  ;;  %v846_v23 = vadd.f32 %v834_v39, %v809_v36  ;;  %v966_v55 = vmul.f32 %v4456_v17, %v3681_v11  ;;  %v967_v63 = vmul.f32 %v4741_v59, %v3681_v11  ;;  %v4859_v36 = vld [vmem:[%s3638_s22 + $0x3c8] sm:$0xff] }
 0x110   : >> { %v990_v21 = vmul.f32 %v4472_v32, %v3689_v16  ;;  %v991_v1 = vmul.f32 %v4748_v54, %v3689_v16  ;;  %v1014_v5 = vmul.f32 %v4755_v40, %v3701_v22  ;;  %v1015_v13 = vmul.f32 %v4758_v60, %v3701_v22 }
 0x111   : >> { %v869_v2 = vadd.f32 %v857_v42, %v845_v37  ;;  %v870_v27 = vadd.f32 %v858_v57, %v846_v23  ;;  %v978_v25 = vadd.f32 %v966_v55, %v954_v19  ;;  %v979_v0 = vadd.f32 %v967_v63, %v955_v41  ;;  %v4862_v19 = vld [vmem:[%s3638_s22 + $0x4a0] sm:$0xff]  ;;  %v3144_v41 = vld [vmem:[%s3638_s22 + $0x4a8] sm:$0x7] }
 0x112   : >> { %v2596_v18 = vld [vmem:[#allocation2 + $0x40] sm:$0xff]  ;;  %v1038_v3 = vmul.f32 %v4765_v53, %v3715_v30  ;;  %v1039_v38 = vmul.f32 %v4768_v10, %v3715_v30  ;;  %v1062_v50 = vmul.f32 %v4775_v56, %v3718_v31  ;;  %v1063_v60 = vmul.f32 %v4778_v33, %v3718_v31 }
 0x113   : >> { %v3387_v39 = vpack.c.bf16 %v1450_v43, %v2596_v18  ;;  %v893_v42 = vadd.f32 %v881_v29, %v869_v2  ;;  %v894_v57 = vadd.f32 %v882_v20, %v870_v27  ;;  %v1002_v48 = vadd.f32 %v990_v21, %v978_v25  ;;  %v4872_v21 = vld [vmem:[%s3638_s22 + $0x578] sm:$0xff] }
 0x114   : >> { %v1003_v37 = vadd.f32 %v991_v1, %v979_v0  ;;  %v1099_v23 = vmul.f32 %v4859_v36, %v3742_v44  ;;  %v1100_v55 = vmul.f32 %v3132_v14, %v3742_v44  ;;  %v1136_v63 = vmul.f32 %v4862_v19, %v3748_v46 }
 0x115   : >> { %3388 = vmatpush1.bf16.msra.mxu0 %v3387_v39  ;;  %3426 = vmatpush1.bf16.msra.mxu1 %v3387_v39  ;;  %v930_v43 = vadd.f32 %v918_v61, %v893_v42  ;;  %v931_v29 = vadd.f32 %v919_v7, %v894_v57  ;;  %v1026_v20 = vadd.f32 %v1014_v5, %v1002_v48 }
 0x116   : >> { %3389 = vmatprep.subr.bf16.mxu0 %v6227_v49  ;;  %3415 = vmatprep.subr.bf16.mxu1 %v6227_v49  ;;  %v1027_v1 = vadd.f32 %v1015_v13, %v1003_v37  ;;  %v1137_v2 = vmul.f32 %v3144_v41, %v3748_v46  ;;  %v1173_v27 = vmul.f32 %v4872_v21, %v3770_v58  ;;  %v3168_v37 = vld [vmem:[%s3638_s22 + $0x658] sm:$0x7] }
 0x117   : >> { %v942_v25 = vmax.f32 %v4811_v28, %v930_v43  ;;  %v943_v0 = vmax.f32 %v4813_v34, %v931_v29  ;;  %v1050_v14 = vadd.f32 %v1038_v3, %v1026_v20  ;;  %v1174_v61 = vmul.f32 %v3156_v26, %v3770_v58 }
 0x118   : >> { %v1051_v7 = vadd.f32 %v1039_v38, %v1027_v1  ;;  %v1209_v5 = vmul.f32 %v4456_v17, %v3671_v6  ;;  %v1210_v18 = vmul.f32 %v4741_v59, %v3671_v6  ;;  %v1221_v13 = vmul.f32 %v4472_v32, %v3681_v11 }
 0x119   : >> { %v1074_v39 = vadd.f32 %v1062_v50, %v1050_v14  ;;  %v1222_v28 = vmul.f32 %v4748_v54, %v3681_v11  ;;  %v1245_v34 = vmul.f32 %v6236_v24, %v3689_v16  ;;  %v1246_v3 = vmul.f32 %v4805_v52, %v3689_v16  ;;  %v4914_v14 = vld [vmem:[%s3638_s22 + $0x650] sm:$0xff] }
 0x11a   : >> { %v1075_v38 = vadd.f32 %v1063_v60, %v1051_v7  ;;  %v1233_v42 = vadd.f32 %v1221_v13, %v1209_v5  ;;  %v1269_v17 = vmul.f32 %v4765_v53, %v3701_v22  ;;  %v1270_v59 = vmul.f32 %v4768_v10, %v3701_v22 }
 0x11b   : >> { %v1111_v32 = vadd.f32 %v1099_v23, %v1074_v39  ;;  %v1234_v50 = vadd.f32 %v1222_v28, %v1210_v18  ;;  %v1293_v54 = vmul.f32 %v4775_v56, %v3715_v30  ;;  %v1294_v24 = vmul.f32 %v4778_v33, %v3715_v30 }
 0x11c   : >> { %v1112_v57 = vadd.f32 %v1100_v55, %v1075_v38  ;;  %v1257_v48 = vadd.f32 %v1245_v34, %v1233_v42  ;;  %v1317_v52 = vmul.f32 %v4824_v51, %v3718_v31  ;;  %v1318_v60 = vmul.f32 %v4827_v47, %v3718_v31 }
 0x11d   : >> { %v1148_v43 = vadd.f32 %v1136_v63, %v1111_v32  ;;  %v1258_v10 = vadd.f32 %v1246_v3, %v1234_v50  ;;  %v1341_v23 = vmul.f32 %v4862_v19, %v3742_v44  ;;  %v1342_v29 = vmul.f32 %v3144_v41, %v3742_v44 }
 0x11e   : >> { %v1149_v20 = vadd.f32 %v1137_v2, %v1112_v57  ;;  %v1281_v1 = vadd.f32 %v1269_v17, %v1257_v48  ;;  %v1365_v33 = vmul.f32 %v4872_v21, %v3748_v46  ;;  %v1366_v55 = vmul.f32 %v3156_v26, %v3748_v46  ;;  %v4942_v48 = vld [vmem:[%s3638_s22 + $0x78] sm:$0xff] }
 0x11f   : >> { %v1185_v7 = vadd.f32 %v1173_v27, %v1148_v43  ;;  %v1282_v5 = vadd.f32 %v1270_v59, %v1258_v10  ;;  %v1402_v47 = vmul.f32 %v4914_v14, %v3770_v58  ;;  %v1403_v63 = vmul.f32 %v3168_v37, %v3770_v58 }
 0x120   : >> { %v1186_v18 = vadd.f32 %v1174_v61, %v1149_v20  ;;  %v1305_v13 = vadd.f32 %v1293_v54, %v1281_v1  ;;  %v1478_v41 = vmul.f32 %v4557_v15, %v3671_v6  ;;  %v1479_v2 = vmul.f32 %v4755_v40, %v3671_v6 }
 0x121   : >> { %v1197_v39 = vmax.f32 %v942_v25, %v1185_v7  ;;  %v1306_v28 = vadd.f32 %v1294_v24, %v1282_v5  ;;  %v1503_v26 = vmul.f32 %v4567_v62, %v3681_v11  ;;  %v1504_v27 = vmul.f32 %v4765_v53, %v3681_v11  ;;  %v4957_v7 = vld [vmem:[%s3638_s22 + $0x158] sm:$0xff] }
 0x122   : >> { %v1198_v34 = vmax.f32 %v943_v0, %v1186_v18  ;;  %v1329_v3 = vadd.f32 %v1317_v52, %v1305_v13  ;;  %v1540_v61 = vmul.f32 %v4577_v12, %v3689_v16  ;;  %v1541_v15 = vmul.f32 %v4775_v56, %v3689_v16  ;;  %v4945_v52 = vld [vmem:[%s3638_s22 + $0x80] sm:$0xff]  ;;  %v4965_v18 = vld [vmem:[%s3638_s22 + $0x230] sm:$0xff] }
 0x123   : >> { %v1330_v38 = vadd.f32 %v1318_v60, %v1306_v28  ;;  %v1515_v40 = vadd.f32 %v1503_v26, %v1478_v41  ;;  %v1516_v25 = vadd.f32 %v1504_v27, %v1479_v2  ;;  %v1577_v42 = vmul.f32 %v4664_v4, %v3701_v22 }
 0x124   : >> { %v1353_v17 = vadd.f32 %v1341_v23, %v1329_v3  ;;  %v1578_v0 = vmul.f32 %v4859_v36, %v3701_v22  ;;  %v1614_v59 = vmul.f32 %v4668_v45, %v3715_v30  ;;  %v1615_v32 = vmul.f32 %v4862_v19, %v3715_v30  ;;  %v4954_v23 = vld [vmem:[%s3638_s22 + $0x150] sm:$0xff] }
 0x125   : >> { %v1354_v50 = vadd.f32 %v1342_v29, %v1330_v38  ;;  %v1552_v54 = vadd.f32 %v1540_v61, %v1515_v40  ;;  %v1553_v24 = vadd.f32 %v1541_v15, %v1516_v25  ;;  %v1651_v57 = vmul.f32 %v4678_v9, %v3718_v31 }
 0x126   : >> { %v1377_v60 = vadd.f32 %v1365_v33, %v1353_v17  ;;  %v1652_v37 = vmul.f32 %v4872_v21, %v3718_v31  ;;  %v1688_v43 = vmul.f32 %v4942_v48, %v3742_v44  ;;  %v1689_v10 = vmul.f32 %v4945_v52, %v3742_v44  ;;  %v4962_v33 = vld [vmem:[%s3638_s22 + $0x228] sm:$0xff] }
 0x127   : >> { %v1378_v29 = vadd.f32 %v1366_v55, %v1354_v50  ;;  %v1589_v20 = vadd.f32 %v1577_v42, %v1552_v54  ;;  %v1590_v1 = vadd.f32 %v1578_v0, %v1553_v24  ;;  %v1725_v5 = vmul.f32 %v4954_v23, %v3748_v46 }
 0x128   : >> { %v1414_v13 = vadd.f32 %v1402_v47, %v1377_v60  ;;  %v1726_v41 = vmul.f32 %v4957_v7, %v3748_v46  ;;  %v1762_v2 = vmul.f32 %v4962_v33, %v3770_v58  ;;  %v1763_v55 = vmul.f32 %v4965_v18, %v3770_v58 }
 0x129   : >> { %v1415_v28 = vadd.f32 %v1403_v63, %v1378_v29  ;;  %v1626_v26 = vadd.f32 %v1614_v59, %v1589_v20  ;;  %v1627_v27 = vadd.f32 %v1615_v32, %v1590_v1  ;;  %v1786_v3 = vmul.f32 %v4567_v62, %v3671_v6 }
 0x12a   : >> { %v1426_v61 = vmax.f32 %v1197_v39, %v1414_v13  ;;  %v1787_v15 = vmul.f32 %v4765_v53, %v3671_v6  ;;  %v1798_v47 = vmul.f32 %v4577_v12, %v3681_v11  ;;  %v1799_v38 = vmul.f32 %v4775_v56, %v3681_v11 }
 0x12b   : >> { %v1427_v40 = vmax.f32 %v1198_v34, %v1415_v28  ;;  %v1663_v25 = vadd.f32 %v1651_v57, %v1626_v26  ;;  %v1664_v42 = vadd.f32 %v1652_v37, %v1627_v27  ;;  %v1835_v63 = vmul.f32 %v4628_v35, %v3689_v16 }
 0x12c   : >> { %v1439_v17 = vadd.f32 %v3674_v8, %v1426_v61  ;;  %v1810_v0 = vadd.f32 %v1798_v47, %v1786_v3  ;;  %v1811_v62 = vadd.f32 %v1799_v38, %v1787_v15  ;;  %v1836_v39 = vmul.f32 %v4824_v51, %v3689_v16  ;;  %v5010_v3 = vld [vmem:[%s3638_s22 + $0x300] sm:$0xff] }
 0x12d   : >> { %v1440_v53 = vadd.f32 %v3674_v8, %v1427_v40  ;;  %v1700_v59 = vadd.f32 %v1688_v43, %v1663_v25  ;;  %v1701_v12 = vadd.f32 %v1689_v10, %v1664_v42  ;;  %v1859_v56 = vmul.f32 %v4668_v45, %v3701_v22  ;;  %v6237_v10 = vld [vmem:[#allocation13_spill] sm:$0xff] }
 0x12e   : >> { %v1451_v34 = vmax.f32 %v1439_v17, 0.0  ;;  %v1847_v32 = vadd.f32 %v1835_v63, %v1810_v0  ;;  %v1848_v50 = vadd.f32 %v1836_v39, %v1811_v62  ;;  %v1860_v35 = vmul.f32 %v4862_v19, %v3701_v22 }
 0x12f   : >> { %v1452_v54 = vmax.f32 %v1440_v53, 0.0  ;;  %v1737_v24 = vadd.f32 %v1725_v5, %v1700_v59  ;;  %v1738_v57 = vadd.f32 %v1726_v41, %v1701_v12  ;;  %v1883_v51 = vmul.f32 %v4678_v9, %v3715_v30 }
 0x130   : >> { %v1871_v60 = vadd.f32 %v1859_v56, %v1847_v32  ;;  %v1872_v37 = vadd.f32 %v1860_v35, %v1848_v50  ;;  %v1884_v43 = vmul.f32 %v4872_v21, %v3715_v30  ;;  %v1920_v29 = vmul.f32 %v6237_v10, %v3718_v31 }
 0x131   : >> { %1464 = vst [vmem:[#allocation2 + $0x58] sm:$0x7] %v1452_v54  ;;  %v4997_v20 = vadd.f32 %v1762_v2, %v1737_v24  ;;  %v4999_v1 = vadd.f32 %v1763_v55, %v1738_v57  ;;  %v1921_v5 = vmul.f32 %v4914_v14, %v3718_v31  ;;  %v1944_v13 = vmul.f32 %v4954_v23, %v3742_v44  ;;  %v5013_v2 = vld [vmem:[%s3638_s22 + $0x308] sm:$0xff] }
 0x132   : >> { %v1895_v41 = vadd.f32 %v1883_v51, %v1871_v60  ;;  %v1896_v28 = vadd.f32 %v1884_v43, %v1872_v37  ;;  %v1945_v26 = vmul.f32 %v4957_v7, %v3742_v44  ;;  %v1968_v27 = vmul.f32 %v4962_v33, %v3748_v46  ;;  %6238 = vst [vmem:[#allocation11_spill] sm:$0xff] %v5013_v2  ;;  %v5046_v51 = vld [vmem:[%s3638_s22 + $0x3d8] sm:$0xff]  ;;  %v5049_v60 = vld [vmem:[%s3638_s22 + $0x3e0] sm:$0xff] }
 0x133   : >> { %v1969_v55 = vmul.f32 %v4965_v18, %v3748_v46  ;;  %v2005_v61 = vmul.f32 %v5010_v3, %v3770_v58  ;;  %v2006_v15 = vmul.f32 %v5013_v2, %v3770_v58  ;;  %v2041_v47 = vmul.f32 %v4664_v4, %v3671_v6  ;;  %6239 = vst [vmem:[#allocation12_spill] sm:$0xff] %v5049_v60 }
 0x134   : >> { %v1932_v38 = vadd.f32 %v1920_v29, %v1895_v41  ;;  %v1933_v40 = vadd.f32 %v1921_v5, %v1896_v28  ;;  %v2042_v25 = vmul.f32 %v4859_v36, %v3671_v6  ;;  %v2053_v42 = vmul.f32 %v4668_v45, %v3681_v11 }
 0x135   : >> { %v2054_v63 = vmul.f32 %v4862_v19, %v3681_v11  ;;  %v2077_v17 = vmul.f32 %v4678_v9, %v3689_v16  ;;  %v2078_v0 = vmul.f32 %v4872_v21, %v3689_v16  ;;  %v2101_v4 = vmul.f32 %v4942_v48, %v3701_v22 }
 0x136   : >> { %v1956_v62 = vadd.f32 %v1944_v13, %v1932_v38  ;;  %v1957_v39 = vadd.f32 %v1945_v26, %v1933_v40  ;;  %v2065_v36 = vadd.f32 %v2053_v42, %v2041_v47  ;;  %v2102_v53 = vmul.f32 %v4945_v52, %v3701_v22  ;;  %v5056_v13 = vld [vmem:[%s3638_s22 + $0x4b0] sm:$0xff]  ;;  %v5064_v47 = vld [vmem:[%s3638_s22 + $0x588] sm:$0xff] }
 0x137   : >> { %v2066_v59 = vadd.f32 %v2054_v63, %v2042_v25  ;;  %v2125_v12 = vmul.f32 %v4954_v23, %v3715_v30  ;;  %v2126_v56 = vmul.f32 %v4957_v7, %v3715_v30  ;;  %v2149_v32 = vmul.f32 %v4962_v33, %v3718_v31  ;;  %v5075_v42 = vld [vmem:[%s3638_s22 + $0x590] sm:$0xff] }
 0x138   : >> { %v2599_v50 = vld [vmem:[#allocation2 + $0x58] sm:$0xff]  ;;  %v1980_v35 = vadd.f32 %v1968_v27, %v1956_v62  ;;  %v1981_v54 = vadd.f32 %v1969_v55, %v1957_v39  ;;  %v2089_v24 = vadd.f32 %v2077_v17, %v2065_v36  ;;  %v2150_v57 = vmul.f32 %v4965_v18, %v3718_v31  ;;  %6241 = vst [vmem:[#allocation14_spill] sm:$0xff] %v5075_v42 }
 0x139   : >> { %v3390_v37 = vpack.c.bf16 %v2599_v50, %v1451_v34  ;;  %v2090_v43 = vadd.f32 %v2078_v0, %v2066_v59  ;;  %v2186_v29 = vmul.f32 %v5046_v51, %v3742_v44  ;;  %v2187_v5 = vmul.f32 %v5049_v60, %v3742_v44  ;;  %v5059_v27 = vld [vmem:[%s3638_s22 + $0x4b8] sm:$0xff] }
 0x13a   : >> { %v2017_v41 = vadd.f32 %v2005_v61, %v1980_v35  ;;  %v2018_v28 = vadd.f32 %v2006_v15, %v1981_v54  ;;  %v2113_v26 = vadd.f32 %v2101_v4, %v2089_v24  ;;  %6240 = vst [vmem:[#allocation13_spill] sm:$0xff] %v5059_v27  ;;  %v2223_v55 = vmul.f32 %v5056_v13, %v3748_v46 }
 0x13b   : >> { %3391 = vmatpush1.bf16.msra.mxu0 %v3390_v37  ;;  %3427 = vmatpush1.bf16.msra.mxu1 %v3390_v37  ;;  %v2114_v34 = vadd.f32 %v2102_v53, %v2090_v43  ;;  %v2224_v38 = vmul.f32 %v5059_v27, %v3748_v46  ;;  %v2260_v40 = vmul.f32 %v5064_v47, %v3770_v58 }
 0x13c   : >> { %3392 = vmatprep.subr.bf16.mxu0 %v6227_v49  ;;  %3416 = vmatprep.subr.bf16.mxu1 %v6227_v49  ;;  %v2029_v61 = vmax.f32 %v4997_v20, %v2017_v41  ;;  %v2030_v15 = vmax.f32 %v4999_v1, %v2018_v28  ;;  %v2137_v25 = vadd.f32 %v2125_v12, %v2113_v26  ;;  %v5113_v41 = vld [vmem:[%s3638_s22 + $0x660] sm:$0xff]  ;;  %v3183_v28 = vld [vmem:[%s3638_s22 + $0x148] sm:$0x7] }
 0x13d   : >> { %v2138_v63 = vadd.f32 %v2126_v56, %v2114_v34  ;;  %v2261_v17 = vmul.f32 %v5075_v42, %v3770_v58  ;;  %v2296_v0 = vmul.f32 %v4668_v45, %v3671_v6  ;;  %v2297_v4 = vmul.f32 %v4862_v19, %v3671_v6 }
 0x13e   : >> { %v2161_v62 = vadd.f32 %v2149_v32, %v2137_v25  ;;  %v2308_v39 = vmul.f32 %v4678_v9, %v3681_v11  ;;  %v2309_v20 = vmul.f32 %v4872_v21, %v3681_v11  ;;  %v2332_v1 = vmul.f32 %v6237_v10, %v3689_v16  ;;  %v5117_v25 = vld [vmem:[%s3638_s22 + $0x668] sm:$0xff] }
 0x13f   : >> { %v2162_v36 = vadd.f32 %v2150_v57, %v2138_v63  ;;  %v2333_v53 = vmul.f32 %v4914_v14, %v3689_v16  ;;  %v2356_v45 = vmul.f32 %v4954_v23, %v3701_v22  ;;  %v2357_v19 = vmul.f32 %v4957_v7, %v3701_v22  ;;  %v3171_v57 = vld [vmem:[%s3638_s22 + $0x70] sm:$0x7]  ;;  %6242 = vst [vmem:[#allocation15_spill] sm:$0xff] %v5117_v25 }
 0x140   : >> { %v2198_v59 = vadd.f32 %v2186_v29, %v2161_v62  ;;  %v2320_v12 = vadd.f32 %v2308_v39, %v2296_v0  ;;  %v2321_v9 = vadd.f32 %v2309_v20, %v2297_v4  ;;  %v2380_v21 = vmul.f32 %v4962_v33, %v3715_v30 }
 0x141   : >> { %v2199_v10 = vadd.f32 %v2187_v5, %v2162_v36  ;;  %v2381_v56 = vmul.f32 %v4965_v18, %v3715_v30  ;;  %v2404_v14 = vmul.f32 %v5010_v3, %v3718_v31  ;;  %v2405_v32 = vmul.f32 %v5013_v2, %v3718_v31  ;;  %v3195_v36 = vld [vmem:[%s3638_s22 + $0x220] sm:$0x7] }
 0x142   : >> { %v2235_v50 = vadd.f32 %v2223_v55, %v2198_v59  ;;  %v2344_v35 = vadd.f32 %v2332_v1, %v2320_v12  ;;  %v2345_v54 = vadd.f32 %v2333_v53, %v2321_v9  ;;  %v2428_v24 = vmul.f32 %v5056_v13, %v3742_v44  ;;  %v5134_v59 = vld [vmem:[%s3638_s22 + $0x3d0] sm:$0x7] }
 0x143   : >> { %v2236_v37 = vadd.f32 %v2224_v38, %v2199_v10  ;;  %v2429_v43 = vmul.f32 %v5059_v27, %v3742_v44  ;;  %v2452_v29 = vmul.f32 %v5064_v47, %v3748_v46  ;;  %v2453_v5 = vmul.f32 %v5075_v42, %v3748_v46 }
 0x144   : >> { %v2272_v26 = vadd.f32 %v2260_v40, %v2235_v50  ;;  %v2368_v55 = vadd.f32 %v2356_v45, %v2344_v35  ;;  %v2369_v34 = vadd.f32 %v2357_v19, %v2345_v54  ;;  %v2489_v38 = vmul.f32 %v5113_v41, %v3770_v58 }
 0x145   : >> { %v2273_v63 = vadd.f32 %v2261_v17, %v2236_v37  ;;  %v2490_v0 = vmul.f32 %v5117_v25, %v3770_v58  ;;  %v1480_v4 = vmul.f32 %v3171_v57, %v3671_v6  ;;  %v1481_v62 = vmul.f32 %v4942_v48, %v3671_v6  ;;  %v5153_v37 = vld [vmem:[%s3638_s22 + $0x88] sm:$0x7] }
 0x146   : >> { %v2284_v39 = vmax.f32 %v2029_v61, %v2272_v26  ;;  %v2392_v40 = vadd.f32 %v2380_v21, %v2368_v55  ;;  %v2393_v20 = vadd.f32 %v2381_v56, %v2369_v34  ;;  %v1505_v1 = vmul.f32 %v3183_v28, %v3681_v11  ;;  %v5139_v21 = vld [vmem:[%s3638_s22 + $0x4a8] sm:$0x7]  ;;  %v5156_v26 = vld [vmem:[%s3638_s22 + $0x90] sm:$0xff] }
 0x147   : >> { %v2285_v53 = vmax.f32 %v2030_v15, %v2273_v63  ;;  %v1506_v17 = vmul.f32 %v4954_v23, %v3681_v11  ;;  %v1542_v45 = vmul.f32 %v3195_v36, %v3689_v16  ;;  %v1543_v19 = vmul.f32 %v4962_v33, %v3689_v16 }
 0x148   : >> { %v2416_v48 = vadd.f32 %v2404_v14, %v2392_v40  ;;  %v2417_v61 = vadd.f32 %v2405_v32, %v2393_v20  ;;  %v1517_v12 = vadd.f32 %v1505_v1, %v1480_v4  ;;  %v1579_v9 = vmul.f32 %v5134_v59, %v3701_v22  ;;  %v5148_v14 = vld [vmem:[%s3638_s22 + $0x580] sm:$0x7]  ;;  %v5168_v20 = vld [vmem:[%s3638_s22 + $0x168] sm:$0xff] }
 0x149   : >> { %v1518_v15 = vadd.f32 %v1506_v17, %v1481_v62  ;;  %v1580_v10 = vmul.f32 %v5046_v51, %v3701_v22  ;;  %v1616_v56 = vmul.f32 %v5139_v21, %v3715_v30  ;;  %v1617_v50 = vmul.f32 %v5056_v13, %v3715_v30  ;;  %v5173_v17 = vld [vmem:[%s3638_s22 + $0x238] sm:$0x7] }
 0x14a   : >> { %v2440_v32 = vadd.f32 %v2428_v24, %v2416_v48  ;;  %v2441_v35 = vadd.f32 %v2429_v43, %v2417_v61  ;;  %v1554_v54 = vadd.f32 %v1542_v45, %v1517_v12  ;;  %v1653_v57 = vmul.f32 %v5148_v14, %v3718_v31  ;;  %v5165_v43 = vld [vmem:[%s3638_s22 + $0x160] sm:$0x7] }
 0x14b   : >> { %v1555_v55 = vadd.f32 %v1543_v19, %v1518_v15  ;;  %v1654_v34 = vmul.f32 %v5064_v47, %v3718_v31  ;;  %v1690_v63 = vmul.f32 %v5153_v37, %v3742_v44  ;;  %v1691_v24 = vmul.f32 %v5156_v26, %v3742_v44  ;;  %v5176_v45 = vld [vmem:[%s3638_s22 + $0x240] sm:$0xff] }
 0x14c   : >> { %v2464_v4 = vadd.f32 %v2452_v29, %v2440_v32  ;;  %v2465_v62 = vadd.f32 %v2453_v5, %v2441_v35  ;;  %v1591_v40 = vadd.f32 %v1579_v9, %v1554_v54  ;;  %v1727_v1 = vmul.f32 %v5165_v43, %v3748_v46  ;;  %v3279_v5 = vld [vmem:[%s3638_s22 + $0x2f8] sm:$0x7] }
 0x14d   : >> { %v1592_v19 = vadd.f32 %v1580_v10, %v1555_v55  ;;  %v1728_v48 = vmul.f32 %v5168_v20, %v3748_v46  ;;  %v1764_v61 = vmul.f32 %v5173_v17, %v3770_v58  ;;  %v1765_v29 = vmul.f32 %v5176_v45, %v3770_v58 }
 0x14e   : >> { %v2501_v12 = vadd.f32 %v2489_v38, %v2464_v4  ;;  %v2502_v9 = vadd.f32 %v2490_v0, %v2465_v62  ;;  %v1628_v15 = vadd.f32 %v1616_v56, %v1591_v40  ;;  %v1788_v32 = vmul.f32 %v3183_v28, %v3671_v6 }
 0x14f   : >> { %v1629_v35 = vadd.f32 %v1617_v50, %v1592_v19  ;;  %v1789_v54 = vmul.f32 %v4954_v23, %v3671_v6  ;;  %v1800_v10 = vmul.f32 %v3195_v36, %v3681_v11  ;;  %v1801_v55 = vmul.f32 %v4962_v33, %v3681_v11 }
 0x150   : >> { %v2513_v25 = vmax.f32 %v2284_v39, %v2501_v12  ;;  %v2514_v2 = vmax.f32 %v2285_v53, %v2502_v9  ;;  %v1665_v42 = vadd.f32 %v1653_v57, %v1628_v15  ;;  %v1837_v27 = vmul.f32 %v3279_v5, %v3689_v16 }
 0x151   : >> { %v1666_v60 = vadd.f32 %v1654_v34, %v1629_v35  ;;  %v1812_v38 = vadd.f32 %v1800_v10, %v1788_v32  ;;  %v1813_v0 = vadd.f32 %v1801_v55, %v1789_v54  ;;  %v1838_v28 = vmul.f32 %v5010_v3, %v3689_v16  ;;  %v5224_v32 = vld [vmem:[%s3638_s22 + $0x310] sm:$0x7]  ;;  %v5229_v54 = vld [vmem:[%s3638_s22 + $0x318] sm:$0xff] }
 0x152   : >> { %v2525_v56 = vadd.f32 %v2513_v25, %v3674_v8  ;;  %v2526_v23 = vadd.f32 %v2514_v2, %v3674_v8  ;;  %v1702_v36 = vadd.f32 %v1690_v63, %v1665_v42  ;;  %v1861_v33 = vmul.f32 %v5139_v21, %v3701_v22  ;;  %v5205_v42 = vld [vmem:[%s3638_s22 + $0x658] sm:$0x7] }
 0x153   : >> { %v1703_v39 = vadd.f32 %v1691_v24, %v1666_v60  ;;  %v1849_v53 = vadd.f32 %v1837_v27, %v1812_v38  ;;  %v1850_v50 = vadd.f32 %v1838_v28, %v1813_v0  ;;  %v1862_v57 = vmul.f32 %v5056_v13, %v3701_v22 }
 0x154   : >> { %v2537_v34 = vmax.f32 %v2525_v56, 0.0  ;;  %v2538_v4 = vmax.f32 %v2526_v23, 0.0  ;;  %v1739_v62 = vadd.f32 %v1727_v1, %v1702_v36  ;;  %v1885_v3 = vmul.f32 %v5148_v14, %v3715_v30 }
 0x155   : >> { %v1740_v25 = vadd.f32 %v1728_v48, %v1703_v39  ;;  %v1873_v40 = vadd.f32 %v1861_v33, %v1849_v53  ;;  %v1874_v19 = vadd.f32 %v1862_v57, %v1850_v50  ;;  %v1886_v2 = vmul.f32 %v5064_v47, %v3715_v30  ;;  %v3315_v50 = vld [vmem:[%s3638_s22 + $0x3e8] sm:$0x7] }
 0x156   : >> { %v3393_v60 = vpack.c.bf16 %v2538_v4, %v2537_v34  ;;  %v5207_v27 = vadd.f32 %v1764_v61, %v1739_v62  ;;  %v1922_v63 = vmul.f32 %v5205_v42, %v3718_v31  ;;  %v1923_v24 = vmul.f32 %v5113_v41, %v3718_v31 }
 0x157   : >> { %v5213_v1 = vadd.f32 %v1765_v29, %v1740_v25  ;;  %v1897_v48 = vadd.f32 %v1885_v3, %v1873_v40  ;;  %v1898_v5 = vadd.f32 %v1886_v2, %v1874_v19  ;;  %v1946_v12 = vmul.f32 %v5165_v43, %v3742_v44  ;;  %v3327_v3 = vld [vmem:[%s3638_s22 + $0x4c0] sm:$0x7]  ;;  %v3339_v2 = vld [vmem:[%s3638_s22 + $0x598] sm:$0x7] }
 0x158   : >> { %3394 = vmatpush1.bf16.msra.mxu0 %v3393_v60  ;;  %3428 = vmatpush1.bf16.msra.mxu1 %v3393_v60  ;;  %v1947_v61 = vmul.f32 %v5168_v20, %v3742_v44  ;;  %v1970_v9 = vmul.f32 %v5173_v17, %v3748_v46  ;;  %v1971_v15 = vmul.f32 %v5176_v45, %v3748_v46 }
 0x159   : >> { %3395 = vmatprep.subr.bf16.mxu0 %v6227_v49  ;;  %3417 = vmatprep.subr.bf16.mxu1 %v6227_v49  ;;  %v1934_v29 = vadd.f32 %v1922_v63, %v1897_v48  ;;  %v1935_v35 = vadd.f32 %v1923_v24, %v1898_v5  ;;  %v2007_v10 = vmul.f32 %v5224_v32, %v3770_v58  ;;  %v5265_v48 = vld [vmem:[%s3638_s22 + $0x3f0] sm:$0xff] }
 0x15a   : >> { %v2008_v55 = vmul.f32 %v5229_v54, %v3770_v58  ;;  %v2043_v38 = vmul.f32 %v5134_v59, %v3671_v6  ;;  %v2044_v0 = vmul.f32 %v5046_v51, %v3671_v6  ;;  %v2055_v28 = vmul.f32 %v5139_v21, %v3681_v11 }
 0x15b   : >> { %v1958_v56 = vadd.f32 %v1946_v12, %v1934_v29  ;;  %v1959_v23 = vadd.f32 %v1947_v61, %v1935_v35  ;;  %v2056_v36 = vmul.f32 %v5056_v13, %v3681_v11  ;;  %v2079_v33 = vmul.f32 %v5148_v14, %v3689_v16  ;;  %v5269_v12 = vld [vmem:[%s3638_s22 + $0x4c8] sm:$0xff] }
 0x15c   : >> { %v2067_v39 = vadd.f32 %v2055_v28, %v2043_v38  ;;  %v2080_v59 = vmul.f32 %v5064_v47, %v3689_v16  ;;  %v2103_v53 = vmul.f32 %v5153_v37, %v3701_v22  ;;  %v2104_v51 = vmul.f32 %v5156_v26, %v3701_v22  ;;  %v5280_v38 = vld [vmem:[%s3638_s22 + $0x5a0] sm:$0xff] }
 0x15d   : >> { %v1982_v57 = vadd.f32 %v1970_v9, %v1958_v56  ;;  %v1983_v34 = vadd.f32 %v1971_v15, %v1959_v23  ;;  %v2068_v4 = vadd.f32 %v2056_v36, %v2044_v0  ;;  %v2127_v62 = vmul.f32 %v5165_v43, %v3715_v30 }
 0x15e   : >> { %v2091_v25 = vadd.f32 %v2079_v33, %v2067_v39  ;;  %v2128_v40 = vmul.f32 %v5168_v20, %v3715_v30  ;;  %v2151_v37 = vmul.f32 %v5173_v17, %v3718_v31  ;;  %v2152_v19 = vmul.f32 %v5176_v45, %v3718_v31 }
 0x15f   : >> { %v2019_v60 = vadd.f32 %v2007_v10, %v1982_v57  ;;  %v5262_v63 = vadd.f32 %v2008_v55, %v1983_v34  ;;  %v2092_v24 = vadd.f32 %v2080_v59, %v2068_v4  ;;  %v2188_v5 = vmul.f32 %v3315_v50, %v3742_v44  ;;  %v3351_v34 = vld [vmem:[%s3638_s22 + $0x670] sm:$0x7] }
 0x160   : >> { %v2115_v61 = vadd.f32 %v2103_v53, %v2091_v25  ;;  %v2189_v9 = vmul.f32 %v5265_v48, %v3742_v44  ;;  %v2225_v15 = vmul.f32 %v3327_v3, %v3748_v46  ;;  %v2226_v29 = vmul.f32 %v5269_v12, %v3748_v46 }
 0x161   : >> { %v2031_v35 = vmax.f32 %v5207_v27, %v2019_v60  ;;  %v2032_v10 = vmax.f32 %v5213_v1, %v5262_v63  ;;  %v2116_v55 = vadd.f32 %v2104_v51, %v2092_v24  ;;  %v2262_v0 = vmul.f32 %v3339_v2, %v3770_v58 }
 0x162   : >> { %v2139_v28 = vadd.f32 %v2127_v62, %v2115_v61  ;;  %v2263_v56 = vmul.f32 %v5280_v38, %v3770_v58  ;;  %v2298_v23 = vmul.f32 %v5139_v21, %v3671_v6  ;;  %v2299_v36 = vmul.f32 %v5056_v13, %v3671_v6  ;;  %v5318_v61 = vld [vmem:[%s3638_s22 + $0x678] sm:$0xff] }
 0x163   : >> { %v2140_v33 = vadd.f32 %v2128_v40, %v2116_v55  ;;  %v2310_v27 = vmul.f32 %v5148_v14, %v3681_v11  ;;  %v2311_v1 = vmul.f32 %v5064_v47, %v3681_v11  ;;  %v2334_v39 = vmul.f32 %v5205_v42, %v3689_v16  ;;  %v3186_v55 = vld [vmem:[%s3638_s22 + $0x160] sm:$0x7] }
 0x164   : >> { %v2163_v59 = vadd.f32 %v2151_v37, %v2139_v28  ;;  %v2335_v53 = vmul.f32 %v5113_v41, %v3689_v16  ;;  %v2358_v21 = vmul.f32 %v5165_v43, %v3701_v22  ;;  %v2359_v13 = vmul.f32 %v5168_v20, %v3701_v22  ;;  %v3174_v37 = vld [vmem:[%s3638_s22 + $0x88] sm:$0x7] }
 0x165   : >> { %v2164_v51 = vadd.f32 %v2152_v19, %v2140_v33  ;;  %v2322_v50 = vadd.f32 %v2310_v27, %v2298_v23  ;;  %v2323_v14 = vadd.f32 %v2311_v1, %v2299_v36  ;;  %v2382_v47 = vmul.f32 %v5173_v17, %v3715_v30  ;;  %v3198_v27 = vld [vmem:[%s3638_s22 + $0x238] sm:$0x7] }
 0x166   : >> { %v2200_v57 = vadd.f32 %v2188_v5, %v2163_v59  ;;  %v2383_v42 = vmul.f32 %v5176_v45, %v3715_v30  ;;  %v2406_v41 = vmul.f32 %v5224_v32, %v3718_v31  ;;  %v2407_v43 = vmul.f32 %v5229_v54, %v3718_v31 }
 0x167   : >> { %v2201_v4 = vadd.f32 %v2189_v9, %v2164_v51  ;;  %v2346_v62 = vadd.f32 %v2334_v39, %v2322_v50  ;;  %v2347_v25 = vadd.f32 %v2335_v53, %v2323_v14  ;;  %v2430_v40 = vmul.f32 %v3327_v3, %v3742_v44  ;;  %v6243_v50 = vld [vmem:[#allocation12_spill] sm:$0xff] }
 0x168   : >> { %v2237_v17 = vadd.f32 %v2225_v15, %v2200_v57  ;;  %v2431_v19 = vmul.f32 %v5269_v12, %v3742_v44  ;;  %v2454_v60 = vmul.f32 %v3339_v2, %v3748_v46  ;;  %v2455_v32 = vmul.f32 %v5280_v38, %v3748_v46  ;;  %v6244_v57 = vld [vmem:[#allocation13_spill] sm:$0xff] }
 0x169   : >> { %v2238_v63 = vadd.f32 %v2226_v29, %v2201_v4  ;;  %v2370_v24 = vadd.f32 %v2358_v21, %v2346_v62  ;;  %v2371_v5 = vadd.f32 %v2359_v13, %v2347_v25  ;;  %v2491_v9 = vmul.f32 %v3351_v34, %v3770_v58  ;;  %v5335_v13 = vld [vmem:[%s3638_s22 + $0x3e8] sm:$0x7]  ;;  %v5349_v4 = vld [vmem:[%s3638_s22 + $0x598] sm:$0x7] }
 0x16a   : >> { %v2274_v3 = vadd.f32 %v2262_v0, %v2237_v17  ;;  %v2492_v15 = vmul.f32 %v5318_v61, %v3770_v58  ;;  %v1482_v2 = vmul.f32 %v4945_v52, %v3671_v6  ;;  %v1483_v28 = vmul.f32 %v3174_v37, %v3671_v6  ;;  %v5352_v62 = vld [vmem:[%s3638_s22 + $0x98] sm:$0xff] }
 0x16b   : >> { %v2275_v23 = vadd.f32 %v2263_v56, %v2238_v63  ;;  %v2394_v36 = vadd.f32 %v2382_v47, %v2370_v24  ;;  %v2395_v29 = vadd.f32 %v2383_v42, %v2371_v5  ;;  %v1507_v33 = vmul.f32 %v4957_v7, %v3681_v11  ;;  %v5342_v47 = vld [vmem:[%s3638_s22 + $0x4c0] sm:$0x7]  ;;  %v6245_v37 = vld [vmem:[#allocation14_spill] sm:$0xff] }
 0x16c   : >> { %v2286_v1 = vmax.f32 %v2031_v35, %v2274_v3  ;;  %v1508_v0 = vmul.f32 %v3186_v55, %v3681_v11  ;;  %v1544_v39 = vmul.f32 %v4965_v18, %v3689_v16  ;;  %v1545_v59 = vmul.f32 %v3198_v27, %v3689_v16 }
 0x16d   : >> { %v2287_v52 = vmax.f32 %v2032_v10, %v2275_v23  ;;  %v2418_v53 = vadd.f32 %v2406_v41, %v2394_v36  ;;  %v2419_v56 = vadd.f32 %v2407_v43, %v2395_v29  ;;  %v1519_v21 = vadd.f32 %v1507_v33, %v1482_v2  ;;  %v5369_v23 = vld [vmem:[%s3638_s22 + $0x178] sm:$0x7]  ;;  %v5372_v36 = vld [vmem:[%s3638_s22 + $0x248] sm:$0xff] }
 0x16e   : >> { %v1520_v51 = vadd.f32 %v1508_v0, %v1483_v28  ;;  %v1581_v35 = vmul.f32 %v6243_v50, %v3701_v22  ;;  %v1582_v14 = vmul.f32 %v5335_v13, %v3701_v22  ;;  %v1618_v42 = vmul.f32 %v6244_v57, %v3715_v30  ;;  %v5366_v28 = vld [vmem:[%s3638_s22 + $0x170] sm:$0xff] }
 0x16f   : >> { %v2442_v10 = vadd.f32 %v2430_v40, %v2418_v53  ;;  %v2443_v41 = vadd.f32 %v2431_v19, %v2419_v56  ;;  %v1556_v43 = vadd.f32 %v1544_v39, %v1519_v21  ;;  %v1619_v34 = vmul.f32 %v5342_v47, %v3715_v30  ;;  %v5359_v40 = vld [vmem:[%s3638_s22 + $0xa0] sm:$0x7]  ;;  %v3282_v21 = vld [vmem:[%s3638_s22 + $0x310] sm:$0x7] }
 0x170   : >> { %v1557_v25 = vadd.f32 %v1545_v59, %v1520_v51  ;;  %v1655_v17 = vmul.f32 %v6245_v37, %v3718_v31  ;;  %v1656_v63 = vmul.f32 %v5349_v4, %v3718_v31  ;;  %v1692_v19 = vmul.f32 %v5352_v62, %v3742_v44 }
 0x171   : >> { %v2466_v24 = vadd.f32 %v2454_v60, %v2442_v10  ;;  %v2467_v5 = vadd.f32 %v2455_v32, %v2443_v41  ;;  %v1593_v3 = vadd.f32 %v1581_v35, %v1556_v43  ;;  %v1693_v2 = vmul.f32 %v5359_v40, %v3742_v44  ;;  %v5379_v60 = vld [vmem:[%s3638_s22 + $0x250] sm:$0x7] }
 0x172   : >> { %v1594_v29 = vadd.f32 %v1582_v14, %v1557_v25  ;;  %v1729_v33 = vmul.f32 %v5366_v28, %v3748_v46  ;;  %v1730_v0 = vmul.f32 %v5369_v23, %v3748_v46  ;;  %v1766_v32 = vmul.f32 %v5372_v36, %v3770_v58 }
 0x173   : >> { %v2503_v39 = vadd.f32 %v2491_v9, %v2466_v24  ;;  %v2504_v59 = vadd.f32 %v2492_v15, %v2467_v5  ;;  %v1630_v53 = vadd.f32 %v1618_v42, %v1593_v3  ;;  %v1767_v56 = vmul.f32 %v5379_v60, %v3770_v58  ;;  %v6246_v24 = vld [vmem:[#allocation11_spill] sm:$0xff] }
 0x174   : >> { %v1631_v51 = vadd.f32 %v1619_v34, %v1594_v29  ;;  %v1790_v35 = vmul.f32 %v4957_v7, %v3671_v6  ;;  %v1791_v14 = vmul.f32 %v3186_v55, %v3671_v6  ;;  %v1802_v10 = vmul.f32 %v4965_v18, %v3681_v11 }
 0x175   : >> { %v2515_v41 = vmax.f32 %v2286_v1, %v2503_v39  ;;  %v2516_v43 = vmax.f32 %v2287_v52, %v2504_v59  ;;  %v1667_v25 = vadd.f32 %v1655_v17, %v1630_v53  ;;  %v1803_v9 = vmul.f32 %v3198_v27, %v3681_v11 }
 0x176   : >> { %v1668_v15 = vadd.f32 %v1656_v63, %v1631_v51  ;;  %v1814_v42 = vadd.f32 %v1802_v10, %v1790_v35  ;;  %v1839_v5 = vmul.f32 %v6246_v24, %v3689_v16  ;;  %v1840_v34 = vmul.f32 %v3282_v21, %v3689_v16  ;;  %v6247_v10 = vld [vmem:[#allocation15_spill] sm:$0xff] }
 0x177   : >> { %v2527_v3 = vadd.f32 %v2515_v41, %v3674_v8  ;;  %v2528_v7 = vadd.f32 %v2516_v43, %v3674_v8  ;;  %v1704_v55 = vadd.f32 %v1692_v19, %v1667_v25  ;;  %v1815_v29 = vadd.f32 %v1803_v9, %v1791_v14 }
 0x178   : >> { %v1705_v18 = vadd.f32 %v1693_v2, %v1668_v15  ;;  %v1851_v1 = vadd.f32 %v1839_v5, %v1814_v42  ;;  %v1863_v52 = vmul.f32 %v6244_v57, %v3701_v22  ;;  %v1864_v27 = vmul.f32 %v5342_v47, %v3701_v22  ;;  %v5406_v2 = vld [vmem:[%s3638_s22 + $0x670] sm:$0x7]  ;;  %v5421_v15 = vld [vmem:[%s3638_s22 + $0x320] sm:$0xff]  ;;  %v5428_v5 = vld [vmem:[%s3638_s22 + $0x328] sm:$0x7] }
 0x179   : >> { %v2539_v17 = vmax.f32 %v2527_v3, 0.0  ;;  %v2540_v63 = vmax.f32 %v2528_v7, 0.0  ;;  %v1741_v39 = vadd.f32 %v1729_v33, %v1704_v55  ;;  %v1852_v59 = vadd.f32 %v1840_v34, %v1815_v29 }
 0x17a   : >> { %v1742_v53 = vadd.f32 %v1730_v0, %v1705_v18  ;;  %v1875_v21 = vadd.f32 %v1863_v52, %v1851_v1  ;;  %v1887_v51 = vmul.f32 %v6245_v37, %v3715_v30  ;;  %v1888_v19 = vmul.f32 %v5349_v4, %v3715_v30 }
 0x17b   : >> { %2551 = vst [vmem:[#allocation2 + $0x70] sm:$0x7] %v2539_v17  ;;  %v5408_v35 = vadd.f32 %v1766_v32, %v1741_v39  ;;  %v1876_v14 = vadd.f32 %v1864_v27, %v1852_v59  ;;  %v1924_v33 = vmul.f32 %v6247_v10, %v3718_v31  ;;  %v1925_v0 = vmul.f32 %v5406_v2, %v3718_v31 }
 0x17c   : >> { %v5414_v41 = vadd.f32 %v1767_v56, %v1742_v53  ;;  %v1899_v43 = vadd.f32 %v1887_v51, %v1875_v21  ;;  %v1948_v25 = vmul.f32 %v5366_v28, %v3742_v44  ;;  %v1949_v9 = vmul.f32 %v5369_v23, %v3742_v44  ;;  %v3318_v51 = vld [vmem:[%s3638_s22 + $0x400] sm:$0x7] }
 0x17d   : >> { %v1900_v32 = vadd.f32 %v1888_v19, %v1876_v14  ;;  %v1972_v42 = vmul.f32 %v5372_v36, %v3748_v46  ;;  %v1973_v24 = vmul.f32 %v5379_v60, %v3748_v46  ;;  %v2009_v56 = vmul.f32 %v5421_v15, %v3770_v58 }
 0x17e   : >> { %v1936_v34 = vadd.f32 %v1924_v33, %v1899_v43  ;;  %v2010_v3 = vmul.f32 %v5428_v5, %v3770_v58  ;;  %v2045_v7 = vmul.f32 %v6243_v50, %v3671_v6  ;;  %v2046_v55 = vmul.f32 %v5335_v13, %v3671_v6 }
 0x17f   : >> { %v1937_v29 = vadd.f32 %v1925_v0, %v1900_v32  ;;  %v2057_v18 = vmul.f32 %v6244_v57, %v3681_v11  ;;  %v2058_v1 = vmul.f32 %v5342_v47, %v3681_v11  ;;  %v2081_v52 = vmul.f32 %v6245_v37, %v3689_v16 }
 0x180   : >> { %v1960_v27 = vadd.f32 %v1948_v25, %v1936_v34  ;;  %v2082_v17 = vmul.f32 %v5349_v4, %v3689_v16  ;;  %v2105_v50 = vmul.f32 %v5352_v62, %v3701_v22  ;;  %v2106_v13 = vmul.f32 %v5359_v40, %v3701_v22  ;;  %v5460_v34 = vld [vmem:[%s3638_s22 + $0x3f8] sm:$0xff] }
 0x181   : >> { %v1961_v39 = vadd.f32 %v1949_v9, %v1937_v29  ;;  %v2069_v59 = vadd.f32 %v2057_v18, %v2045_v7  ;;  %v2070_v53 = vadd.f32 %v2058_v1, %v2046_v55  ;;  %v2129_v21 = vmul.f32 %v5366_v28, %v3715_v30  ;;  %v5463_v7 = vld [vmem:[%s3638_s22 + $0x4d0] sm:$0xff]  ;;  %v3330_v55 = vld [vmem:[%s3638_s22 + $0x4d8] sm:$0x7] }
 0x182   : >> { %v2602_v19 = vld [vmem:[#allocation2 + $0x70] sm:$0xff]  ;;  %v1984_v14 = vadd.f32 %v1972_v42, %v1960_v27  ;;  %v2130_v33 = vmul.f32 %v5369_v23, %v3715_v30  ;;  %v2153_v0 = vmul.f32 %v5372_v36, %v3718_v31  ;;  %v2154_v40 = vmul.f32 %v5379_v60, %v3718_v31 }
 0x183   : >> { %v3396_v43 = vpack.c.bf16 %v2540_v63, %v2602_v19  ;;  %v1985_v25 = vadd.f32 %v1973_v24, %v1961_v39  ;;  %v2093_v9 = vadd.f32 %v2081_v52, %v2069_v59  ;;  %v2094_v32 = vadd.f32 %v2082_v17, %v2070_v53  ;;  %v3342_v27 = vld [vmem:[%s3638_s22 + $0x5b0] sm:$0x7]  ;;  %v5473_v17 = vld [vmem:[%s3638_s22 + $0x5a8] sm:$0xff] }
 0x184   : >> { %v2021_v42 = vadd.f32 %v2009_v56, %v1984_v14  ;;  %v2190_v29 = vmul.f32 %v5460_v34, %v3742_v44  ;;  %v2191_v18 = vmul.f32 %v3318_v51, %v3742_v44  ;;  %v2227_v1 = vmul.f32 %v5463_v7, %v3748_v46 }
 0x185   : >> { %3397 = vmatpush1.bf16.msra.mxu0 %v3396_v43  ;;  %3429 = vmatpush1.bf16.msra.mxu1 %v3396_v43  ;;  %v2022_v63 = vadd.f32 %v2010_v3, %v1985_v25  ;;  %v2117_v24 = vadd.f32 %v2105_v50, %v2093_v9  ;;  %v2118_v52 = vadd.f32 %v2106_v13, %v2094_v32 }
 0x186   : >> { %3398 = vmatprep.subr.bf16.mxu0 %v6227_v49  ;;  %3418 = vmatprep.subr.bf16.mxu1 %v6227_v49  ;;  %v2033_v56 = vmax.f32 %v5408_v35, %v2021_v42  ;;  %v2228_v39 = vmul.f32 %v3330_v55, %v3748_v46  ;;  %v2264_v59 = vmul.f32 %v5473_v17, %v3770_v58 }
 0x187   : >> { %v2034_v53 = vmax.f32 %v5414_v41, %v2022_v63  ;;  %v2141_v51 = vadd.f32 %v2129_v21, %v2117_v24  ;;  %v2142_v19 = vadd.f32 %v2130_v33, %v2118_v52  ;;  %v2265_v3 = vmul.f32 %v3342_v27, %v3770_v58  ;;  %v3354_v63 = vld [vmem:[%s3638_s22 + $0x688] sm:$0x7] }
 0x188   : >> { %v2300_v50 = vmul.f32 %v6244_v57, %v3671_v6  ;;  %v2301_v13 = vmul.f32 %v5342_v47, %v3671_v6  ;;  %v2312_v35 = vmul.f32 %v6245_v37, %v3681_v11  ;;  %v2313_v14 = vmul.f32 %v5349_v4, %v3681_v11 }
 0x189   : >> { %v2165_v43 = vadd.f32 %v2153_v0, %v2141_v51  ;;  %v2166_v25 = vadd.f32 %v2154_v40, %v2142_v19  ;;  %v2336_v41 = vmul.f32 %v6247_v10, %v3689_v16  ;;  %v2337_v21 = vmul.f32 %v5406_v2, %v3689_v16 }
 0x18a   : >> { %v2324_v33 = vadd.f32 %v2312_v35, %v2300_v50  ;;  %v2325_v57 = vadd.f32 %v2313_v14, %v2301_v13  ;;  %v2360_v47 = vmul.f32 %v5366_v28, %v3701_v22  ;;  %v2361_v37 = vmul.f32 %v5369_v23, %v3701_v22  ;;  %v5515_v50 = vld [vmem:[%s3638_s22 + $0x680] sm:$0xff] }
 0x18b   : >> { %v2202_v9 = vadd.f32 %v2190_v29, %v2165_v43  ;;  %v2203_v32 = vadd.f32 %v2191_v18, %v2166_v25  ;;  %v2384_v4 = vmul.f32 %v5372_v36, %v3715_v30  ;;  %v2385_v10 = vmul.f32 %v5379_v60, %v3715_v30 }
 0x18c   : >> { %v2348_v0 = vadd.f32 %v2336_v41, %v2324_v33  ;;  %v2349_v40 = vadd.f32 %v2337_v21, %v2325_v57  ;;  %v2408_v2 = vmul.f32 %v5421_v15, %v3718_v31  ;;  %v2409_v42 = vmul.f32 %v5428_v5, %v3718_v31 }
 0x18d   : >> { %v2239_v24 = vadd.f32 %v2227_v1, %v2202_v9  ;;  %v2240_v23 = vadd.f32 %v2228_v39, %v2203_v32  ;;  %v2432_v29 = vmul.f32 %v5463_v7, %v3742_v44  ;;  %v2433_v18 = vmul.f32 %v3330_v55, %v3742_v44 }
 0x18e   : >> { %v2372_v52 = vadd.f32 %v2360_v47, %v2348_v0  ;;  %v2373_v51 = vadd.f32 %v2361_v37, %v2349_v40  ;;  %v2456_v60 = vmul.f32 %v5473_v17, %v3748_v46  ;;  %v2457_v19 = vmul.f32 %v3342_v27, %v3748_v46 }
 0x18f   : >> { %v2276_v13 = vadd.f32 %v2264_v59, %v2239_v24  ;;  %v2277_v35 = vadd.f32 %v2265_v3, %v2240_v23  ;;  %v2493_v5 = vmul.f32 %v5515_v50, %v3770_v58  ;;  %v2494_v1 = vmul.f32 %v3354_v63, %v3770_v58 }
 0x190   : >> { %v2396_v39 = vadd.f32 %v2384_v4, %v2372_v52  ;;  %v2397_v14 = vadd.f32 %v2385_v10, %v2373_v51  ;;  %v1484_v55 = vmul.f32 %v5156_v26, %v3671_v6  ;;  %v1485_v43 = vmul.f32 %v5352_v62, %v3671_v6  ;;  %v5558_v52 = vld [vmem:[%s3638_s22 + $0x188] sm:$0xff] }
 0x191   : >> { %v2288_v25 = vmax.f32 %v2033_v56, %v2276_v13  ;;  %v2289_v41 = vmax.f32 %v2034_v53, %v2277_v35  ;;  %v1509_v27 = vmul.f32 %v5168_v20, %v3681_v11  ;;  %v1510_v59 = vmul.f32 %v5366_v28, %v3681_v11 }
 0x192   : >> { %v2420_v3 = vadd.f32 %v2408_v2, %v2396_v39  ;;  %v2421_v21 = vadd.f32 %v2409_v42, %v2397_v14  ;;  %v1546_v33 = vmul.f32 %v5176_v45, %v3689_v16  ;;  %v1547_v26 = vmul.f32 %v5372_v36, %v3689_v16  ;;  %v5545_v2 = vld [vmem:[%s3638_s22 + $0xa8] sm:$0xff]  ;;  %v5548_v42 = vld [vmem:[%s3638_s22 + $0xb0] sm:$0xff] }
 0x193   : >> { %v1521_v57 = vadd.f32 %v1509_v27, %v1484_v55  ;;  %v1522_v62 = vadd.f32 %v1510_v59, %v1485_v43  ;;  %v1583_v56 = vmul.f32 %v5265_v48, %v3701_v22  ;;  %v1584_v53 = vmul.f32 %v5460_v34, %v3701_v22 }
 0x194   : >> { %v2444_v47 = vadd.f32 %v2432_v29, %v2420_v3  ;;  %v2445_v37 = vadd.f32 %v2433_v18, %v2421_v21  ;;  %v1620_v9 = vmul.f32 %v5269_v12, %v3715_v30  ;;  %v1621_v32 = vmul.f32 %v5463_v7, %v3715_v30  ;;  %v5555_v18 = vld [vmem:[%s3638_s22 + $0x180] sm:$0xff] }
 0x195   : >> { %v1558_v4 = vadd.f32 %v1546_v33, %v1521_v57  ;;  %v1559_v10 = vadd.f32 %v1547_v26, %v1522_v62  ;;  %v1657_v0 = vmul.f32 %v5280_v38, %v3718_v31  ;;  %v1658_v40 = vmul.f32 %v5473_v17, %v3718_v31 }
 0x196   : >> { %v2468_v63 = vadd.f32 %v2456_v60, %v2444_v47  ;;  %v2469_v24 = vadd.f32 %v2457_v19, %v2445_v37  ;;  %v1694_v23 = vmul.f32 %v5545_v2, %v3742_v44  ;;  %v1695_v29 = vmul.f32 %v5548_v42, %v3742_v44  ;;  %v5565_v60 = vld [vmem:[%s3638_s22 + $0x258] sm:$0xff]  ;;  %v5568_v19 = vld [vmem:[%s3638_s22 + $0x260] sm:$0xff] }
 0x197   : >> { %v1595_v51 = vadd.f32 %v1583_v56, %v1558_v4  ;;  %v1596_v13 = vadd.f32 %v1584_v53, %v1559_v10  ;;  %v1731_v35 = vmul.f32 %v5555_v18, %v3748_v46  ;;  %v1732_v39 = vmul.f32 %v5558_v52, %v3748_v46 }
 0x198   : >> { %v2505_v14 = vadd.f32 %v2493_v5, %v2468_v63  ;;  %v2506_v55 = vadd.f32 %v2494_v1, %v2469_v24  ;;  %v1768_v43 = vmul.f32 %v5565_v60, %v3770_v58  ;;  %v1769_v27 = vmul.f32 %v5568_v19, %v3770_v58 }
 0x199   : >> { %v1632_v59 = vadd.f32 %v1620_v9, %v1595_v51  ;;  %v1633_v3 = vadd.f32 %v1621_v32, %v1596_v13  ;;  %v1792_v21 = vmul.f32 %v5168_v20, %v3671_v6  ;;  %v1793_v33 = vmul.f32 %v5366_v28, %v3671_v6 }
 0x19a   : >> { %v2517_v26 = vmax.f32 %v2288_v25, %v2505_v14  ;;  %v2518_v57 = vmax.f32 %v2289_v41, %v2506_v55  ;;  %v1804_v5 = vmul.f32 %v5176_v45, %v3681_v11  ;;  %v1805_v1 = vmul.f32 %v5372_v36, %v3681_v11 }
 0x19b   : >> { %v1669_v62 = vadd.f32 %v1657_v0, %v1632_v59  ;;  %v1670_v56 = vadd.f32 %v1658_v40, %v1633_v3  ;;  %v1841_v53 = vmul.f32 %v5229_v54, %v3689_v16  ;;  %v1842_v47 = vmul.f32 %v5421_v15, %v3689_v16 }
 0x19c   : >> { %v2529_v20 = vadd.f32 %v2517_v26, %v3674_v8  ;;  %v2530_v28 = vadd.f32 %v2518_v57, %v3674_v8  ;;  %v1816_v25 = vadd.f32 %v1804_v5, %v1792_v21  ;;  %v1817_v41 = vadd.f32 %v1805_v1, %v1793_v33  ;;  %v5618_v57 = vld [vmem:[%s3638_s22 + $0x330] sm:$0xff] }
 0x19d   : >> { %v1706_v37 = vadd.f32 %v1694_v23, %v1669_v62  ;;  %v1707_v9 = vadd.f32 %v1695_v29, %v1670_v56  ;;  %v1865_v45 = vmul.f32 %v5269_v12, %v3701_v22  ;;  %v1866_v36 = vmul.f32 %v5463_v7, %v3701_v22 }
 0x19e   : >> { %v2541_v32 = vmax.f32 %v2529_v20, 0.0  ;;  %v2542_v4 = vmax.f32 %v2530_v28, 0.0  ;;  %v1853_v54 = vadd.f32 %v1841_v53, %v1816_v25  ;;  %v1854_v10 = vadd.f32 %v1842_v47, %v1817_v41  ;;  %v5633_v20 = vld [vmem:[%s3638_s22 + $0x338] sm:$0xff] }
 0x19f   : >> { %v1743_v0 = vadd.f32 %v1731_v35, %v1706_v37  ;;  %v1744_v15 = vadd.f32 %v1732_v39, %v1707_v9  ;;  %v1889_v40 = vmul.f32 %v5280_v38, %v3715_v30  ;;  %v1890_v63 = vmul.f32 %v5473_v17, %v3715_v30 }
 0x1a0   : >> { %2554 = vst [vmem:[#allocation2 + $0x88] sm:$0x7] %v2542_v4  ;;  %v1877_v24 = vadd.f32 %v1865_v45, %v1853_v54  ;;  %v1878_v23 = vadd.f32 %v1866_v36, %v1854_v10  ;;  %v1926_v29 = vmul.f32 %v5318_v61, %v3718_v31  ;;  %v1927_v51 = vmul.f32 %v5515_v50, %v3718_v31 }
 0x1a1   : >> { %v5600_v13 = vadd.f32 %v1768_v43, %v1743_v0  ;;  %v5602_v35 = vadd.f32 %v1769_v27, %v1744_v15  ;;  %v1950_v55 = vmul.f32 %v5555_v18, %v3742_v44  ;;  %v1951_v59 = vmul.f32 %v5558_v52, %v3742_v44  ;;  %v5649_v15 = vld [vmem:[%s3638_s22 + $0x408] sm:$0xff] }
 0x1a2   : >> { %v1901_v39 = vadd.f32 %v1889_v40, %v1877_v24  ;;  %v1902_v14 = vadd.f32 %v1890_v63, %v1878_v23  ;;  %v1974_v3 = vmul.f32 %v5565_v60, %v3748_v46  ;;  %v1975_v21 = vmul.f32 %v5568_v19, %v3748_v46  ;;  %v5656_v23 = vld [vmem:[%s3638_s22 + $0x410] sm:$0xff] }
 0x1a3   : >> { %v2047_v43 = vmul.f32 %v5265_v48, %v3671_v6  ;;  %v2048_v27 = vmul.f32 %v5460_v34, %v3671_v6  ;;  %v2059_v5 = vmul.f32 %v5269_v12, %v3681_v11  ;;  %v2060_v1 = vmul.f32 %v5463_v7, %v3681_v11 }
 0x1a4   : >> { %v1938_v33 = vadd.f32 %v1926_v29, %v1901_v39  ;;  %v1939_v26 = vadd.f32 %v1927_v51, %v1902_v14  ;;  %v2011_v62 = vmul.f32 %v5618_v57, %v3770_v58  ;;  %v2083_v48 = vmul.f32 %v5280_v38, %v3689_v16  ;;  %v2573_v29 = vld [vmem:[%s5638_s6 + $0x8] sm:$0xff] }
 0x1a5   : >> { %v2084_v34 = vmul.f32 %v5473_v17, %v3689_v16  ;;  %v2107_v56 = vmul.f32 %v5545_v2, %v3701_v22  ;;  %v2071_v28 = vadd.f32 %v2059_v5, %v2047_v43  ;;  %v2072_v25 = vadd.f32 %v2060_v1, %v2048_v27  ;;  %v5674_v43 = vld [vmem:[%s3638_s22 + $0x4e8] sm:$0xff]  ;;  %3363 = vmatprep.mubr.msk.f32.mxu0 %vm2612_vm0, %v2573_v29 }
 0x1a6   : >> { %v1962_v53 = vadd.f32 %v1950_v55, %v1938_v33  ;;  %v1963_v47 = vadd.f32 %v1951_v59, %v1939_v26  ;;  %v2012_v37 = vmul.f32 %v5633_v20, %v3770_v58  ;;  %v2108_v9 = vmul.f32 %v5548_v42, %v3701_v22  ;;  %v5666_v55 = vld [vmem:[%s3638_s22 + $0x4e0] sm:$0xff]  ;;  %v2581_v59 = vld [vmem:[%s5638_s6 + $0x48] sm:$0xff]  ;;  %v5679_v33 = vld [vmem:[%s3638_s22 + $0x5b8] sm:$0xff] }
 0x1a7   : >> { %v2605_v41 = vld [vmem:[#allocation2 + $0x88] sm:$0xff]  ;;  %v2131_v45 = vmul.f32 %v5555_v18, %v3715_v30  ;;  %v2132_v36 = vmul.f32 %v5558_v52, %v3715_v30  ;;  %v2095_v0 = vadd.f32 %v2083_v48, %v2071_v28  ;;  %v2096_v40 = vadd.f32 %v2084_v34, %v2072_v25  ;;  %3367 = vmatprep.mubr.msk.f32.mxu1 %vm2612_vm0, %v2581_v59 }
 0x1a8   : >> { %v3399_v4 = vpack.c.bf16 %v2605_v41, %v2541_v32  ;;  %v1986_v54 = vadd.f32 %v1974_v3, %v1962_v53  ;;  %v1987_v10 = vadd.f32 %v1975_v21, %v1963_v47  ;;  %v2155_v63 = vmul.f32 %v5565_v60, %v3718_v31 }
 0x1a9   : >> { %v2156_v24 = vmul.f32 %v5568_v19, %v3718_v31  ;;  %v2192_v32 = vmul.f32 %v5649_v15, %v3742_v44  ;;  %v2119_v39 = vadd.f32 %v2107_v56, %v2095_v0  ;;  %v2193_v14 = vmul.f32 %v5656_v23, %v3742_v44 }
 0x1aa   : >> { %3400 = vmatpush1.bf16.msra.mxu0 %v3399_v4  ;;  %3430 = vmatpush1.bf16.msra.mxu1 %v3399_v4  ;;  %v5661_v51 = vadd.f32 %v2011_v62, %v1986_v54  ;;  %v5671_v3 = vadd.f32 %v2012_v37, %v1987_v10  ;;  %v2120_v21 = vadd.f32 %v2108_v9, %v2096_v40 }
 0x1ab   : >> { %3401 = vmatprep.subr.bf16.mxu0 %v6227_v49  ;;  %3419 = vmatprep.subr.bf16.mxu1 %v6227_v49  ;;  %v2229_v27 = vmul.f32 %v5666_v55, %v3748_v46  ;;  %v2143_v5 = vadd.f32 %v2131_v45, %v2119_v39  ;;  %v2230_v1 = vmul.f32 %v5674_v43, %v3748_v46  ;;  %v3189_v39 = vld [vmem:[%s3638_s22 + $0x178] sm:$0x7] }
 0x1ac   : >> { %v2035_v26 = vmax.f32 %v5600_v13, %v5661_v51  ;;  %v2266_v62 = vmul.f32 %v5679_v33, %v3770_v58  ;;  %v2144_v48 = vadd.f32 %v2132_v36, %v2120_v21  ;;  %v2302_v34 = vmul.f32 %v5269_v12, %v3671_v6 }
 0x1ad   : >> { %v2303_v56 = vmul.f32 %v5463_v7, %v3671_v6  ;;  %v2314_v13 = vmul.f32 %v5280_v38, %v3681_v11  ;;  %v2167_v53 = vadd.f32 %v2155_v63, %v2143_v5  ;;  %v2315_v47 = vmul.f32 %v5473_v17, %v3681_v11  ;;  %v5704_v7 = vld [vmem:[%s3638_s22 + $0x5c0] sm:$0xff] }
 0x1ae   : >> { %v2338_v28 = vmul.f32 %v5318_v61, %v3689_v16  ;;  %v2339_v25 = vmul.f32 %v5515_v50, %v3689_v16  ;;  %v2036_v12 = vmax.f32 %v5602_v35, %v5671_v3  ;;  %v2168_v41 = vadd.f32 %v2156_v24, %v2144_v48  ;;  %v3177_v63 = vld [vmem:[%s3638_s22 + $0xa0] sm:$0x7] }
 0x1af   : >> { %v2326_v38 = vadd.f32 %v2314_v13, %v2302_v34  ;;  %v2362_v37 = vmul.f32 %v5555_v18, %v3701_v22  ;;  %v2204_v9 = vadd.f32 %v2192_v32, %v2167_v53  ;;  %v2267_v17 = vmul.f32 %v5704_v7, %v3770_v58 }
 0x1b0   : >> { %v2327_v61 = vadd.f32 %v2315_v47, %v2303_v56  ;;  %v2363_v50 = vmul.f32 %v5558_v52, %v3701_v22  ;;  %v2205_v45 = vadd.f32 %v2193_v14, %v2168_v41  ;;  %v2386_v35 = vmul.f32 %v5565_v60, %v3715_v30 }
 0x1b1   : >> { %v2350_v36 = vadd.f32 %v2338_v28, %v2326_v38  ;;  %v2387_v4 = vmul.f32 %v5568_v19, %v3715_v30  ;;  %v2241_v54 = vadd.f32 %v2229_v27, %v2204_v9  ;;  %v2410_v0 = vmul.f32 %v5618_v57, %v3718_v31  ;;  %v5731_v27 = vld [vmem:[%s3638_s22 + $0x690] sm:$0xff]  ;;  %v5751_v9 = vld [vmem:[%s3638_s22 + $0x400] sm:$0x7] }
 0x1b2   : >> { %v2351_v10 = vadd.f32 %v2339_v25, %v2327_v61  ;;  %v2411_v40 = vmul.f32 %v5633_v20, %v3718_v31  ;;  %v2242_v24 = vadd.f32 %v2230_v1, %v2205_v45  ;;  %v2434_v29 = vmul.f32 %v5666_v55, %v3742_v44  ;;  %v5734_v1 = vld [vmem:[%s3638_s22 + $0x698] sm:$0xff]  ;;  %v3201_v28 = vld [vmem:[%s3638_s22 + $0x250] sm:$0x7] }
 0x1b3   : >> { %v2374_v32 = vadd.f32 %v2362_v37, %v2350_v36  ;;  %v2435_v51 = vmul.f32 %v5674_v43, %v3742_v44  ;;  %v2278_v14 = vadd.f32 %v2266_v62, %v2241_v54  ;;  %v2458_v3 = vmul.f32 %v5679_v33, %v3748_v46  ;;  %v5756_v36 = vld [vmem:[%s3638_s22 + $0x4d8] sm:$0x7] }
 0x1b4   : >> { %v2375_v59 = vadd.f32 %v2363_v50, %v2351_v10  ;;  %v2459_v21 = vmul.f32 %v5704_v7, %v3748_v46  ;;  %v2495_v48 = vmul.f32 %v5731_v27, %v3770_v58  ;;  %v1486_v34 = vmul.f32 %v3177_v63, %v3671_v6 }
 0x1b5   : >> { %v2398_v5 = vadd.f32 %v2386_v35, %v2374_v32  ;;  %v1487_v62 = vmul.f32 %v5545_v2, %v3671_v6  ;;  %v2496_v13 = vmul.f32 %v5734_v1, %v3770_v58  ;;  %v1511_v53 = vmul.f32 %v3189_v39, %v3681_v11 }
 0x1b6   : >> { %v2399_v56 = vadd.f32 %v2387_v4, %v2375_v59  ;;  %v1512_v47 = vmul.f32 %v5555_v18, %v3681_v11  ;;  %v2279_v25 = vadd.f32 %v2267_v17, %v2242_v24  ;;  %v1548_v38 = vmul.f32 %v3201_v28, %v3689_v16  ;;  %v5765_v24 = vld [vmem:[%s3638_s22 + $0x5b0] sm:$0x7]  ;;  %v5772_v59 = vld [vmem:[%s3638_s22 + $0xb8] sm:$0x7] }
 0x1b7   : >> { %v2422_v41 = vadd.f32 %v2410_v0, %v2398_v5  ;;  %v1549_v37 = vmul.f32 %v5565_v60, %v3689_v16  ;;  %v1523_v61 = vadd.f32 %v1511_v53, %v1486_v34  ;;  %v1585_v45 = vmul.f32 %v5751_v9, %v3701_v22  ;;  %v5780_v53 = vld [vmem:[%s3638_s22 + $0x190] sm:$0x7] }
 0x1b8   : >> { %v2423_v2 = vadd.f32 %v2411_v40, %v2399_v56  ;;  %v1524_v50 = vadd.f32 %v1512_v47, %v1487_v62  ;;  %v2290_v35 = vmax.f32 %v2035_v26, %v2278_v14  ;;  %v1586_v4 = vmul.f32 %v5649_v15, %v3701_v22  ;;  %v5775_v62 = vld [vmem:[%s3638_s22 + $0xc0] sm:$0xff] }
 0x1b9   : >> { %v2446_v17 = vadd.f32 %v2434_v29, %v2422_v41  ;;  %v1622_v54 = vmul.f32 %v5756_v36, %v3715_v30  ;;  %v1560_v0 = vadd.f32 %v1548_v38, %v1523_v61  ;;  %v1623_v63 = vmul.f32 %v5666_v55, %v3715_v30  ;;  %v3285_v41 = vld [vmem:[%s3638_s22 + $0x328] sm:$0x7] }
 0x1ba   : >> { %v2447_v10 = vadd.f32 %v2435_v51, %v2423_v2  ;;  %v1561_v40 = vadd.f32 %v1549_v37, %v1524_v50  ;;  %v2291_v32 = vmax.f32 %v2036_v12, %v2279_v25  ;;  %v1659_v29 = vmul.f32 %v5765_v24, %v3718_v31  ;;  %v5783_v12 = vld [vmem:[%s3638_s22 + $0x198] sm:$0xff] }
 0x1bb   : >> { %v2470_v26 = vadd.f32 %v2458_v3, %v2446_v17  ;;  %v1660_v14 = vmul.f32 %v5679_v33, %v3718_v31  ;;  %v1597_v5 = vadd.f32 %v1585_v45, %v1560_v0  ;;  %v1696_v56 = vmul.f32 %v5772_v59, %v3742_v44 }
 0x1bc   : >> { %v2471_v51 = vadd.f32 %v2459_v21, %v2447_v10  ;;  %v1598_v34 = vadd.f32 %v1586_v4, %v1561_v40  ;;  %v1697_v47 = vmul.f32 %v5775_v62, %v3742_v44  ;;  %v1733_v25 = vmul.f32 %v5780_v53, %v3748_v46 }
 0x1bd   : >> { %v2507_v3 = vadd.f32 %v2495_v48, %v2470_v26  ;;  %v1734_v21 = vmul.f32 %v5783_v12, %v3748_v46  ;;  %v1634_v37 = vadd.f32 %v1622_v54, %v1597_v5  ;;  %v1794_v61 = vmul.f32 %v3189_v39, %v3671_v6  ;;  %v5806_v26 = vld [vmem:[%s3638_s22 + $0x268] sm:$0x7] }
 0x1be   : >> { %v2508_v38 = vadd.f32 %v2496_v13, %v2471_v51  ;;  %v1635_v2 = vadd.f32 %v1623_v63, %v1598_v34  ;;  %v1795_v45 = vmul.f32 %v5555_v18, %v3671_v6  ;;  %v1806_v48 = vmul.f32 %v3201_v28, %v3681_v11 }
 0x1bf   : >> { %v2519_v50 = vmax.f32 %v2290_v35, %v2507_v3  ;;  %v1807_v17 = vmul.f32 %v5565_v60, %v3681_v11  ;;  %v1671_v10 = vadd.f32 %v1659_v29, %v1634_v37  ;;  %v1843_v13 = vmul.f32 %v3285_v41, %v3689_v16  ;;  %v5809_v29 = vld [vmem:[%s3638_s22 + $0x270] sm:$0xff] }
 0x1c0   : >> { %v2520_v4 = vmax.f32 %v2291_v32, %v2508_v38  ;;  %v1672_v0 = vadd.f32 %v1660_v14, %v1635_v2  ;;  %v1818_v40 = vadd.f32 %v1806_v48, %v1794_v61  ;;  %v1844_v18 = vmul.f32 %v5618_v57, %v3689_v16 }
 0x1c1   : >> { %v2531_v54 = vadd.f32 %v2519_v50, %v3674_v8  ;;  %v1819_v39 = vadd.f32 %v1807_v17, %v1795_v45  ;;  %v1708_v28 = vadd.f32 %v1696_v56, %v1671_v10  ;;  %v1867_v60 = vmul.f32 %v5756_v36, %v3701_v22 }
 0x1c2   : >> { %v2532_v35 = vadd.f32 %v2520_v4, %v3674_v8  ;;  %v1709_v63 = vadd.f32 %v1697_v47, %v1672_v0  ;;  %v1855_v14 = vadd.f32 %v1843_v13, %v1818_v40  ;;  %v1868_v5 = vmul.f32 %v5666_v55, %v3701_v22  ;;  %v5820_v47 = vld [vmem:[%s3638_s22 + $0x688] sm:$0x7]  ;;  %v5833_v13 = vld [vmem:[%s3638_s22 + $0x340] sm:$0x7] }
 0x1c3   : >> { %v2543_v32 = vmax.f32 %v2531_v54, 0.0  ;;  %v1856_v51 = vadd.f32 %v1844_v18, %v1819_v39  ;;  %v1770_v57 = vmul.f32 %v5806_v26, %v3770_v58  ;;  %v1771_v56 = vmul.f32 %v5809_v29, %v3770_v58 }
 0x1c4   : >> { %v2544_v34 = vmax.f32 %v2532_v35, 0.0  ;;  %v1891_v3 = vmul.f32 %v5765_v24, %v3715_v30  ;;  %v1879_v41 = vadd.f32 %v1867_v60, %v1855_v14  ;;  %v1892_v37 = vmul.f32 %v5679_v33, %v3715_v30 }
 0x1c5   : >> { %v1880_v38 = vadd.f32 %v1868_v5, %v1856_v51  ;;  %v1928_v2 = vmul.f32 %v5820_v47, %v3718_v31  ;;  %v1745_v50 = vadd.f32 %v1733_v25, %v1708_v28  ;;  %v1746_v45 = vadd.f32 %v1734_v21, %v1709_v63  ;;  %v5840_v21 = vld [vmem:[%s3638_s22 + $0x348] sm:$0xff] }
 0x1c6   : >> { %v3402_v61 = vpack.c.bf16 %v2544_v34, %v2543_v32  ;;  %v1929_v48 = vmul.f32 %v5731_v27, %v3718_v31  ;;  %v1903_v17 = vadd.f32 %v1891_v3, %v1879_v41  ;;  %v1952_v10 = vmul.f32 %v5780_v53, %v3742_v44 }
 0x1c7   : >> { %v1904_v4 = vadd.f32 %v1892_v37, %v1880_v38  ;;  %v1953_v0 = vmul.f32 %v5783_v12, %v3742_v44  ;;  %v1976_v54 = vmul.f32 %v5806_v26, %v3748_v46  ;;  %v1977_v25 = vmul.f32 %v5809_v29, %v3748_v46 }
 0x1c8   : >> { %3403 = vmatpush1.bf16.msra.mxu0 %v3402_v61  ;;  %3431 = vmatpush1.bf16.msra.mxu1 %v3402_v61  ;;  %v2013_v40 = vmul.f32 %v5833_v13, %v3770_v58  ;;  %v1940_v39 = vadd.f32 %v1928_v2, %v1903_v17  ;;  %v2014_v35 = vmul.f32 %v5840_v21, %v3770_v58  ;;  %v3322_v17 = vld [vmem:[%s3638_s22 + $0x420] sm:$0xff] }
 0x1c9   : >> { %3404 = vmatprep.subr.bf16.mxu0 %v6227_v49  ;;  %3420 = vmatprep.subr.bf16.mxu1 %v6227_v49  ;;  %v1941_v18 = vadd.f32 %v1929_v48, %v1904_v4  ;;  %v2049_v28 = vmul.f32 %v5751_v9, %v3671_v6  ;;  %v2050_v63 = vmul.f32 %v5649_v15, %v3671_v6  ;;  %v3321_v48 = vld [vmem:[%s3638_s22 + $0x418] sm:$0x7] }
 0x1ca   : >> { %v2061_v60 = vmul.f32 %v5756_v36, %v3681_v11  ;;  %v2062_v32 = vmul.f32 %v5666_v55, %v3681_v11  ;;  %v1964_v14 = vadd.f32 %v1952_v10, %v1940_v39  ;;  %v2085_v5 = vmul.f32 %v5765_v24, %v3689_v16  ;;  %v3333_v39 = vld [vmem:[%s3638_s22 + $0x4f0] sm:$0x7] }
 0x1cb   : >> { %v1965_v51 = vadd.f32 %v1953_v0, %v1941_v18  ;;  %v2086_v9 = vmul.f32 %v5679_v33, %v3689_v16  ;;  %v2109_v15 = vmul.f32 %v5772_v59, %v3701_v22  ;;  %v2110_v41 = vmul.f32 %v5775_v62, %v3701_v22  ;;  %v3334_v62 = vld [vmem:[%s3638_s22 + $0x4f8] sm:$0xff] }
 0x1cc   : >> { %v2073_v34 = vadd.f32 %v2061_v60, %v2049_v28  ;;  %v2074_v3 = vadd.f32 %v2062_v32, %v2050_v63  ;;  %v5864_v38 = vadd.f32 %v1770_v57, %v1745_v50  ;;  %v5866_v37 = vadd.f32 %v1771_v56, %v1746_v45  ;;  %v3345_v32 = vld [vmem:[%s3638_s22 + $0x5c8] sm:$0x7] }
 0x1cd   : >> { %v1988_v2 = vadd.f32 %v1976_v54, %v1964_v14  ;;  %v1989_v61 = vadd.f32 %v1977_v25, %v1965_v51  ;;  %v2133_v0 = vmul.f32 %v5780_v53, %v3715_v30  ;;  %v2134_v59 = vmul.f32 %v5783_v12, %v3715_v30  ;;  %v3346_v14 = vld [vmem:[%s3638_s22 + $0x5d0] sm:$0xff] }
 0x1ce   : >> { %v2097_v4 = vadd.f32 %v2085_v5, %v2073_v34  ;;  %v2098_v10 = vadd.f32 %v2086_v9, %v2074_v3  ;;  %v2157_v50 = vmul.f32 %v5806_v26, %v3718_v31  ;;  %v2158_v45 = vmul.f32 %v5809_v29, %v3718_v31 }
 0x1cf   : >> { %v5876_v57 = vadd.f32 %v2013_v40, %v1988_v2  ;;  %v5878_v56 = vadd.f32 %v2014_v35, %v1989_v61  ;;  %v2194_v18 = vmul.f32 %v3321_v48, %v3742_v44  ;;  %v2195_v28 = vmul.f32 %v3322_v17, %v3742_v44 }
 0x1d0   : >> { %v2121_v54 = vadd.f32 %v2109_v15, %v2097_v4  ;;  %v2122_v25 = vadd.f32 %v2110_v41, %v2098_v10  ;;  %v2231_v35 = vmul.f32 %v3333_v39, %v3748_v46  ;;  %v2232_v60 = vmul.f32 %v3334_v62, %v3748_v46 }
 0x1d1   : >> { %v2037_v63 = vmax.f32 %v5864_v38, %v5876_v57  ;;  %v2038_v40 = vmax.f32 %v5866_v37, %v5878_v56  ;;  %v2304_v9 = vmul.f32 %v5756_v36, %v3671_v6  ;;  %v2305_v34 = vmul.f32 %v5666_v55, %v3671_v6 }
 0x1d2   : >> { %v2145_v51 = vadd.f32 %v2133_v0, %v2121_v54  ;;  %v2146_v5 = vadd.f32 %v2134_v59, %v2122_v25  ;;  %v2316_v3 = vmul.f32 %v5765_v24, %v3681_v11  ;;  %v2317_v15 = vmul.f32 %v5679_v33, %v3681_v11  ;;  %v3357_v54 = vld [vmem:[%s3638_s22 + $0x6a0] sm:$0x7]  ;;  %v3358_v25 = vld [vmem:[%s3638_s22 + $0x6a8] sm:$0xff] }
 0x1d3   : >> { %v2340_v41 = vmul.f32 %v5820_v47, %v3689_v16  ;;  %v2341_v2 = vmul.f32 %v5731_v27, %v3689_v16  ;;  %v2268_v36 = vmul.f32 %v3345_v32, %v3770_v58  ;;  %v2269_v55 = vmul.f32 %v3346_v14, %v3770_v58 }
 0x1d4   : >> { %v2169_v61 = vadd.f32 %v2157_v50, %v2145_v51  ;;  %v2170_v48 = vadd.f32 %v2158_v45, %v2146_v5  ;;  %v2328_v17 = vadd.f32 %v2316_v3, %v2304_v9  ;;  %v2329_v24 = vadd.f32 %v2317_v15, %v2305_v34  ;;  %v3192_v5 = vld [vmem:[%s3638_s22 + $0x190] sm:$0x7] }
 0x1d5   : >> { %v2364_v33 = vmul.f32 %v5780_v53, %v3701_v22  ;;  %v2365_v47 = vmul.f32 %v5783_v12, %v3701_v22  ;;  %v2388_v10 = vmul.f32 %v5806_v26, %v3715_v30  ;;  %v2389_v0 = vmul.f32 %v5809_v29, %v3715_v30  ;;  %v3180_v12 = vld [vmem:[%s3638_s22 + $0xb8] sm:$0x7] }
 0x1d6   : >> { %v2206_v4 = vadd.f32 %v2194_v18, %v2169_v61  ;;  %v2207_v27 = vadd.f32 %v2195_v28, %v2170_v48  ;;  %v2352_v59 = vadd.f32 %v2340_v41, %v2328_v17  ;;  %v2353_v50 = vadd.f32 %v2341_v2, %v2329_v24  ;;  %v3204_v41 = vld [vmem:[%s3638_s22 + $0x268] sm:$0x7] }
 0x1d7   : >> { %v2412_v45 = vmul.f32 %v5833_v13, %v3718_v31  ;;  %v2413_v53 = vmul.f32 %v5840_v21, %v3718_v31  ;;  %v2436_v28 = vmul.f32 %v3333_v39, %v3742_v44  ;;  %v2437_v26 = vmul.f32 %v3334_v62, %v3742_v44 }
 0x1d8   : >> { %v2243_v51 = vadd.f32 %v2231_v35, %v2206_v4  ;;  %v2244_v18 = vadd.f32 %v2232_v60, %v2207_v27  ;;  %v2376_v29 = vadd.f32 %v2364_v33, %v2352_v59  ;;  %v2377_v9 = vadd.f32 %v2365_v47, %v2353_v50  ;;  %v5941_v47 = vld [vmem:[%s3638_s22 + $0x418] sm:$0x7]  ;;  %v5944_v4 = vld [vmem:[%s3638_s22 + $0x4f0] sm:$0x7] }
 0x1d9   : >> { %v2460_v34 = vmul.f32 %v3345_v32, %v3748_v46  ;;  %v2461_v13 = vmul.f32 %v3346_v14, %v3748_v46  ;;  %v2497_v3 = vmul.f32 %v3357_v54, %v3770_v58  ;;  %v2498_v21 = vmul.f32 %v3358_v25, %v3770_v58 }
 0x1da   : >> { %v1488_v35 = vmul.f32 %v5548_v42, %v3671_v6  ;;  %v1489_v39 = vmul.f32 %v3180_v12, %v3671_v6  ;;  %v2400_v60 = vadd.f32 %v2388_v10, %v2376_v29  ;;  %v2401_v62 = vadd.f32 %v2389_v0, %v2377_v9  ;;  %v5968_v9 = vld [vmem:[%s3638_s22 + $0xc8] sm:$0xff] }
 0x1db   : >> { %v1513_v15 = vmul.f32 %v5558_v52, %v3681_v11  ;;  %v1514_v32 = vmul.f32 %v3192_v5, %v3681_v11  ;;  %v2280_v14 = vadd.f32 %v2268_v36, %v2243_v51  ;;  %v2281_v2 = vadd.f32 %v2269_v55, %v2244_v18 }
 0x1dc   : >> { %v1550_v61 = vmul.f32 %v5568_v19, %v3689_v16  ;;  %v1551_v48 = vmul.f32 %v3204_v41, %v3689_v16  ;;  %v2424_v42 = vadd.f32 %v2412_v45, %v2400_v60  ;;  %v2425_v17 = vadd.f32 %v2413_v53, %v2401_v62  ;;  %v5955_v53 = vld [vmem:[%s3638_s22 + $0x5c8] sm:$0x7] }
 0x1dd   : >> { %v1525_v24 = vadd.f32 %v1513_v15, %v1488_v35  ;;  %v1526_v33 = vadd.f32 %v1514_v32, %v1489_v39  ;;  %v1587_v27 = vmul.f32 %v5656_v23, %v3701_v22  ;;  %v1588_v36 = vmul.f32 %v5941_v47, %v3701_v22  ;;  %v5971_v35 = vld [vmem:[%s3638_s22 + $0xd0] sm:$0x7]  ;;  %v3288_v39 = vld [vmem:[%s3638_s22 + $0x340] sm:$0x7] }
 0x1de   : >> { %v1624_v55 = vmul.f32 %v5674_v43, %v3715_v30  ;;  %v1625_v10 = vmul.f32 %v5944_v4, %v3715_v30  ;;  %v2448_v0 = vadd.f32 %v2436_v28, %v2424_v42  ;;  %v2449_v59 = vadd.f32 %v2437_v26, %v2425_v17  ;;  %v5995_v17 = vld [vmem:[%s3638_s22 + $0x1a8] sm:$0x7] }
 0x1df   : >> { %v1562_v50 = vadd.f32 %v1550_v61, %v1525_v24  ;;  %v1563_v45 = vadd.f32 %v1551_v48, %v1526_v33  ;;  %v2292_v54 = vmax.f32 %v2037_v63, %v2280_v14  ;;  %v2293_v25 = vmax.f32 %v2038_v40, %v2281_v2 }
 0x1e0   : >> { %v1661_v12 = vmul.f32 %v5704_v7, %v3718_v31  ;;  %v1662_v51 = vmul.f32 %v5955_v53, %v3718_v31  ;;  %v2472_v18 = vadd.f32 %v2460_v34, %v2448_v0  ;;  %v2473_v28 = vadd.f32 %v2461_v13, %v2449_v59  ;;  %v6004_v59 = vld [vmem:[%s3638_s22 + $0x278] sm:$0xff] }
 0x1e1   : >> { %v1599_v26 = vadd.f32 %v1587_v27, %v1562_v50  ;;  %v1600_v29 = vadd.f32 %v1588_v36, %v1563_v45  ;;  %v1698_v38 = vmul.f32 %v5968_v9, %v3742_v44  ;;  %v1699_v37 = vmul.f32 %v5971_v35, %v3742_v44 }
 0x1e2   : >> { %v2509_v57 = vadd.f32 %v2497_v3, %v2472_v18  ;;  %v2510_v56 = vadd.f32 %v2498_v21, %v2473_v28  ;;  %v1796_v34 = vmul.f32 %v5558_v52, %v3671_v6  ;;  %v1797_v13 = vmul.f32 %v3192_v5, %v3671_v6  ;;  %v5985_v3 = vld [vmem:[%s3638_s22 + $0x1a0] sm:$0xff] }
 0x1e3   : >> { %v1636_v63 = vadd.f32 %v1624_v55, %v1599_v26  ;;  %v1637_v40 = vadd.f32 %v1625_v10, %v1600_v29  ;;  %v1808_v60 = vmul.f32 %v5568_v19, %v3681_v11  ;;  %v1809_v62 = vmul.f32 %v3204_v41, %v3681_v11  ;;  %v6020_v29 = vld [vmem:[%s3638_s22 + $0x280] sm:$0x7] }
 0x1e4   : >> { %v2521_v15 = vmax.f32 %v2292_v54, %v2509_v57  ;;  %v2522_v32 = vmax.f32 %v2293_v25, %v2510_v56  ;;  %v1845_v52 = vmul.f32 %v5633_v20, %v3689_v16  ;;  %v1846_v5 = vmul.f32 %v3288_v39, %v3689_v16 }
 0x1e5   : >> { %v1673_v14 = vadd.f32 %v1661_v12, %v1636_v63  ;;  %v1674_v2 = vadd.f32 %v1662_v51, %v1637_v40  ;;  %v1820_v21 = vadd.f32 %v1808_v60, %v1796_v34  ;;  %v1821_v61 = vadd.f32 %v1809_v62, %v1797_v13  ;;  %v6011_v12 = vld [vmem:[%s3638_s22 + $0x6a0] sm:$0x7] }
 0x1e6   : >> { %v2533_v48 = vadd.f32 %v2521_v15, %v3674_v8  ;;  %v2534_v19 = vadd.f32 %v2522_v32, %v3674_v8  ;;  %v1735_v41 = vmul.f32 %v5985_v3, %v3748_v46  ;;  %v1869_v27 = vmul.f32 %v5674_v43, %v3701_v22 }
 0x1e7   : >> { %v1710_v42 = vadd.f32 %v1698_v38, %v1673_v14  ;;  %v1857_v24 = vadd.f32 %v1845_v52, %v1820_v21  ;;  %v1858_v33 = vadd.f32 %v1846_v5, %v1821_v61  ;;  %v1870_v20 = vmul.f32 %v5944_v4, %v3701_v22 }
 0x1e8   : >> { %v2545_v36 = vmax.f32 %v2533_v48, 0.0  ;;  %v2546_v55 = vmax.f32 %v2534_v19, 0.0  ;;  %v1711_v10 = vadd.f32 %v1699_v37, %v1674_v2  ;;  %v1736_v0 = vmul.f32 %v5995_v17, %v3748_v46 }
 0x1e9   : >> { %v1881_v50 = vadd.f32 %v1869_v27, %v1857_v24  ;;  %v1882_v45 = vadd.f32 %v1870_v20, %v1858_v33  ;;  %v1893_v54 = vmul.f32 %v5704_v7, %v3715_v30  ;;  %v1894_v25 = vmul.f32 %v5955_v53, %v3715_v30  ;;  %v3312_v24 = vld [vmem:[%s3638_s22 + $0x358] sm:$0x7]  ;;  %v3311_v20 = vld [vmem:[%s3638_s22 + $0x350] sm:$0xff] }
 0x1ea   : >> { %2557 = vst [vmem:[#allocation2 + $0xa0] sm:$0x7] %v2545_v36  ;;  %v1772_v51 = vmul.f32 %v6004_v59, %v3770_v58  ;;  %v1930_v18 = vmul.f32 %v5734_v1, %v3718_v31  ;;  %v1931_v28 = vmul.f32 %v6011_v12, %v3718_v31  ;;  %v1747_v26 = vadd.f32 %v1735_v41, %v1710_v42 }
 0x1eb   : >> { %v1905_v38 = vadd.f32 %v1893_v54, %v1881_v50  ;;  %v1906_v37 = vadd.f32 %v1894_v25, %v1882_v45  ;;  %v1954_v57 = vmul.f32 %v5985_v3, %v3742_v44  ;;  %v1748_v56 = vadd.f32 %v1736_v0, %v1711_v10  ;;  %v3324_v0 = vld [vmem:[%s3638_s22 + $0x430] sm:$0x7] }
 0x1ec   : >> { %v1773_v63 = vmul.f32 %v6020_v29, %v3770_v58  ;;  %v1955_v40 = vmul.f32 %v5995_v17, %v3742_v44  ;;  %v2051_v13 = vmul.f32 %v5656_v23, %v3671_v6  ;;  %v2052_v60 = vmul.f32 %v5941_v47, %v3671_v6 }
 0x1ed   : >> { %v1942_v39 = vadd.f32 %v1930_v18, %v1905_v38  ;;  %v1943_v34 = vadd.f32 %v1931_v28, %v1906_v37  ;;  %v2063_v62 = vmul.f32 %v5674_v43, %v3681_v11  ;;  %v2064_v15 = vmul.f32 %v5944_v4, %v3681_v11 }
 0x1ee   : >> { %v2087_v32 = vmul.f32 %v5704_v7, %v3689_v16  ;;  %v2088_v14 = vmul.f32 %v5955_v53, %v3689_v16  ;;  %v6040_v2 = vadd.f32 %v1772_v51, %v1747_v26  ;;  %v1978_v47 = vmul.f32 %v6004_v59, %v3748_v46  ;;  %v3335_v51 = vld [vmem:[%s3638_s22 + $0x500] sm:$0xff] }
 0x1ef   : >> { %v1966_v23 = vadd.f32 %v1954_v57, %v1942_v39  ;;  %v2075_v21 = vadd.f32 %v2063_v62, %v2051_v13  ;;  %v2076_v61 = vadd.f32 %v2064_v15, %v2052_v60  ;;  %v2111_v52 = vmul.f32 %v5968_v9, %v3701_v22  ;;  %v3336_v57 = vld [vmem:[%s3638_s22 + $0x508] sm:$0x7] }
 0x1f0   : >> { %v2112_v5 = vmul.f32 %v5971_v35, %v3701_v22  ;;  %v6048_v19 = vadd.f32 %v1773_v63, %v1748_v56  ;;  %v1967_v42 = vadd.f32 %v1955_v40, %v1943_v34  ;;  %v1979_v41 = vmul.f32 %v6020_v29, %v3748_v46  ;;  %v3323_v35 = vld [vmem:[%s3638_s22 + $0x428] sm:$0xff] }
 0x1f1   : >> { %v2608_v48 = vld [vmem:[#allocation2 + $0xa0] sm:$0xff]  ;;  %v2135_v33 = vmul.f32 %v5985_v3, %v3715_v30  ;;  %v2099_v36 = vadd.f32 %v2087_v32, %v2075_v21  ;;  %v2100_v10 = vadd.f32 %v2088_v14, %v2076_v61  ;;  %v2136_v9 = vmul.f32 %v5995_v17, %v3715_v30 }
 0x1f2   : >> { %v3405_v27 = vpack.c.bf16 %v2546_v55, %v2608_v48  ;;  %v1990_v50 = vadd.f32 %v1978_v47, %v1966_v23  ;;  %v2015_v45 = vmul.f32 %v3311_v20, %v3770_v58  ;;  %v2016_v54 = vmul.f32 %v3312_v24, %v3770_v58  ;;  %v3348_v23 = vld [vmem:[%s3638_s22 + $0x5e0] sm:$0x7] }
 0x1f3   : >> { %v2159_v25 = vmul.f32 %v6004_v59, %v3718_v31  ;;  %v2123_v55 = vadd.f32 %v2111_v52, %v2099_v36  ;;  %v2124_v18 = vadd.f32 %v2112_v5, %v2100_v10  ;;  %v2160_v28 = vmul.f32 %v6020_v29, %v3718_v31 }
 0x1f4   : >> { %3406 = vmatpush1.bf16.msra.mxu0 %v3405_v27  ;;  %3432 = vmatpush1.bf16.msra.mxu1 %v3405_v27  ;;  %v1991_v26 = vadd.f32 %v1979_v41, %v1967_v42  ;;  %v2196_v38 = vmul.f32 %v3323_v35, %v3742_v44  ;;  %v2197_v37 = vmul.f32 %v3324_v0, %v3742_v44  ;;  %v3359_v35 = vld [vmem:[%s3638_s22 + $0x6b0] sm:$0xff] }
 0x1f5   : >> { %3407 = vmatprep.subr.bf16.mxu0 %v6227_v49  ;;  %3421 = vmatprep.subr.bf16.mxu1 %v6227_v49  ;;  %v2147_v56 = vadd.f32 %v2135_v33, %v2123_v55  ;;  %v2148_v63 = vadd.f32 %v2136_v9, %v2124_v18  ;;  %v2233_v40 = vmul.f32 %v3335_v51, %v3748_v46 }
 0x1f6   : >> { %v2306_v39 = vmul.f32 %v5674_v43, %v3671_v6  ;;  %v2307_v34 = vmul.f32 %v5944_v4, %v3671_v6  ;;  %v2318_v49 = vmul.f32 %v5704_v7, %v3681_v11  ;;  %v2319_v13 = vmul.f32 %v5955_v53, %v3681_v11  ;;  %v3347_v43 = vld [vmem:[%s3638_s22 + $0x5d8] sm:$0xff] }
 0x1f7   : >> { %v2342_v60 = vmul.f32 %v5734_v1, %v3689_v16  ;;  %v2171_v62 = vadd.f32 %v2159_v25, %v2147_v56  ;;  %v2172_v15 = vadd.f32 %v2160_v28, %v2148_v63  ;;  %v2234_v32 = vmul.f32 %v3336_v57, %v3748_v46 }
 0x1f8   : >> { %v2343_v14 = vmul.f32 %v6011_v12, %v3689_v16  ;;  %v2330_v47 = vadd.f32 %v2318_v49, %v2306_v39  ;;  %v2331_v6 = vadd.f32 %v2319_v13, %v2307_v34  ;;  %v2366_v7 = vmul.f32 %v5985_v3, %v3701_v22  ;;  %v2572_v39 = vld [vmem:[%s5638_s6] sm:$0xff]  ;;  %v2575_v49 = vld [vmem:[%s5638_s6 + $0x18] sm:$0xff] }
 0x1f9   : >> { %v2367_v11 = vmul.f32 %v5995_v17, %v3701_v22  ;;  %v2027_v4 = vadd.f32 %v2015_v45, %v1990_v50  ;;  %v2028_v53 = vadd.f32 %v2016_v54, %v1991_v26  ;;  %v2208_v1 = vadd.f32 %v2196_v38, %v2171_v62  ;;  %v2580_v34 = vld [vmem:[%s5638_s6 + $0x40] sm:$0xff]  ;;  %v2583_v13 = vld [vmem:[%s5638_s6 + $0x58] sm:$0xff]  ;;  %v2577_v62 = vld [vmem:[%s5638_s6 + $0x28] sm:$0xff] }
 0x1fa   : >> { %v2209_v21 = vadd.f32 %v2197_v37, %v2172_v15  ;;  %v2354_v61 = vadd.f32 %v2342_v60, %v2330_v47  ;;  %v2355_v52 = vadd.f32 %v2343_v14, %v2331_v6  ;;  %v2390_v5 = vmul.f32 %v6004_v59, %v3715_v30  ;;  %v2582_v60 = vld [vmem:[%s5638_s6 + $0x50] sm:$0xff]  ;;  %v2585_v15 = vld [vmem:[%s5638_s6 + $0x68] sm:$0xff]  ;;  %v2584_v14 = vld [vmem:[%s5638_s6 + $0x60] sm:$0xff] }
 0x1fb   : >> { %v2391_v16 = vmul.f32 %v6020_v29, %v3715_v30  ;;  %v2270_v12 = vmul.f32 %v3347_v43, %v3770_v58  ;;  %v2271_v3 = vmul.f32 %v3348_v23, %v3770_v58  ;;  %v2414_v22 = vmul.f32 %v3311_v20, %v3718_v31  ;;  %v2578_v47 = vld [vmem:[%s5638_s6 + $0x30] sm:$0xff] }
 0x1fc   : >> { %v2415_v17 = vmul.f32 %v3312_v24, %v3718_v31  ;;  %v2245_v48 = vadd.f32 %v2233_v40, %v2208_v1  ;;  %v2246_v42 = vadd.f32 %v2234_v32, %v2209_v21  ;;  %v2378_v41 = vadd.f32 %v2366_v7, %v2354_v61  ;;  %v3360_v31 = vld [vmem:[%s3638_s22 + $0x6b8] sm:$0x7]  ;;  %v2576_v32 = vld [vmem:[%s5638_s6 + $0x20] sm:$0xff]  ;;  %v2586_v6 = vld [vmem:[%s5638_s6 + $0x70] sm:$0xff] }
 0x1fd   : >> { %v2379_v33 = vadd.f32 %v2367_v11, %v2355_v52  ;;  %v2438_v59 = vmul.f32 %v3335_v51, %v3742_v44  ;;  %v2439_v30 = vmul.f32 %v3336_v57, %v3742_v44  ;;  %v2039_v29 = vmax.f32 %v6040_v2, %v2027_v4  ;;  %v2561_v7 = vld [vmem:[#allocation3] sm:$0xff] }
 0x1fe   : >> { %v2402_v27 = vadd.f32 %v2390_v5, %v2378_v41  ;;  %v2040_v10 = vmax.f32 %v6048_v19, %v2028_v53  ;;  %v2462_v9 = vmul.f32 %v3347_v43, %v3748_v46  ;;  %v2463_v20 = vmul.f32 %v3348_v23, %v3748_v46  ;;  %v2579_v43 = vld [vmem:[%s5638_s6 + $0x38] sm:$0xff]  ;;  %v2565_v11 = vld [vmem:[#allocation3 + $0x20] sm:$0xff]  ;;  %v2562_v5 = vld [vmem:[#allocation3 + $0x8] sm:$0xff] }
 0x1ff   : >> { %v2403_v36 = vadd.f32 %v2391_v16, %v2379_v33  ;;  %v2282_v24 = vadd.f32 %v2270_v12, %v2245_v48  ;;  %v2283_v0 = vadd.f32 %v2271_v3, %v2246_v42  ;;  %v2499_v51 = vmul.f32 %v3359_v35, %v3770_v58  ;;  %v2587_v23 = vld [vmem:[%s5638_s6 + $0x78] sm:$0xff]  ;;  %v2566_v16 = vld [vmem:[#allocation3 + $0x28] sm:$0xff]  ;;  %v2563_v41 = vld [vmem:[#allocation3 + $0x10] sm:$0xff] }
 0x200   : >> { %v2426_v50 = vadd.f32 %v2414_v22, %v2402_v27  ;;  %v2500_v44 = vmul.f32 %v3360_v31, %v3770_v58  ;;  %v2567_v33 = vld [vmem:[#allocation3 + $0x30] sm:$0xff] }
 0x201   : >> { %v2427_v45 = vadd.f32 %v2415_v17, %v2403_v36  ;;  %v2294_v55 = vmax.f32 %v2039_v29, %v2282_v24  ;;  %v2295_v2 = vmax.f32 %v2040_v10, %v2283_v0 }
 0x202   : >> { %v2450_v54 = vadd.f32 %v2438_v59, %v2426_v50 }
 0x203   : >> { %v2451_v25 = vadd.f32 %v2439_v30, %v2427_v45 }
 0x204   : >> { %v2474_v19 = vadd.f32 %v2462_v9, %v2450_v54  ;;  %v2564_v9 = vld [vmem:[#allocation3 + $0x18] sm:$0xff]  ;;  %v2768_v54 = vld [vmem:[%s6195_s4 + $0x10] sm:$0xff] (%p337_p5) }
 0x205   : >> { %v2475_v18 = vadd.f32 %v2463_v20, %v2451_v25  ;;  %v2568_v20 = vld [vmem:[#allocation3 + $0x38] sm:$0xff]  ;;  %v2766_v25 = vld [vmem:[%s6195_s4] sm:$0xff] (%p337_p5) }
 0x206   : >> { %v2511_v46 = vadd.f32 %v2499_v51, %v2474_v19  ;;  %v3535_v51 = vmov (%p337_p5), 0   ;;  %v2830_v19 = vld [vmem:[%s6196_s5] sm:$0xff] (%p337_p5) }
 0x207   : >> { %v2512_v28 = vadd.f32 %v2500_v44, %v2475_v18  ;;  %3476 = vset.pattern.permute.xlu1 (%p337_p5), %v3535_v51  ;;  %3475 = vset.pattern.permute.xlu0 (%p337_p5), %v3535_v51  ;;  %v2769_v44 = vld [vmem:[%s6195_s4 + $0x18] sm:$0xff] (%p337_p5)  ;;  %v2832_v18 = vld [vmem:[%s6196_s5 + $0x10] sm:$0xff] (%p337_p5) }
 0x208   : >> { %v2523_v26 = vmax.f32 %v2294_v55, %v2511_v46  ;;  %2786 = vperm.xlu1 (%p337_p5), %3476, %v2768_v54   ;;  %2776 = vperm.xlu0 (%p337_p5), %3475, %v2766_v25   ;;  %v2767_v55 = vld [vmem:[%s6195_s4 + $0x8] sm:$0xff] (%p337_p5)  ;;  %v2770_v46 = vld [vmem:[%s6195_s4 + $0x20] sm:$0xff] (%p337_p5) }
 0x209   : >> { %v2524_v38 = vmax.f32 %v2295_v2, %v2512_v28  ;;  %v2831_v2 = vld [vmem:[%s6196_s5 + $0x8] sm:$0xff] (%p337_p5)  ;;  %v2833_v28 = vld [vmem:[%s6196_s5 + $0x18] sm:$0xff] (%p337_p5) }
 0x20a   : >> { %v2535_v37 = vadd.f32 %v2523_v26, %v3674_v8  ;;  %v2771_v26 = vld [vmem:[%s6195_s4 + $0x28] sm:$0xff] (%p337_p5) }
 0x20b   : >> { %v2536_v57 = vadd.f32 %v2524_v38, %v3674_v8  ;;  %v2574_v8 = vld [vmem:[%s5638_s6 + $0x10] sm:$0xff]  ;;  %v2834_v38 = vld [vmem:[%s6196_s5 + $0x20] sm:$0xff] (%p337_p5) }
 0x20c   : >> { %v2547_v56 = vmax.f32 %v2535_v37, 0.0  ;;  %2791 = vperm.xlu1 (%p337_p5), %3476, %v2769_v44   ;;  %2781 = vperm.xlu0 (%p337_p5), %3475, %v2767_v55   ;;  %v2772_v37 = vld [vmem:[%s6195_s4 + $0x30] sm:$0xff] (%p337_p5) }
 0x20d   : >> { %v2548_v58 = vmax.f32 %v2536_v57, 0.0  ;;  %v2835_v57 = vld [vmem:[%s6196_s5 + $0x28] sm:$0xff] (%p337_p5) }
 0x20f   : >> { %2560 = vst [vmem:[#allocation2 + $0xb8] sm:$0x7] %v2548_v58  ;;  %v2837_v58 = vld [vmem:[%s6196_s5 + $0x38] sm:$0xff] (%p337_p5) }
 0x210   : > { %2845 = vperm.xlu1 (%p337_p5), %3476, %v2831_v2   ;;  %2840 = vperm.xlu0 (%p337_p5), %3475, %v2830_v19  }
 0x214   : > { %2850 = vperm.xlu1 (%p337_p5), %3476, %v2832_v18   ;;  %2796 = vperm.xlu0 (%p337_p5), %3475, %v2770_v46  }
 0x216   : >> { %v2611_v63 = vld [vmem:[#allocation2 + $0xb8] sm:$0xff] }
 0x217   : >> { %v3408_v40 = vpack.c.bf16 %v2611_v63, %v2547_v56  ;;  %v2773_v56 = vld [vmem:[%s6195_s4 + $0x38] sm:$0xff] (%p337_p5)  ;;  %v2836_v63 = vld [vmem:[%s6196_s5 + $0x30] sm:$0xff] (%p337_p5) }
 0x218   : > { %2855 = vperm.xlu1 (%p337_p5), %3476, %v2833_v28   ;;  %2801 = vperm.xlu0 (%p337_p5), %3475, %v2771_v26  }
 0x219   : >> { %3409 = vmatpush1.bf16.msra.mxu0 %v3408_v40  ;;  %3433 = vmatpush1.bf16.msra.mxu1 %v3408_v40 }
 0x21c   : >> { %2702 = vmatmul.mubr.f32.vlgmr.msra.gmra.mrb[0].mxu0 %v2572_v39  ;;  %2722 = vmatmul.mubr.f32.vlgmr.msra.gmra.mrb[0].mxu1 %v2580_v34 }
 0x21d   : >> { %3364 = vmatprep.mubr.msk.f32.mxu0 %vm2612_vm0, %v2575_v49  ;;  %3368 = vmatprep.mubr.msk.f32.mxu1 %vm2612_vm0, %v2583_v13 }
 0x21e   : > { %2860 = vperm.xlu1 (%p337_p5), %3476, %v2834_v38   ;;  %2806 = vperm.xlu0 (%p337_p5), %3475, %v2772_v37  }
 0x220   : >> { %2707 = vmatmul.mubr.f32.gmra.mrb[2].mxu0 %v2574_v8  ;;  %2727 = vmatmul.mubr.f32.gmra.mrb[2].mxu1 %v2582_v60 }
 0x221   : >> { %3365 = vmatprep.mubr.msk.f32.mxu0 %vm2612_vm0, %v2577_v62  ;;  %3369 = vmatprep.mubr.msk.f32.mxu1 %vm2612_vm0, %v2585_v15 }
 0x222   : > { %2865 = vperm.xlu1 (%p337_p5), %3476, %v2835_v57   ;;  %2811 = vperm.xlu0 (%p337_p5), %3475, %v2773_v56   ;;  %v2900_v57 = vstv (%p337_p5), %s2899_s15 }
 0x224   : >> { %2712 = vmatmul.mubr.f32.gmra.mrb[4].mxu0 %v2576_v32  ;;  %2732 = vmatmul.mubr.f32.gmra.mrb[4].mxu1 %v2584_v14 }
 0x225   : >> { %3366 = vmatprep.mubr.msk.f32.mxu0 %vm2612_vm0, %v2579_v43  ;;  %3370 = vmatprep.mubr.msk.f32.mxu1 %vm2612_vm0, %v2587_v23 }
 0x226   : > { %2875 = vperm.xlu1 (%p337_p5), %3476, %v2837_v58   ;;  %2870 = vperm.xlu0 (%p337_p5), %3475, %v2836_v63  }
 0x228   : >> { %2717 = vmatmul.mubr.f32.gmra.mrb[6].mxu0 %v2578_v47  ;;  %2737 = vmatmul.mubr.f32.gmra.mrb[6].mxu1 %v2586_v6 }
 0x287   : > { %v2787_v40 = vpop.permute.xlu1 (%p337_p5), %2786  ;;  %v2777_v39 = vpop.permute.xlu0 (%p337_p5), %2776 }
 0x28b   : > { %v2792_v34 = vpop.permute.xlu1 (%p337_p5), %2791  ;;  %v2782_v49 = vpop.permute.xlu0 (%p337_p5), %2781 }
 0x28f   : > { %v2846_v60 = vpop.permute.xlu1 (%p337_p5), %2845  ;;  %v2841_v62 = vpop.permute.xlu0 (%p337_p5), %2840 }
 0x293   : > { %v2851_v23 = vpop.permute.xlu1 (%p337_p5), %2850  ;;  %v2797_v47 = vpop.permute.xlu0 (%p337_p5), %2796 }
 0x2ef   : >> { %v2703_v4 = vpop.f32.mrb[0].mxu0  ;;  %v2723_v53 = vpop.f32.mrb[0].mxu1 }
 0x2f0   : >> { %v2742_v1 = vadd.f32 %v2703_v4, %v2561_v7  ;;  %v2746_v21 = vadd.f32 %v2723_v53, %v2565_v11  ;;  %v2705_v61 = vpop.f32.mrb[1].mxu0  ;;  %v2725_v52 = vpop.f32.mrb[1].mxu1 }
 0x2f2   : >> { %2750 = vst [vmem:[#allocation3] sm:$0xff] %v2742_v1  ;;  %2754 = vst [vmem:[#allocation3 + $0x20] sm:$0xff] %v2746_v21  ;;  %v2856_v1 = vpop.permute.xlu1 (%p337_p5), %2855  ;;  %v2802_v21 = vpop.permute.xlu0 (%p337_p5), %2801 }
 0x2f3   : >> { %v2708_v12 = vpop.f32.mrb[2].mxu0  ;;  %v2728_v3 = vpop.f32.mrb[2].mxu1 }
 0x2f4   : >> { %v2743_v22 = vadd.f32 %v2708_v12, %v2562_v5  ;;  %v2747_v17 = vadd.f32 %v2728_v3, %v2566_v16  ;;  %v2710_v48 = vpop.f32.mrb[3].mxu0  ;;  %v2730_v42 = vpop.f32.mrb[3].mxu1 }
 0x2f6   : >> { %2751 = vst [vmem:[#allocation3 + $0x8] sm:$0xff] %v2743_v22  ;;  %2755 = vst [vmem:[#allocation3 + $0x28] sm:$0xff] %v2747_v17  ;;  %v2861_v48 = vpop.permute.xlu1 (%p337_p5), %2860  ;;  %v2807_v42 = vpop.permute.xlu0 (%p337_p5), %2806 }
 0x2f7   : >> { %v2713_v27 = vpop.f32.mrb[4].mxu0  ;;  %v2733_v36 = vpop.f32.mrb[4].mxu1 }
 0x2f8   : >> { %v2744_v59 = vadd.f32 %v2713_v27, %v2563_v41  ;;  %v2748_v30 = vadd.f32 %v2733_v36, %v2567_v33  ;;  %v2715_v29 = vpop.f32.mrb[5].mxu0  ;;  %v2735_v10 = vpop.f32.mrb[5].mxu1  ;;  %339 = sbr.rel (!%p337_p5) target bundleno = 59 (0x3b), region = 126 }
 0x2f9   : > { %v2758_v8 = vld [vmem:[#allocation3] sm:$0xff] (%p337_p5) }
 0x2fa   : >> { %2752 = vst [vmem:[#allocation3 + $0x10] sm:$0xff] %v2744_v59  ;;  %2756 = vst [vmem:[#allocation3 + $0x30] sm:$0xff] %v2748_v30  ;;  %v2814_v14 = vadd.f32 (%p337_p5), %v2777_v39, %v2758_v8  ;;  %v2762_v11 = vld [vmem:[#allocation3 + $0x20] sm:$0xff] (%p337_p5) }
 0x2fb   : >> { %v2718_v35 = vpop.f32.mrb[6].mxu0  ;;  %v2738_v31 = vpop.f32.mrb[6].mxu1  ;;  %v2818_v12 = vadd.f32 (%p337_p5), %v2797_v47, %v2762_v11 }
 0x2fc   : >> { %v2745_v24 = vadd.f32 %v2718_v35, %v2564_v9  ;;  %v2749_v0 = vadd.f32 %v2738_v31, %v2568_v20  ;;  %v2720_v50 = vpop.f32.mrb[7].mxu0  ;;  %v2740_v45 = vpop.f32.mrb[7].mxu1  ;;  %v2822_v4 = vmax.f32 (%p337_p5), %v2814_v14, 0.0 }
 0x2fd   : > { %v2759_v13 = vld [vmem:[#allocation3 + $0x8] sm:$0xff] (%p337_p5)  ;;  %v2826_v27 = vmax.f32 (%p337_p5), %v2818_v12, 0.0  ;;  %v2866_v20 = vpop.permute.xlu1 (%p337_p5), %2865  ;;  %v2812_v35 = vpop.permute.xlu0 (%p337_p5), %2811 }
 0x2fe   : >> { %2753 = vst [vmem:[#allocation3 + $0x18] sm:$0xff] %v2745_v24  ;;  %2757 = vst [vmem:[#allocation3 + $0x38] sm:$0xff] %v2749_v0  ;;  %v2815_v15 = vadd.f32 (%p337_p5), %v2782_v49, %v2759_v13  ;;  %v2763_v61 = vld [vmem:[#allocation3 + $0x28] sm:$0xff] (%p337_p5)  ;;  %v2878_v16 = vmul.f32 (%p337_p5), %v2841_v62, %v2822_v4 }
 0x2ff   : > { %v2819_v17 = vadd.f32 %v2802_v21, %v2763_v61  ;;  %v2882_v10 = vmul.f32 %v2861_v48, %v2826_v27 }
 0x300   : > { %v2823_v7 = vmax.f32 %v2815_v15, 0.0 }
 0x301   : > { %v2760_v32 = vld [vmem:[#allocation3 + $0x10] sm:$0xff]  ;;  %v2827_v29 = vmax.f32 %v2819_v17, 0.0  ;;  %v2876_v25 = vpop.permute.xlu1 %2875  ;;  %v2871_v51 = vpop.permute.xlu0 %2870 }
 0x302   : > { %v2816_v6 = vadd.f32 %v2787_v40, %v2760_v32  ;;  %v2879_v5 = vmul.f32 %v2846_v60, %v2823_v7  ;;  %v2764_v41 = vld [vmem:[#allocation3 + $0x30] sm:$0xff] }
 0x303   : > { %v2820_v9 = vadd.f32 %v2807_v42, %v2764_v41  ;;  %v2883_v24 = vmul.f32 %v2866_v20, %v2827_v29 }
 0x304   : > { %v2824_v52 = vmax.f32 %v2816_v6, 0.0  ;;  %v2886_v33 = vadd.f32 %v2879_v5, %v2878_v16 }
 0x305   : > { %v2761_v43 = vld [vmem:[#allocation3 + $0x18] sm:$0xff]  ;;  %v2828_v45 = vmax.f32 %v2820_v9, 0.0 }
 0x306   : > { %v2817_v53 = vadd.f32 %v2792_v34, %v2761_v43  ;;  %v2880_v22 = vmul.f32 %v2851_v23, %v2824_v52  ;;  %v2765_v59 = vld [vmem:[#allocation3 + $0x38] sm:$0xff] }
 0x307   : > { %v2821_v0 = vadd.f32 %v2812_v35, %v2765_v59  ;;  %v2884_v55 = vmul.f32 %v2871_v51, %v2828_v45 }
 0x308   : > { %v2825_v3 = vmax.f32 %v2817_v53, 0.0  ;;  %v2887_v30 = vadd.f32 %v2886_v33, %v2880_v22 }
 0x309   : > { %v2829_v54 = vmax.f32 %v2821_v0, 0.0 }
 0x30a   : > { %v2881_v36 = vmul.f32 %v2856_v1, %v2825_v3 }
 0x30b   : > { %v2885_v2 = vmul.f32 %v2876_v25, %v2829_v54 }
 0x30c   : > { %v2888_v31 = vadd.f32 %v2887_v30, %v2881_v36 }
 0x30e   : > { %v2889_v50 = vadd.f32 %v2888_v31, %v2882_v10 }
 0x310   : > { %v2890_v44 = vadd.f32 %v2889_v50, %v2883_v24 }
 0x312   : > { %v2891_v19 = vadd.f32 %v2890_v44, %v2884_v55 }
 0x314   : > { %v2892_v18 = vadd.f32 %v2891_v19, %v2885_v2 }
 0x316   : > { %v2893_v46 = vrot.slane %v2892_v18, 4 }
 0x318   : > { %v2894_v28 = vadd.f32 %v2893_v46, %v2892_v18 }
 0x31a   : > { %v2895_v26 = vrot.slane %v2894_v28, 2 }
 0x31c   : > { %v2896_v38 = vadd.f32 %v2895_v26, %v2894_v28 }
 0x31e   : > { %v2897_v37 = vrot.slane %v2896_v38, 1 }
 0x320   : > { %v2898_v56 = vadd.f32 %v2897_v37, %v2896_v38 }
 0x322   : > { %v2901_v58 = vadd.f32 %v2900_v57, %v2898_v56 }
 0x324   : > { %2902 = vst [vmem:[%s302_s19] sm:$0x1] %v2901_v58 }
 0x325 PF: > { %s20_s26 = sadd.s32 1, %s3525_s26  }
 0x326   : > { %p17_p12 = scmp.ge.s32.totalorder %s20_s26, 4  }
 0x328   :  { %19 = sbr.rel (!%p17_p12) target bundleno = 4 (0x4), region = 137 }
 0x32f   :  { %2920 = vsyncpa [#allocation6], 1 }
 0x330   :  { %2922 = vsyncpa [#allocation6 + $0x1], 1 }
 0x331   :  { %2923 = vsyncpa [#allocation8], 1 }

</bundles_post_ra>
